<compile_context>
chip_gen: v7x
topology: tpu7x:2x2x1
jax: 0.10.0
libtpu: 0.0.40
codegen_flags: <defaults>
</compile_context>

<pallas_src>
import jax
import jax.numpy as jnp
from jax.experimental import pallas as pl
from jax.experimental.pallas import tpu as pltpu

# ---- model config ----
B, T, IN_DIM = 2, 8, 32          # batch, enc_steps, input feature dim
D, HEADS, HIDDEN, DEPTH = 32, 4, 64, 2
HD = D // HEADS                  # head dim = 8
L = T + 1                        # real sequence length (frames + cls) = 9
LPAD = 16                        # padded sequence length (sublane multiple)
LN_EPS = 1e-5                    # nn.LayerNorm default
LANES = 128

# ---- packed parameter slab layout (rows; data starts at lane 0) ----
R_WENC   = 0                       # (IN_DIM, D)         linear_encoding weight
R_FBIAS  = R_WENC + IN_DIM         # (T, D)              b_enc + pos[0:T]
R_CLSPAD = R_FBIAS + T             # (LPAD - T, D)       row0 = cls + pos[T], rest 0
R_LAYER0 = R_CLSPAD + (LPAD - T)   # per-layer blocks start here
# per-layer field offsets (all 8-row aligned)
L_LN1   = 0                        # 2 rows: gamma, beta            lanes [0:D)
L_WQKV  = 8                        # D rows                         lanes [0:3D)
L_WPROJ = L_WQKV + D               # D rows                         lanes [0:D)
L_BPROJ = L_WPROJ + D              # 1 row                          lanes [0:D)
L_LN2   = L_BPROJ + 8              # 2 rows: gamma, beta            lanes [0:D)
L_W1    = L_LN2 + 8                # D rows                         lanes [0:HIDDEN)
L_B1    = L_W1 + D                 # 1 row                          lanes [0:HIDDEN)
L_W2    = L_B1 + 8                 # HIDDEN rows                    lanes [0:D)
L_B2    = L_W2 + HIDDEN            # 1 row                          lanes [0:D)
L_ROWS  = L_B2 + 8 - 1             # round the layer block up to 8-row alignment
L_ROWS  = ((L_B2 + 1 + 7) // 8) * 8
P_ROWS  = R_LAYER0 + DEPTH * L_ROWS


def _layernorm(x, g, b):
    # two-pass variance (robust; review flagged E[x^2]-mu^2 cancellation)
    mu = jnp.mean(x, axis=-1, keepdims=True)
    xc = x - mu
    var = jnp.mean(xc * xc, axis=-1, keepdims=True)
    return xc * jax.lax.rsqrt(var + LN_EPS) * g + b


def _gelu(x):
    # TODO(synk): PyTorch nn.GELU default is exact erf GELU; tanh approximation used
    # because erf lowering support in Mosaic is not guaranteed (~1e-3 divergence).
    c = 0.7978845608028654  # sqrt(2/pi)
    return 0.5 * x * (1.0 + jnp.tanh(c * (x + 0.044715 * x * x * x)))


def video_transformer_kernel(x_ref, p_ref, o_ref):
    # ---- linear_encoding for the whole batch at once: (B*T, IN_DIM) @ (IN_DIM, D) ----
    # TODO(synk): default matmul precision; set precision=HIGHEST for bit-level
    # agreement with PyTorch fp32 matmuls.
    w_enc = p_ref[R_WENC:R_WENC + IN_DIM, :D]
    enc = jnp.dot(x_ref[...], w_enc, preferred_element_type=jnp.float32)   # (B*T, D)

    fbias = p_ref[R_FBIAS:R_FBIAS + T, :D]                   # b_enc + pos[0:T]   (T, D)
    clspad = p_ref[R_CLSPAD:R_CLSPAD + (LPAD - T), :D]       # cls+pos[T], zeros  (8, D)

    # ---- build padded (B*LPAD, D) sequence slab: frames | cls | zero padding ----
    blocks = []
    for bi in range(B):
        blocks.append(enc[bi * T:(bi + 1) * T, :] + fbias)   # (T, D)
        blocks.append(clspad)                                # (LPAD - T, D)
    x = jnp.concatenate(blocks, axis=0)                      # (B*LPAD, D) = (32, 32)

    # key-padding mask: padded key columns get a large negative additive bias
    key_idx = jax.lax.broadcasted_iota(jnp.int32, (LPAD, LPAD), 1)
    kmask = jnp.where(key_idx >= L, jnp.float32(-1e30), jnp.float32(0.0))

    for l in range(DEPTH):                                   # unrolled, static offsets
        base = R_LAYER0 + l * L_ROWS

        # ---- Residual(PreNormDrop(SelfAttention)) ----
        ln1 = p_ref[base + L_LN1:base + L_LN1 + 2, :D]       # gamma, beta
        h = _layernorm(x, ln1[0:1, :], ln1[1:2, :])
        w_qkv = p_ref[base + L_WQKV:base + L_WQKV + D, :3 * D]   # (D, 3D), Q pre-scaled
        qkv = jnp.dot(h, w_qkv, preferred_element_type=jnp.float32)  # (B*LPAD, 3D)

        heads_all = []
        for bi in range(B):
            r0 = bi * LPAD
            per_head = []
            for hh in range(HEADS):
                q = qkv[r0:r0 + LPAD, hh * HD:(hh + 1) * HD]               # (LPAD, HD)
                k = qkv[r0:r0 + LPAD, D + hh * HD:D + (hh + 1) * HD]
                v = qkv[r0:r0 + LPAD, 2 * D + hh * HD:2 * D + (hh + 1) * HD]
                s = jax.lax.dot_general(q, k, (((1,), (1,)), ((), ())),
                                        preferred_element_type=jnp.float32) + kmask
                s = s - jnp.max(s, axis=-1, keepdims=True)
                e = jnp.exp(s)
                probs = e / jnp.sum(e, axis=-1, keepdims=True)             # exact divide
                per_head.append(jnp.dot(probs, v,
                                        preferred_element_type=jnp.float32))  # (LPAD, HD)
            heads_all.append(jnp.concatenate(per_head, axis=1))            # (LPAD, D)
        attn = jnp.concatenate(heads_all, axis=0)                          # (B*LPAD, D)

        w_proj = p_ref[base + L_WPROJ:base + L_WPROJ + D, :D]
        b_proj = p_ref[base + L_BPROJ:base + L_BPROJ + 1, :D]
        x = x + jnp.dot(attn, w_proj, preferred_element_type=jnp.float32) + b_proj

        # ---- Residual(PreNorm(FeedForward)) ----
        ln2 = p_ref[base + L_LN2:base + L_LN2 + 2, :D]
        h = _layernorm(x, ln2[0:1, :], ln2[1:2, :])
        w1 = p_ref[base + L_W1:base + L_W1 + D, :HIDDEN]
        bias1 = p_ref[base + L_B1:base + L_B1 + 1, :HIDDEN]
        h = _gelu(jnp.dot(h, w1, preferred_element_type=jnp.float32) + bias1)
        w2 = p_ref[base + L_W2:base + L_W2 + HIDDEN, :D]
        bias2 = p_ref[base + L_B2:base + L_B2 + 1, :D]
        x = x + jnp.dot(h, w2, preferred_element_type=jnp.float32) + bias2

    # ---- cls token is at row T of each batch block; single (B, D) store ----
    o_ref[...] = jnp.concatenate(
        [x[bi * LPAD + T:bi * LPAD + T + 1, :] for bi in range(B)], axis=0)


def video_transformer(x, packed_params):
    vmem = pl.BlockSpec(memory_space=pltpu.MemorySpace.VMEM)
    x2 = x.reshape(B * T, IN_DIM)                 # fold batch into rows (wrapper-side)
    return pl.pallas_call(
        video_transformer_kernel,
        out_shape=jax.ShapeDtypeStruct((B, D), jnp.float32),
        in_specs=[vmem, vmem],
        out_specs=vmem,
    )(x2, packed_params)


def init_params():
    key = jax.random.PRNGKey(0)
    keys = list(jax.random.split(key, 4 + DEPTH * 9 + 1))
    ki = iter(keys)

    def norm(k, shape, scale=0.02):
        return (scale * jax.random.normal(k, shape)).astype(jnp.float32)

    w_enc = norm(next(ki), (IN_DIM, D))           # linear_encoding weight
    b_enc = norm(next(ki), (D,))                  # linear_encoding bias
    cls = norm(next(ki), (D,))                    # cls token
    pos = norm(next(ki), (L, D))                  # learned positional embedding

    # ---- pack everything into ONE lane-dense (P_ROWS, 128) f32 slab (one-time) ----
    P = jnp.zeros((P_ROWS, LANES), jnp.float32)
    P = P.at[R_WENC:R_WENC + IN_DIM, :D].set(w_enc)
    P = P.at[R_FBIAS:R_FBIAS + T, :D].set(pos[:T] + b_enc[None, :])
    P = P.at[R_CLSPAD, :D].set(cls + pos[T])      # rows R_CLSPAD+1.. stay zero (padding)

    scale = 1.0 / (HD ** 0.5)
    for l in range(DEPTH):
        base = R_LAYER0 + l * L_ROWS
        P = P.at[base + L_LN1, :D].set(jnp.ones((D,), jnp.float32))       # ln1 gamma
        # ln1 beta row stays zero
        wq = norm(next(ki), (D, D)) * scale       # attention scale folded into Wq
        wk = norm(next(ki), (D, D))
        wv = norm(next(ki), (D, D))
        P = P.at[base + L_WQKV:base + L_WQKV + D, :3 * D].set(
            jnp.concatenate([wq, wk, wv], axis=1))
        P = P.at[base + L_WPROJ:base + L_WPROJ + D, :D].set(norm(next(ki), (D, D)))
        P = P.at[base + L_BPROJ, :D].set(norm(next(ki), (D,)))
        P = P.at[base + L_LN2, :D].set(jnp.ones((D,), jnp.float32))       # ln2 gamma
        # ln2 beta row stays zero
        P = P.at[base + L_W1:base + L_W1 + D, :HIDDEN].set(norm(next(ki), (D, HIDDEN)))
        P = P.at[base + L_B1, :HIDDEN].set(norm(next(ki), (HIDDEN,)))
        P = P.at[base + L_W2:base + L_W2 + HIDDEN, :D].set(norm(next(ki), (HIDDEN, D)))
        P = P.at[base + L_B2, :D].set(norm(next(ki), (D,)))

    x = jax.random.normal(next(ki), (B, T, IN_DIM), dtype=jnp.float32)
    return x, P


if __name__ == "__main__":
    x, packed = init_params()
    out = video_transformer(x, packed)
    out = jax.block_until_ready(out)
    assert out.shape == (B, D), out.shape
    assert jnp.all(jnp.isfinite(out))
    print("KERNEL_OK")
</pallas_src>

<mosaic_0001>
module attributes {stable_mosaic.version = 11 : i64} {
  func.func @video_transformer_kernel(%arg0: memref<16x32xf32, #tpu.memory_space<vmem>>, %arg1: memref<448x128xf32, #tpu.memory_space<vmem>>, %arg2: memref<2x32xf32, #tpu.memory_space<vmem>>) attributes {dimension_semantics = [], scalar_prefetch = 0 : i64, scratch_operands = 0 : i64, tpu.core_type = #tpu.core_type<tc>} {
    %c0 = arith.constant 0 : index
    %c0_0 = arith.constant 0 : index
    %0 = vector.load %arg1[%c0, %c0_0] : memref<448x128xf32, #tpu.memory_space<vmem>>, vector<32x32xf32>
    %c0_1 = arith.constant 0 : index
    %c0_2 = arith.constant 0 : index
    %1 = vector.load %arg0[%c0_1, %c0_2] : memref<16x32xf32, #tpu.memory_space<vmem>>, vector<16x32xf32>
    %cst = arith.constant dense<0.000000e+00> : vector<16x32xf32>
    %2 = tpu.matmul %1, %0, %cst {dimension_numbers = #tpu.dot_dimension_numbers<[1], [0], [0], [1], [0, 0, 1, 1], [], []>} : vector<16x32xf32>, vector<32x32xf32>, vector<16x32xf32> -> vector<16x32xf32>
    %c32 = arith.constant 32 : index
    %c0_3 = arith.constant 0 : index
    %3 = vector.load %arg1[%c32, %c0_3] : memref<448x128xf32, #tpu.memory_space<vmem>>, vector<8x32xf32>
    %c40 = arith.constant 40 : index
    %c0_4 = arith.constant 0 : index
    %4 = vector.load %arg1[%c40, %c0_4] : memref<448x128xf32, #tpu.memory_space<vmem>>, vector<8x32xf32>
    %5 = vector.extract_strided_slice %2 {offsets = [0, 0], sizes = [8, 32], strides = [1, 1]} : vector<16x32xf32> to vector<8x32xf32>
    %6 = arith.addf %5, %3 : vector<8x32xf32>
    %7 = vector.extract_strided_slice %2 {offsets = [8, 0], sizes = [8, 32], strides = [1, 1]} : vector<16x32xf32> to vector<8x32xf32>
    %8 = arith.addf %7, %3 : vector<8x32xf32>
    %9 = tpu.concatenate %6, %4, %8, %4 in 0 : vector<8x32xf32>, vector<8x32xf32>, vector<8x32xf32>, vector<8x32xf32> -> vector<32x32xf32>
    %10 = tpu.iota {dimensions = array<i32: 1>} : vector<16x16xi32>
    %c9_i32 = arith.constant 9 : i32
    %11 = vector.broadcast %c9_i32 : i32 to vector<16x16xi32>
    %12 = arith.cmpi sge, %10, %11 : vector<16x16xi32>
    %cst_5 = arith.constant -1.000000e+30 : f32
    %cst_6 = arith.constant 0.000000e+00 : f32
    %13 = vector.broadcast %cst_5 : f32 to vector<16x16xf32>
    %14 = vector.broadcast %cst_6 : f32 to vector<16x16xf32>
    %15 = arith.select %12, %13, %14 : vector<16x16xi1>, vector<16x16xf32>
    %c48 = arith.constant 48 : index
    %c0_7 = arith.constant 0 : index
    %16 = vector.load %arg1[%c48, %c0_7] : memref<448x128xf32, #tpu.memory_space<vmem>>, vector<2x32xf32>
    %17 = vector.extract_strided_slice %16 {offsets = [0, 0], sizes = [1, 32], strides = [1, 1]} : vector<2x32xf32> to vector<1x32xf32>
    %18 = vector.extract_strided_slice %16 {offsets = [1, 0], sizes = [1, 32], strides = [1, 1]} : vector<2x32xf32> to vector<1x32xf32>
    %cst_8 = arith.constant dense<0.000000e+00> : vector<32xf32>
    %19 = vector.multi_reduction <add>, %9, %cst_8 [1] : vector<32x32xf32> to vector<32xf32>
    %20 = vector.shape_cast %19 : vector<32xf32> to vector<32x1xf32>
    %cst_9 = arith.constant 3.200000e+01 : f32
    %21 = vector.broadcast %cst_9 : f32 to vector<32x1xf32>
    %22 = arith.divf %20, %21 : vector<32x1xf32>
    %23 = vector.broadcast %22 : vector<32x1xf32> to vector<32x32xf32>
    %24 = arith.subf %9, %23 : vector<32x32xf32>
    %25 = arith.mulf %24, %24 : vector<32x32xf32>
    %cst_10 = arith.constant dense<0.000000e+00> : vector<32xf32>
    %26 = vector.multi_reduction <add>, %25, %cst_10 [1] : vector<32x32xf32> to vector<32xf32>
    %27 = vector.shape_cast %26 : vector<32xf32> to vector<32x1xf32>
    %cst_11 = arith.constant 3.200000e+01 : f32
    %28 = vector.broadcast %cst_11 : f32 to vector<32x1xf32>
    %29 = arith.divf %27, %28 : vector<32x1xf32>
    %cst_12 = arith.constant 9.99999974E-6 : f32
    %30 = vector.broadcast %cst_12 : f32 to vector<32x1xf32>
    %31 = arith.addf %29, %30 : vector<32x1xf32>
    %32 = math.rsqrt %31 : vector<32x1xf32>
    %33 = vector.broadcast %32 : vector<32x1xf32> to vector<32x32xf32>
    %34 = arith.mulf %24, %33 : vector<32x32xf32>
    %35 = vector.broadcast %17 : vector<1x32xf32> to vector<32x32xf32>
    %36 = arith.mulf %34, %35 : vector<32x32xf32>
    %37 = vector.broadcast %18 : vector<1x32xf32> to vector<32x32xf32>
    %38 = arith.addf %36, %37 : vector<32x32xf32>
    %c56 = arith.constant 56 : index
    %c0_13 = arith.constant 0 : index
    %39 = vector.load %arg1[%c56, %c0_13] : memref<448x128xf32, #tpu.memory_space<vmem>>, vector<32x96xf32>
    %cst_14 = arith.constant dense<0.000000e+00> : vector<32x96xf32>
    %40 = tpu.matmul %38, %39, %cst_14 {dimension_numbers = #tpu.dot_dimension_numbers<[1], [0], [0], [1], [0, 0, 1, 1], [], []>} : vector<32x32xf32>, vector<32x96xf32>, vector<32x96xf32> -> vector<32x96xf32>
    %41 = vector.extract_strided_slice %40 {offsets = [0, 0], sizes = [16, 8], strides = [1, 1]} : vector<32x96xf32> to vector<16x8xf32>
    %42 = vector.extract_strided_slice %40 {offsets = [0, 32], sizes = [16, 8], strides = [1, 1]} : vector<32x96xf32> to vector<16x8xf32>
    %43 = vector.extract_strided_slice %40 {offsets = [0, 64], sizes = [16, 8], strides = [1, 1]} : vector<32x96xf32> to vector<16x8xf32>
    %cst_15 = arith.constant dense<0.000000e+00> : vector<16x16xf32>
    %44 = tpu.matmul %41, %42, %cst_15 {dimension_numbers = #tpu.dot_dimension_numbers<[1], [1], [0], [0], [0, 0, 1, 0], [], []>} : vector<16x8xf32>, vector<16x8xf32>, vector<16x16xf32> -> vector<16x16xf32>
    %45 = arith.addf %44, %15 : vector<16x16xf32>
    %cst_16 = arith.constant dense<0xFF800000> : vector<16xf32>
    %46 = vector.multi_reduction <maximumf>, %45, %cst_16 [1] : vector<16x16xf32> to vector<16xf32>
    %47 = vector.shape_cast %46 : vector<16xf32> to vector<16x1xf32>
    %48 = vector.broadcast %47 : vector<16x1xf32> to vector<16x16xf32>
    %49 = arith.subf %45, %48 : vector<16x16xf32>
    %50 = math.exp %49 : vector<16x16xf32>
    %cst_17 = arith.constant dense<0.000000e+00> : vector<16xf32>
    %51 = vector.multi_reduction <add>, %50, %cst_17 [1] : vector<16x16xf32> to vector<16xf32>
    %52 = vector.shape_cast %51 : vector<16xf32> to vector<16x1xf32>
    %53 = vector.broadcast %52 : vector<16x1xf32> to vector<16x16xf32>
    %54 = arith.divf %50, %53 : vector<16x16xf32>
    %cst_18 = arith.constant dense<0.000000e+00> : vector<16x8xf32>
    %55 = tpu.matmul %54, %43, %cst_18 {dimension_numbers = #tpu.dot_dimension_numbers<[1], [0], [0], [1], [0, 0, 1, 1], [], []>} : vector<16x16xf32>, vector<16x8xf32>, vector<16x8xf32> -> vector<16x8xf32>
    %56 = vector.extract_strided_slice %40 {offsets = [0, 8], sizes = [16, 8], strides = [1, 1]} : vector<32x96xf32> to vector<16x8xf32>
    %57 = vector.extract_strided_slice %40 {offsets = [0, 40], sizes = [16, 8], strides = [1, 1]} : vector<32x96xf32> to vector<16x8xf32>
    %58 = vector.extract_strided_slice %40 {offsets = [0, 72], sizes = [16, 8], strides = [1, 1]} : vector<32x96xf32> to vector<16x8xf32>
    %cst_19 = arith.constant dense<0.000000e+00> : vector<16x16xf32>
    %59 = tpu.matmul %56, %57, %cst_19 {dimension_numbers = #tpu.dot_dimension_numbers<[1], [1], [0], [0], [0, 0, 1, 0], [], []>} : vector<16x8xf32>, vector<16x8xf32>, vector<16x16xf32> -> vector<16x16xf32>
    %60 = arith.addf %59, %15 : vector<16x16xf32>
    %cst_20 = arith.constant dense<0xFF800000> : vector<16xf32>
    %61 = vector.multi_reduction <maximumf>, %60, %cst_20 [1] : vector<16x16xf32> to vector<16xf32>
    %62 = vector.shape_cast %61 : vector<16xf32> to vector<16x1xf32>
    %63 = vector.broadcast %62 : vector<16x1xf32> to vector<16x16xf32>
    %64 = arith.subf %60, %63 : vector<16x16xf32>
    %65 = math.exp %64 : vector<16x16xf32>
    %cst_21 = arith.constant dense<0.000000e+00> : vector<16xf32>
    %66 = vector.multi_reduction <add>, %65, %cst_21 [1] : vector<16x16xf32> to vector<16xf32>
    %67 = vector.shape_cast %66 : vector<16xf32> to vector<16x1xf32>
    %68 = vector.broadcast %67 : vector<16x1xf32> to vector<16x16xf32>
    %69 = arith.divf %65, %68 : vector<16x16xf32>
    %cst_22 = arith.constant dense<0.000000e+00> : vector<16x8xf32>
    %70 = tpu.matmul %69, %58, %cst_22 {dimension_numbers = #tpu.dot_dimension_numbers<[1], [0], [0], [1], [0, 0, 1, 1], [], []>} : vector<16x16xf32>, vector<16x8xf32>, vector<16x8xf32> -> vector<16x8xf32>
    %71 = vector.extract_strided_slice %40 {offsets = [0, 16], sizes = [16, 8], strides = [1, 1]} : vector<32x96xf32> to vector<16x8xf32>
    %72 = vector.extract_strided_slice %40 {offsets = [0, 48], sizes = [16, 8], strides = [1, 1]} : vector<32x96xf32> to vector<16x8xf32>
    %73 = vector.extract_strided_slice %40 {offsets = [0, 80], sizes = [16, 8], strides = [1, 1]} : vector<32x96xf32> to vector<16x8xf32>
    %cst_23 = arith.constant dense<0.000000e+00> : vector<16x16xf32>
    %74 = tpu.matmul %71, %72, %cst_23 {dimension_numbers = #tpu.dot_dimension_numbers<[1], [1], [0], [0], [0, 0, 1, 0], [], []>} : vector<16x8xf32>, vector<16x8xf32>, vector<16x16xf32> -> vector<16x16xf32>
    %75 = arith.addf %74, %15 : vector<16x16xf32>
    %cst_24 = arith.constant dense<0xFF800000> : vector<16xf32>
    %76 = vector.multi_reduction <maximumf>, %75, %cst_24 [1] : vector<16x16xf32> to vector<16xf32>
    %77 = vector.shape_cast %76 : vector<16xf32> to vector<16x1xf32>
    %78 = vector.broadcast %77 : vector<16x1xf32> to vector<16x16xf32>
    %79 = arith.subf %75, %78 : vector<16x16xf32>
    %80 = math.exp %79 : vector<16x16xf32>
    %cst_25 = arith.constant dense<0.000000e+00> : vector<16xf32>
    %81 = vector.multi_reduction <add>, %80, %cst_25 [1] : vector<16x16xf32> to vector<16xf32>
    %82 = vector.shape_cast %81 : vector<16xf32> to vector<16x1xf32>
    %83 = vector.broadcast %82 : vector<16x1xf32> to vector<16x16xf32>
    %84 = arith.divf %80, %83 : vector<16x16xf32>
    %cst_26 = arith.constant dense<0.000000e+00> : vector<16x8xf32>
    %85 = tpu.matmul %84, %73, %cst_26 {dimension_numbers = #tpu.dot_dimension_numbers<[1], [0], [0], [1], [0, 0, 1, 1], [], []>} : vector<16x16xf32>, vector<16x8xf32>, vector<16x8xf32> -> vector<16x8xf32>
    %86 = vector.extract_strided_slice %40 {offsets = [0, 24], sizes = [16, 8], strides = [1, 1]} : vector<32x96xf32> to vector<16x8xf32>
    %87 = vector.extract_strided_slice %40 {offsets = [0, 56], sizes = [16, 8], strides = [1, 1]} : vector<32x96xf32> to vector<16x8xf32>
    %88 = vector.extract_strided_slice %40 {offsets = [0, 88], sizes = [16, 8], strides = [1, 1]} : vector<32x96xf32> to vector<16x8xf32>
    %cst_27 = arith.constant dense<0.000000e+00> : vector<16x16xf32>
    %89 = tpu.matmul %86, %87, %cst_27 {dimension_numbers = #tpu.dot_dimension_numbers<[1], [1], [0], [0], [0, 0, 1, 0], [], []>} : vector<16x8xf32>, vector<16x8xf32>, vector<16x16xf32> -> vector<16x16xf32>
    %90 = arith.addf %89, %15 : vector<16x16xf32>
    %cst_28 = arith.constant dense<0xFF800000> : vector<16xf32>
    %91 = vector.multi_reduction <maximumf>, %90, %cst_28 [1] : vector<16x16xf32> to vector<16xf32>
    %92 = vector.shape_cast %91 : vector<16xf32> to vector<16x1xf32>
    %93 = vector.broadcast %92 : vector<16x1xf32> to vector<16x16xf32>
    %94 = arith.subf %90, %93 : vector<16x16xf32>
    %95 = math.exp %94 : vector<16x16xf32>
    %cst_29 = arith.constant dense<0.000000e+00> : vector<16xf32>
    %96 = vector.multi_reduction <add>, %95, %cst_29 [1] : vector<16x16xf32> to vector<16xf32>
    %97 = vector.shape_cast %96 : vector<16xf32> to vector<16x1xf32>
    %98 = vector.broadcast %97 : vector<16x1xf32> to vector<16x16xf32>
    %99 = arith.divf %95, %98 : vector<16x16xf32>
    %cst_30 = arith.constant dense<0.000000e+00> : vector<16x8xf32>
    %100 = tpu.matmul %99, %88, %cst_30 {dimension_numbers = #tpu.dot_dimension_numbers<[1], [0], [0], [1], [0, 0, 1, 1], [], []>} : vector<16x16xf32>, vector<16x8xf32>, vector<16x8xf32> -> vector<16x8xf32>
    %101 = tpu.concatenate %55, %70, %85, %100 in 1 : vector<16x8xf32>, vector<16x8xf32>, vector<16x8xf32>, vector<16x8xf32> -> vector<16x32xf32>
    %102 = vector.extract_strided_slice %40 {offsets = [16, 0], sizes = [16, 8], strides = [1, 1]} : vector<32x96xf32> to vector<16x8xf32>
    %103 = vector.extract_strided_slice %40 {offsets = [16, 32], sizes = [16, 8], strides = [1, 1]} : vector<32x96xf32> to vector<16x8xf32>
    %104 = vector.extract_strided_slice %40 {offsets = [16, 64], sizes = [16, 8], strides = [1, 1]} : vector<32x96xf32> to vector<16x8xf32>
    %cst_31 = arith.constant dense<0.000000e+00> : vector<16x16xf32>
    %105 = tpu.matmul %102, %103, %cst_31 {dimension_numbers = #tpu.dot_dimension_numbers<[1], [1], [0], [0], [0, 0, 1, 0], [], []>} : vector<16x8xf32>, vector<16x8xf32>, vector<16x16xf32> -> vector<16x16xf32>
    %106 = arith.addf %105, %15 : vector<16x16xf32>
    %cst_32 = arith.constant dense<0xFF800000> : vector<16xf32>
    %107 = vector.multi_reduction <maximumf>, %106, %cst_32 [1] : vector<16x16xf32> to vector<16xf32>
    %108 = vector.shape_cast %107 : vector<16xf32> to vector<16x1xf32>
    %109 = vector.broadcast %108 : vector<16x1xf32> to vector<16x16xf32>
    %110 = arith.subf %106, %109 : vector<16x16xf32>
    %111 = math.exp %110 : vector<16x16xf32>
    %cst_33 = arith.constant dense<0.000000e+00> : vector<16xf32>
    %112 = vector.multi_reduction <add>, %111, %cst_33 [1] : vector<16x16xf32> to vector<16xf32>
    %113 = vector.shape_cast %112 : vector<16xf32> to vector<16x1xf32>
    %114 = vector.broadcast %113 : vector<16x1xf32> to vector<16x16xf32>
    %115 = arith.divf %111, %114 : vector<16x16xf32>
    %cst_34 = arith.constant dense<0.000000e+00> : vector<16x8xf32>
    %116 = tpu.matmul %115, %104, %cst_34 {dimension_numbers = #tpu.dot_dimension_numbers<[1], [0], [0], [1], [0, 0, 1, 1], [], []>} : vector<16x16xf32>, vector<16x8xf32>, vector<16x8xf32> -> vector<16x8xf32>
    %117 = vector.extract_strided_slice %40 {offsets = [16, 8], sizes = [16, 8], strides = [1, 1]} : vector<32x96xf32> to vector<16x8xf32>
    %118 = vector.extract_strided_slice %40 {offsets = [16, 40], sizes = [16, 8], strides = [1, 1]} : vector<32x96xf32> to vector<16x8xf32>
    %119 = vector.extract_strided_slice %40 {offsets = [16, 72], sizes = [16, 8], strides = [1, 1]} : vector<32x96xf32> to vector<16x8xf32>
    %cst_35 = arith.constant dense<0.000000e+00> : vector<16x16xf32>
    %120 = tpu.matmul %117, %118, %cst_35 {dimension_numbers = #tpu.dot_dimension_numbers<[1], [1], [0], [0], [0, 0, 1, 0], [], []>} : vector<16x8xf32>, vector<16x8xf32>, vector<16x16xf32> -> vector<16x16xf32>
    %121 = arith.addf %120, %15 : vector<16x16xf32>
    %cst_36 = arith.constant dense<0xFF800000> : vector<16xf32>
    %122 = vector.multi_reduction <maximumf>, %121, %cst_36 [1] : vector<16x16xf32> to vector<16xf32>
    %123 = vector.shape_cast %122 : vector<16xf32> to vector<16x1xf32>
    %124 = vector.broadcast %123 : vector<16x1xf32> to vector<16x16xf32>
    %125 = arith.subf %121, %124 : vector<16x16xf32>
    %126 = math.exp %125 : vector<16x16xf32>
    %cst_37 = arith.constant dense<0.000000e+00> : vector<16xf32>
    %127 = vector.multi_reduction <add>, %126, %cst_37 [1] : vector<16x16xf32> to vector<16xf32>
    %128 = vector.shape_cast %127 : vector<16xf32> to vector<16x1xf32>
    %129 = vector.broadcast %128 : vector<16x1xf32> to vector<16x16xf32>
    %130 = arith.divf %126, %129 : vector<16x16xf32>
    %cst_38 = arith.constant dense<0.000000e+00> : vector<16x8xf32>
    %131 = tpu.matmul %130, %119, %cst_38 {dimension_numbers = #tpu.dot_dimension_numbers<[1], [0], [0], [1], [0, 0, 1, 1], [], []>} : vector<16x16xf32>, vector<16x8xf32>, vector<16x8xf32> -> vector<16x8xf32>
    %132 = vector.extract_strided_slice %40 {offsets = [16, 16], sizes = [16, 8], strides = [1, 1]} : vector<32x96xf32> to vector<16x8xf32>
    %133 = vector.extract_strided_slice %40 {offsets = [16, 48], sizes = [16, 8], strides = [1, 1]} : vector<32x96xf32> to vector<16x8xf32>
    %134 = vector.extract_strided_slice %40 {offsets = [16, 80], sizes = [16, 8], strides = [1, 1]} : vector<32x96xf32> to vector<16x8xf32>
    %cst_39 = arith.constant dense<0.000000e+00> : vector<16x16xf32>
    %135 = tpu.matmul %132, %133, %cst_39 {dimension_numbers = #tpu.dot_dimension_numbers<[1], [1], [0], [0], [0, 0, 1, 0], [], []>} : vector<16x8xf32>, vector<16x8xf32>, vector<16x16xf32> -> vector<16x16xf32>
    %136 = arith.addf %135, %15 : vector<16x16xf32>
    %cst_40 = arith.constant dense<0xFF800000> : vector<16xf32>
    %137 = vector.multi_reduction <maximumf>, %136, %cst_40 [1] : vector<16x16xf32> to vector<16xf32>
    %138 = vector.shape_cast %137 : vector<16xf32> to vector<16x1xf32>
    %139 = vector.broadcast %138 : vector<16x1xf32> to vector<16x16xf32>
    %140 = arith.subf %136, %139 : vector<16x16xf32>
    %141 = math.exp %140 : vector<16x16xf32>
    %cst_41 = arith.constant dense<0.000000e+00> : vector<16xf32>
    %142 = vector.multi_reduction <add>, %141, %cst_41 [1] : vector<16x16xf32> to vector<16xf32>
    %143 = vector.shape_cast %142 : vector<16xf32> to vector<16x1xf32>
    %144 = vector.broadcast %143 : vector<16x1xf32> to vector<16x16xf32>
    %145 = arith.divf %141, %144 : vector<16x16xf32>
    %cst_42 = arith.constant dense<0.000000e+00> : vector<16x8xf32>
    %146 = tpu.matmul %145, %134, %cst_42 {dimension_numbers = #tpu.dot_dimension_numbers<[1], [0], [0], [1], [0, 0, 1, 1], [], []>} : vector<16x16xf32>, vector<16x8xf32>, vector<16x8xf32> -> vector<16x8xf32>
    %147 = vector.extract_strided_slice %40 {offsets = [16, 24], sizes = [16, 8], strides = [1, 1]} : vector<32x96xf32> to vector<16x8xf32>
    %148 = vector.extract_strided_slice %40 {offsets = [16, 56], sizes = [16, 8], strides = [1, 1]} : vector<32x96xf32> to vector<16x8xf32>
    %149 = vector.extract_strided_slice %40 {offsets = [16, 88], sizes = [16, 8], strides = [1, 1]} : vector<32x96xf32> to vector<16x8xf32>
    %cst_43 = arith.constant dense<0.000000e+00> : vector<16x16xf32>
    %150 = tpu.matmul %147, %148, %cst_43 {dimension_numbers = #tpu.dot_dimension_numbers<[1], [1], [0], [0], [0, 0, 1, 0], [], []>} : vector<16x8xf32>, vector<16x8xf32>, vector<16x16xf32> -> vector<16x16xf32>
    %151 = arith.addf %150, %15 : vector<16x16xf32>
    %cst_44 = arith.constant dense<0xFF800000> : vector<16xf32>
    %152 = vector.multi_reduction <maximumf>, %151, %cst_44 [1] : vector<16x16xf32> to vector<16xf32>
    %153 = vector.shape_cast %152 : vector<16xf32> to vector<16x1xf32>
    %154 = vector.broadcast %153 : vector<16x1xf32> to vector<16x16xf32>
    %155 = arith.subf %151, %154 : vector<16x16xf32>
    %156 = math.exp %155 : vector<16x16xf32>
    %cst_45 = arith.constant dense<0.000000e+00> : vector<16xf32>
    %157 = vector.multi_reduction <add>, %156, %cst_45 [1] : vector<16x16xf32> to vector<16xf32>
    %158 = vector.shape_cast %157 : vector<16xf32> to vector<16x1xf32>
    %159 = vector.broadcast %158 : vector<16x1xf32> to vector<16x16xf32>
    %160 = arith.divf %156, %159 : vector<16x16xf32>
    %cst_46 = arith.constant dense<0.000000e+00> : vector<16x8xf32>
    %161 = tpu.matmul %160, %149, %cst_46 {dimension_numbers = #tpu.dot_dimension_numbers<[1], [0], [0], [1], [0, 0, 1, 1], [], []>} : vector<16x16xf32>, vector<16x8xf32>, vector<16x8xf32> -> vector<16x8xf32>
    %162 = tpu.concatenate %116, %131, %146, %161 in 1 : vector<16x8xf32>, vector<16x8xf32>, vector<16x8xf32>, vector<16x8xf32> -> vector<16x32xf32>
    %163 = tpu.concatenate %101, %162 in 0 : vector<16x32xf32>, vector<16x32xf32> -> vector<32x32xf32>
    %c88 = arith.constant 88 : index
    %c0_47 = arith.constant 0 : index
    %164 = vector.load %arg1[%c88, %c0_47] : memref<448x128xf32, #tpu.memory_space<vmem>>, vector<32x32xf32>
    %c120 = arith.constant 120 : index
    %c0_48 = arith.constant 0 : index
    %165 = vector.load %arg1[%c120, %c0_48] : memref<448x128xf32, #tpu.memory_space<vmem>>, vector<1x32xf32>
    %cst_49 = arith.constant dense<0.000000e+00> : vector<32x32xf32>
    %166 = tpu.matmul %163, %164, %cst_49 {dimension_numbers = #tpu.dot_dimension_numbers<[1], [0], [0], [1], [0, 0, 1, 1], [], []>} : vector<32x32xf32>, vector<32x32xf32>, vector<32x32xf32> -> vector<32x32xf32>
    %167 = arith.addf %9, %166 : vector<32x32xf32>
    %168 = vector.broadcast %165 : vector<1x32xf32> to vector<32x32xf32>
    %169 = arith.addf %167, %168 : vector<32x32xf32>
    %c128 = arith.constant 128 : index
    %c0_50 = arith.constant 0 : index
    %170 = vector.load %arg1[%c128, %c0_50] : memref<448x128xf32, #tpu.memory_space<vmem>>, vector<2x32xf32>
    %171 = vector.extract_strided_slice %170 {offsets = [0, 0], sizes = [1, 32], strides = [1, 1]} : vector<2x32xf32> to vector<1x32xf32>
    %172 = vector.extract_strided_slice %170 {offsets = [1, 0], sizes = [1, 32], strides = [1, 1]} : vector<2x32xf32> to vector<1x32xf32>
    %cst_51 = arith.constant dense<0.000000e+00> : vector<32xf32>
    %173 = vector.multi_reduction <add>, %169, %cst_51 [1] : vector<32x32xf32> to vector<32xf32>
    %174 = vector.shape_cast %173 : vector<32xf32> to vector<32x1xf32>
    %cst_52 = arith.constant 3.200000e+01 : f32
    %175 = vector.broadcast %cst_52 : f32 to vector<32x1xf32>
    %176 = arith.divf %174, %175 : vector<32x1xf32>
    %177 = vector.broadcast %176 : vector<32x1xf32> to vector<32x32xf32>
    %178 = arith.subf %169, %177 : vector<32x32xf32>
    %179 = arith.mulf %178, %178 : vector<32x32xf32>
    %cst_53 = arith.constant dense<0.000000e+00> : vector<32xf32>
    %180 = vector.multi_reduction <add>, %179, %cst_53 [1] : vector<32x32xf32> to vector<32xf32>
    %181 = vector.shape_cast %180 : vector<32xf32> to vector<32x1xf32>
    %cst_54 = arith.constant 3.200000e+01 : f32
    %182 = vector.broadcast %cst_54 : f32 to vector<32x1xf32>
    %183 = arith.divf %181, %182 : vector<32x1xf32>
    %cst_55 = arith.constant 9.99999974E-6 : f32
    %184 = vector.broadcast %cst_55 : f32 to vector<32x1xf32>
    %185 = arith.addf %183, %184 : vector<32x1xf32>
    %186 = math.rsqrt %185 : vector<32x1xf32>
    %187 = vector.broadcast %186 : vector<32x1xf32> to vector<32x32xf32>
    %188 = arith.mulf %178, %187 : vector<32x32xf32>
    %189 = vector.broadcast %171 : vector<1x32xf32> to vector<32x32xf32>
    %190 = arith.mulf %188, %189 : vector<32x32xf32>
    %191 = vector.broadcast %172 : vector<1x32xf32> to vector<32x32xf32>
    %192 = arith.addf %190, %191 : vector<32x32xf32>
    %c136 = arith.constant 136 : index
    %c0_56 = arith.constant 0 : index
    %193 = vector.load %arg1[%c136, %c0_56] : memref<448x128xf32, #tpu.memory_space<vmem>>, vector<32x64xf32>
    %c168 = arith.constant 168 : index
    %c0_57 = arith.constant 0 : index
    %194 = vector.load %arg1[%c168, %c0_57] : memref<448x128xf32, #tpu.memory_space<vmem>>, vector<1x64xf32>
    %cst_58 = arith.constant dense<0.000000e+00> : vector<32x64xf32>
    %195 = tpu.matmul %192, %193, %cst_58 {dimension_numbers = #tpu.dot_dimension_numbers<[1], [0], [0], [1], [0, 0, 1, 1], [], []>} : vector<32x32xf32>, vector<32x64xf32>, vector<32x64xf32> -> vector<32x64xf32>
    %196 = vector.broadcast %194 : vector<1x64xf32> to vector<32x64xf32>
    %197 = arith.addf %195, %196 : vector<32x64xf32>
    %cst_59 = arith.constant 5.000000e-01 : f32
    %198 = vector.broadcast %cst_59 : f32 to vector<32x64xf32>
    %199 = arith.mulf %198, %197 : vector<32x64xf32>
    %cst_60 = arith.constant 4.471500e-02 : f32
    %200 = vector.broadcast %cst_60 : f32 to vector<32x64xf32>
    %201 = arith.mulf %200, %197 : vector<32x64xf32>
    %202 = arith.mulf %201, %197 : vector<32x64xf32>
    %203 = arith.mulf %202, %197 : vector<32x64xf32>
    %204 = arith.addf %197, %203 : vector<32x64xf32>
    %cst_61 = arith.constant 0.797884583 : f32
    %205 = vector.broadcast %cst_61 : f32 to vector<32x64xf32>
    %206 = arith.mulf %205, %204 : vector<32x64xf32>
    %207 = math.tanh %206 : vector<32x64xf32>
    %cst_62 = arith.constant 1.000000e+00 : f32
    %208 = vector.broadcast %cst_62 : f32 to vector<32x64xf32>
    %209 = arith.addf %208, %207 : vector<32x64xf32>
    %210 = arith.mulf %199, %209 : vector<32x64xf32>
    %c176 = arith.constant 176 : index
    %c0_63 = arith.constant 0 : index
    %211 = vector.load %arg1[%c176, %c0_63] : memref<448x128xf32, #tpu.memory_space<vmem>>, vector<64x32xf32>
    %c240 = arith.constant 240 : index
    %c0_64 = arith.constant 0 : index
    %212 = vector.load %arg1[%c240, %c0_64] : memref<448x128xf32, #tpu.memory_space<vmem>>, vector<1x32xf32>
    %cst_65 = arith.constant dense<0.000000e+00> : vector<32x32xf32>
    %213 = tpu.matmul %210, %211, %cst_65 {dimension_numbers = #tpu.dot_dimension_numbers<[1], [0], [0], [1], [0, 0, 1, 1], [], []>} : vector<32x64xf32>, vector<64x32xf32>, vector<32x32xf32> -> vector<32x32xf32>
    %214 = arith.addf %169, %213 : vector<32x32xf32>
    %215 = vector.broadcast %212 : vector<1x32xf32> to vector<32x32xf32>
    %216 = arith.addf %214, %215 : vector<32x32xf32>
    %c248 = arith.constant 248 : index
    %c0_66 = arith.constant 0 : index
    %217 = vector.load %arg1[%c248, %c0_66] : memref<448x128xf32, #tpu.memory_space<vmem>>, vector<2x32xf32>
    %218 = vector.extract_strided_slice %217 {offsets = [0, 0], sizes = [1, 32], strides = [1, 1]} : vector<2x32xf32> to vector<1x32xf32>
    %219 = vector.extract_strided_slice %217 {offsets = [1, 0], sizes = [1, 32], strides = [1, 1]} : vector<2x32xf32> to vector<1x32xf32>
    %cst_67 = arith.constant dense<0.000000e+00> : vector<32xf32>
    %220 = vector.multi_reduction <add>, %216, %cst_67 [1] : vector<32x32xf32> to vector<32xf32>
    %221 = vector.shape_cast %220 : vector<32xf32> to vector<32x1xf32>
    %cst_68 = arith.constant 3.200000e+01 : f32
    %222 = vector.broadcast %cst_68 : f32 to vector<32x1xf32>
    %223 = arith.divf %221, %222 : vector<32x1xf32>
    %224 = vector.broadcast %223 : vector<32x1xf32> to vector<32x32xf32>
    %225 = arith.subf %216, %224 : vector<32x32xf32>
    %226 = arith.mulf %225, %225 : vector<32x32xf32>
    %cst_69 = arith.constant dense<0.000000e+00> : vector<32xf32>
    %227 = vector.multi_reduction <add>, %226, %cst_69 [1] : vector<32x32xf32> to vector<32xf32>
    %228 = vector.shape_cast %227 : vector<32xf32> to vector<32x1xf32>
    %cst_70 = arith.constant 3.200000e+01 : f32
    %229 = vector.broadcast %cst_70 : f32 to vector<32x1xf32>
    %230 = arith.divf %228, %229 : vector<32x1xf32>
    %cst_71 = arith.constant 9.99999974E-6 : f32
    %231 = vector.broadcast %cst_71 : f32 to vector<32x1xf32>
    %232 = arith.addf %230, %231 : vector<32x1xf32>
    %233 = math.rsqrt %232 : vector<32x1xf32>
    %234 = vector.broadcast %233 : vector<32x1xf32> to vector<32x32xf32>
    %235 = arith.mulf %225, %234 : vector<32x32xf32>
    %236 = vector.broadcast %218 : vector<1x32xf32> to vector<32x32xf32>
    %237 = arith.mulf %235, %236 : vector<32x32xf32>
    %238 = vector.broadcast %219 : vector<1x32xf32> to vector<32x32xf32>
    %239 = arith.addf %237, %238 : vector<32x32xf32>
    %c256 = arith.constant 256 : index
    %c0_72 = arith.constant 0 : index
    %240 = vector.load %arg1[%c256, %c0_72] : memref<448x128xf32, #tpu.memory_space<vmem>>, vector<32x96xf32>
    %cst_73 = arith.constant dense<0.000000e+00> : vector<32x96xf32>
    %241 = tpu.matmul %239, %240, %cst_73 {dimension_numbers = #tpu.dot_dimension_numbers<[1], [0], [0], [1], [0, 0, 1, 1], [], []>} : vector<32x32xf32>, vector<32x96xf32>, vector<32x96xf32> -> vector<32x96xf32>
    %242 = vector.extract_strided_slice %241 {offsets = [0, 0], sizes = [16, 8], strides = [1, 1]} : vector<32x96xf32> to vector<16x8xf32>
    %243 = vector.extract_strided_slice %241 {offsets = [0, 32], sizes = [16, 8], strides = [1, 1]} : vector<32x96xf32> to vector<16x8xf32>
    %244 = vector.extract_strided_slice %241 {offsets = [0, 64], sizes = [16, 8], strides = [1, 1]} : vector<32x96xf32> to vector<16x8xf32>
    %cst_74 = arith.constant dense<0.000000e+00> : vector<16x16xf32>
    %245 = tpu.matmul %242, %243, %cst_74 {dimension_numbers = #tpu.dot_dimension_numbers<[1], [1], [0], [0], [0, 0, 1, 0], [], []>} : vector<16x8xf32>, vector<16x8xf32>, vector<16x16xf32> -> vector<16x16xf32>
    %246 = arith.addf %245, %15 : vector<16x16xf32>
    %cst_75 = arith.constant dense<0xFF800000> : vector<16xf32>
    %247 = vector.multi_reduction <maximumf>, %246, %cst_75 [1] : vector<16x16xf32> to vector<16xf32>
    %248 = vector.shape_cast %247 : vector<16xf32> to vector<16x1xf32>
    %249 = vector.broadcast %248 : vector<16x1xf32> to vector<16x16xf32>
    %250 = arith.subf %246, %249 : vector<16x16xf32>
    %251 = math.exp %250 : vector<16x16xf32>
    %cst_76 = arith.constant dense<0.000000e+00> : vector<16xf32>
    %252 = vector.multi_reduction <add>, %251, %cst_76 [1] : vector<16x16xf32> to vector<16xf32>
    %253 = vector.shape_cast %252 : vector<16xf32> to vector<16x1xf32>
    %254 = vector.broadcast %253 : vector<16x1xf32> to vector<16x16xf32>
    %255 = arith.divf %251, %254 : vector<16x16xf32>
    %cst_77 = arith.constant dense<0.000000e+00> : vector<16x8xf32>
    %256 = tpu.matmul %255, %244, %cst_77 {dimension_numbers = #tpu.dot_dimension_numbers<[1], [0], [0], [1], [0, 0, 1, 1], [], []>} : vector<16x16xf32>, vector<16x8xf32>, vector<16x8xf32> -> vector<16x8xf32>
    %257 = vector.extract_strided_slice %241 {offsets = [0, 8], sizes = [16, 8], strides = [1, 1]} : vector<32x96xf32> to vector<16x8xf32>
    %258 = vector.extract_strided_slice %241 {offsets = [0, 40], sizes = [16, 8], strides = [1, 1]} : vector<32x96xf32> to vector<16x8xf32>
    %259 = vector.extract_strided_slice %241 {offsets = [0, 72], sizes = [16, 8], strides = [1, 1]} : vector<32x96xf32> to vector<16x8xf32>
    %cst_78 = arith.constant dense<0.000000e+00> : vector<16x16xf32>
    %260 = tpu.matmul %257, %258, %cst_78 {dimension_numbers = #tpu.dot_dimension_numbers<[1], [1], [0], [0], [0, 0, 1, 0], [], []>} : vector<16x8xf32>, vector<16x8xf32>, vector<16x16xf32> -> vector<16x16xf32>
    %261 = arith.addf %260, %15 : vector<16x16xf32>
    %cst_79 = arith.constant dense<0xFF800000> : vector<16xf32>
    %262 = vector.multi_reduction <maximumf>, %261, %cst_79 [1] : vector<16x16xf32> to vector<16xf32>
    %263 = vector.shape_cast %262 : vector<16xf32> to vector<16x1xf32>
    %264 = vector.broadcast %263 : vector<16x1xf32> to vector<16x16xf32>
    %265 = arith.subf %261, %264 : vector<16x16xf32>
    %266 = math.exp %265 : vector<16x16xf32>
    %cst_80 = arith.constant dense<0.000000e+00> : vector<16xf32>
    %267 = vector.multi_reduction <add>, %266, %cst_80 [1] : vector<16x16xf32> to vector<16xf32>
    %268 = vector.shape_cast %267 : vector<16xf32> to vector<16x1xf32>
    %269 = vector.broadcast %268 : vector<16x1xf32> to vector<16x16xf32>
    %270 = arith.divf %266, %269 : vector<16x16xf32>
    %cst_81 = arith.constant dense<0.000000e+00> : vector<16x8xf32>
    %271 = tpu.matmul %270, %259, %cst_81 {dimension_numbers = #tpu.dot_dimension_numbers<[1], [0], [0], [1], [0, 0, 1, 1], [], []>} : vector<16x16xf32>, vector<16x8xf32>, vector<16x8xf32> -> vector<16x8xf32>
    %272 = vector.extract_strided_slice %241 {offsets = [0, 16], sizes = [16, 8], strides = [1, 1]} : vector<32x96xf32> to vector<16x8xf32>
    %273 = vector.extract_strided_slice %241 {offsets = [0, 48], sizes = [16, 8], strides = [1, 1]} : vector<32x96xf32> to vector<16x8xf32>
    %274 = vector.extract_strided_slice %241 {offsets = [0, 80], sizes = [16, 8], strides = [1, 1]} : vector<32x96xf32> to vector<16x8xf32>
    %cst_82 = arith.constant dense<0.000000e+00> : vector<16x16xf32>
    %275 = tpu.matmul %272, %273, %cst_82 {dimension_numbers = #tpu.dot_dimension_numbers<[1], [1], [0], [0], [0, 0, 1, 0], [], []>} : vector<16x8xf32>, vector<16x8xf32>, vector<16x16xf32> -> vector<16x16xf32>
    %276 = arith.addf %275, %15 : vector<16x16xf32>
    %cst_83 = arith.constant dense<0xFF800000> : vector<16xf32>
    %277 = vector.multi_reduction <maximumf>, %276, %cst_83 [1] : vector<16x16xf32> to vector<16xf32>
    %278 = vector.shape_cast %277 : vector<16xf32> to vector<16x1xf32>
    %279 = vector.broadcast %278 : vector<16x1xf32> to vector<16x16xf32>
    %280 = arith.subf %276, %279 : vector<16x16xf32>
    %281 = math.exp %280 : vector<16x16xf32>
    %cst_84 = arith.constant dense<0.000000e+00> : vector<16xf32>
    %282 = vector.multi_reduction <add>, %281, %cst_84 [1] : vector<16x16xf32> to vector<16xf32>
    %283 = vector.shape_cast %282 : vector<16xf32> to vector<16x1xf32>
    %284 = vector.broadcast %283 : vector<16x1xf32> to vector<16x16xf32>
    %285 = arith.divf %281, %284 : vector<16x16xf32>
    %cst_85 = arith.constant dense<0.000000e+00> : vector<16x8xf32>
    %286 = tpu.matmul %285, %274, %cst_85 {dimension_numbers = #tpu.dot_dimension_numbers<[1], [0], [0], [1], [0, 0, 1, 1], [], []>} : vector<16x16xf32>, vector<16x8xf32>, vector<16x8xf32> -> vector<16x8xf32>
    %287 = vector.extract_strided_slice %241 {offsets = [0, 24], sizes = [16, 8], strides = [1, 1]} : vector<32x96xf32> to vector<16x8xf32>
    %288 = vector.extract_strided_slice %241 {offsets = [0, 56], sizes = [16, 8], strides = [1, 1]} : vector<32x96xf32> to vector<16x8xf32>
    %289 = vector.extract_strided_slice %241 {offsets = [0, 88], sizes = [16, 8], strides = [1, 1]} : vector<32x96xf32> to vector<16x8xf32>
    %cst_86 = arith.constant dense<0.000000e+00> : vector<16x16xf32>
    %290 = tpu.matmul %287, %288, %cst_86 {dimension_numbers = #tpu.dot_dimension_numbers<[1], [1], [0], [0], [0, 0, 1, 0], [], []>} : vector<16x8xf32>, vector<16x8xf32>, vector<16x16xf32> -> vector<16x16xf32>
    %291 = arith.addf %290, %15 : vector<16x16xf32>
    %cst_87 = arith.constant dense<0xFF800000> : vector<16xf32>
    %292 = vector.multi_reduction <maximumf>, %291, %cst_87 [1] : vector<16x16xf32> to vector<16xf32>
    %293 = vector.shape_cast %292 : vector<16xf32> to vector<16x1xf32>
    %294 = vector.broadcast %293 : vector<16x1xf32> to vector<16x16xf32>
    %295 = arith.subf %291, %294 : vector<16x16xf32>
    %296 = math.exp %295 : vector<16x16xf32>
    %cst_88 = arith.constant dense<0.000000e+00> : vector<16xf32>
    %297 = vector.multi_reduction <add>, %296, %cst_88 [1] : vector<16x16xf32> to vector<16xf32>
    %298 = vector.shape_cast %297 : vector<16xf32> to vector<16x1xf32>
    %299 = vector.broadcast %298 : vector<16x1xf32> to vector<16x16xf32>
    %300 = arith.divf %296, %299 : vector<16x16xf32>
    %cst_89 = arith.constant dense<0.000000e+00> : vector<16x8xf32>
    %301 = tpu.matmul %300, %289, %cst_89 {dimension_numbers = #tpu.dot_dimension_numbers<[1], [0], [0], [1], [0, 0, 1, 1], [], []>} : vector<16x16xf32>, vector<16x8xf32>, vector<16x8xf32> -> vector<16x8xf32>
    %302 = tpu.concatenate %256, %271, %286, %301 in 1 : vector<16x8xf32>, vector<16x8xf32>, vector<16x8xf32>, vector<16x8xf32> -> vector<16x32xf32>
    %303 = vector.extract_strided_slice %241 {offsets = [16, 0], sizes = [16, 8], strides = [1, 1]} : vector<32x96xf32> to vector<16x8xf32>
    %304 = vector.extract_strided_slice %241 {offsets = [16, 32], sizes = [16, 8], strides = [1, 1]} : vector<32x96xf32> to vector<16x8xf32>
    %305 = vector.extract_strided_slice %241 {offsets = [16, 64], sizes = [16, 8], strides = [1, 1]} : vector<32x96xf32> to vector<16x8xf32>
    %cst_90 = arith.constant dense<0.000000e+00> : vector<16x16xf32>
    %306 = tpu.matmul %303, %304, %cst_90 {dimension_numbers = #tpu.dot_dimension_numbers<[1], [1], [0], [0], [0, 0, 1, 0], [], []>} : vector<16x8xf32>, vector<16x8xf32>, vector<16x16xf32> -> vector<16x16xf32>
    %307 = arith.addf %306, %15 : vector<16x16xf32>
    %cst_91 = arith.constant dense<0xFF800000> : vector<16xf32>
    %308 = vector.multi_reduction <maximumf>, %307, %cst_91 [1] : vector<16x16xf32> to vector<16xf32>
    %309 = vector.shape_cast %308 : vector<16xf32> to vector<16x1xf32>
    %310 = vector.broadcast %309 : vector<16x1xf32> to vector<16x16xf32>
    %311 = arith.subf %307, %310 : vector<16x16xf32>
    %312 = math.exp %311 : vector<16x16xf32>
    %cst_92 = arith.constant dense<0.000000e+00> : vector<16xf32>
    %313 = vector.multi_reduction <add>, %312, %cst_92 [1] : vector<16x16xf32> to vector<16xf32>
    %314 = vector.shape_cast %313 : vector<16xf32> to vector<16x1xf32>
    %315 = vector.broadcast %314 : vector<16x1xf32> to vector<16x16xf32>
    %316 = arith.divf %312, %315 : vector<16x16xf32>
    %cst_93 = arith.constant dense<0.000000e+00> : vector<16x8xf32>
    %317 = tpu.matmul %316, %305, %cst_93 {dimension_numbers = #tpu.dot_dimension_numbers<[1], [0], [0], [1], [0, 0, 1, 1], [], []>} : vector<16x16xf32>, vector<16x8xf32>, vector<16x8xf32> -> vector<16x8xf32>
    %318 = vector.extract_strided_slice %241 {offsets = [16, 8], sizes = [16, 8], strides = [1, 1]} : vector<32x96xf32> to vector<16x8xf32>
    %319 = vector.extract_strided_slice %241 {offsets = [16, 40], sizes = [16, 8], strides = [1, 1]} : vector<32x96xf32> to vector<16x8xf32>
    %320 = vector.extract_strided_slice %241 {offsets = [16, 72], sizes = [16, 8], strides = [1, 1]} : vector<32x96xf32> to vector<16x8xf32>
    %cst_94 = arith.constant dense<0.000000e+00> : vector<16x16xf32>
    %321 = tpu.matmul %318, %319, %cst_94 {dimension_numbers = #tpu.dot_dimension_numbers<[1], [1], [0], [0], [0, 0, 1, 0], [], []>} : vector<16x8xf32>, vector<16x8xf32>, vector<16x16xf32> -> vector<16x16xf32>
    %322 = arith.addf %321, %15 : vector<16x16xf32>
    %cst_95 = arith.constant dense<0xFF800000> : vector<16xf32>
    %323 = vector.multi_reduction <maximumf>, %322, %cst_95 [1] : vector<16x16xf32> to vector<16xf32>
    %324 = vector.shape_cast %323 : vector<16xf32> to vector<16x1xf32>
    %325 = vector.broadcast %324 : vector<16x1xf32> to vector<16x16xf32>
    %326 = arith.subf %322, %325 : vector<16x16xf32>
    %327 = math.exp %326 : vector<16x16xf32>
    %cst_96 = arith.constant dense<0.000000e+00> : vector<16xf32>
    %328 = vector.multi_reduction <add>, %327, %cst_96 [1] : vector<16x16xf32> to vector<16xf32>
    %329 = vector.shape_cast %328 : vector<16xf32> to vector<16x1xf32>
    %330 = vector.broadcast %329 : vector<16x1xf32> to vector<16x16xf32>
    %331 = arith.divf %327, %330 : vector<16x16xf32>
    %cst_97 = arith.constant dense<0.000000e+00> : vector<16x8xf32>
    %332 = tpu.matmul %331, %320, %cst_97 {dimension_numbers = #tpu.dot_dimension_numbers<[1], [0], [0], [1], [0, 0, 1, 1], [], []>} : vector<16x16xf32>, vector<16x8xf32>, vector<16x8xf32> -> vector<16x8xf32>
    %333 = vector.extract_strided_slice %241 {offsets = [16, 16], sizes = [16, 8], strides = [1, 1]} : vector<32x96xf32> to vector<16x8xf32>
    %334 = vector.extract_strided_slice %241 {offsets = [16, 48], sizes = [16, 8], strides = [1, 1]} : vector<32x96xf32> to vector<16x8xf32>
    %335 = vector.extract_strided_slice %241 {offsets = [16, 80], sizes = [16, 8], strides = [1, 1]} : vector<32x96xf32> to vector<16x8xf32>
    %cst_98 = arith.constant dense<0.000000e+00> : vector<16x16xf32>
    %336 = tpu.matmul %333, %334, %cst_98 {dimension_numbers = #tpu.dot_dimension_numbers<[1], [1], [0], [0], [0, 0, 1, 0], [], []>} : vector<16x8xf32>, vector<16x8xf32>, vector<16x16xf32> -> vector<16x16xf32>
    %337 = arith.addf %336, %15 : vector<16x16xf32>
    %cst_99 = arith.constant dense<0xFF800000> : vector<16xf32>
    %338 = vector.multi_reduction <maximumf>, %337, %cst_99 [1] : vector<16x16xf32> to vector<16xf32>
    %339 = vector.shape_cast %338 : vector<16xf32> to vector<16x1xf32>
    %340 = vector.broadcast %339 : vector<16x1xf32> to vector<16x16xf32>
    %341 = arith.subf %337, %340 : vector<16x16xf32>
    %342 = math.exp %341 : vector<16x16xf32>
    %cst_100 = arith.constant dense<0.000000e+00> : vector<16xf32>
    %343 = vector.multi_reduction <add>, %342, %cst_100 [1] : vector<16x16xf32> to vector<16xf32>
    %344 = vector.shape_cast %343 : vector<16xf32> to vector<16x1xf32>
    %345 = vector.broadcast %344 : vector<16x1xf32> to vector<16x16xf32>
    %346 = arith.divf %342, %345 : vector<16x16xf32>
    %cst_101 = arith.constant dense<0.000000e+00> : vector<16x8xf32>
    %347 = tpu.matmul %346, %335, %cst_101 {dimension_numbers = #tpu.dot_dimension_numbers<[1], [0], [0], [1], [0, 0, 1, 1], [], []>} : vector<16x16xf32>, vector<16x8xf32>, vector<16x8xf32> -> vector<16x8xf32>
    %348 = vector.extract_strided_slice %241 {offsets = [16, 24], sizes = [16, 8], strides = [1, 1]} : vector<32x96xf32> to vector<16x8xf32>
    %349 = vector.extract_strided_slice %241 {offsets = [16, 56], sizes = [16, 8], strides = [1, 1]} : vector<32x96xf32> to vector<16x8xf32>
    %350 = vector.extract_strided_slice %241 {offsets = [16, 88], sizes = [16, 8], strides = [1, 1]} : vector<32x96xf32> to vector<16x8xf32>
    %cst_102 = arith.constant dense<0.000000e+00> : vector<16x16xf32>
    %351 = tpu.matmul %348, %349, %cst_102 {dimension_numbers = #tpu.dot_dimension_numbers<[1], [1], [0], [0], [0, 0, 1, 0], [], []>} : vector<16x8xf32>, vector<16x8xf32>, vector<16x16xf32> -> vector<16x16xf32>
    %352 = arith.addf %351, %15 : vector<16x16xf32>
    %cst_103 = arith.constant dense<0xFF800000> : vector<16xf32>
    %353 = vector.multi_reduction <maximumf>, %352, %cst_103 [1] : vector<16x16xf32> to vector<16xf32>
    %354 = vector.shape_cast %353 : vector<16xf32> to vector<16x1xf32>
    %355 = vector.broadcast %354 : vector<16x1xf32> to vector<16x16xf32>
    %356 = arith.subf %352, %355 : vector<16x16xf32>
    %357 = math.exp %356 : vector<16x16xf32>
    %cst_104 = arith.constant dense<0.000000e+00> : vector<16xf32>
    %358 = vector.multi_reduction <add>, %357, %cst_104 [1] : vector<16x16xf32> to vector<16xf32>
    %359 = vector.shape_cast %358 : vector<16xf32> to vector<16x1xf32>
    %360 = vector.broadcast %359 : vector<16x1xf32> to vector<16x16xf32>
    %361 = arith.divf %357, %360 : vector<16x16xf32>
    %cst_105 = arith.constant dense<0.000000e+00> : vector<16x8xf32>
    %362 = tpu.matmul %361, %350, %cst_105 {dimension_numbers = #tpu.dot_dimension_numbers<[1], [0], [0], [1], [0, 0, 1, 1], [], []>} : vector<16x16xf32>, vector<16x8xf32>, vector<16x8xf32> -> vector<16x8xf32>
    %363 = tpu.concatenate %317, %332, %347, %362 in 1 : vector<16x8xf32>, vector<16x8xf32>, vector<16x8xf32>, vector<16x8xf32> -> vector<16x32xf32>
    %364 = tpu.concatenate %302, %363 in 0 : vector<16x32xf32>, vector<16x32xf32> -> vector<32x32xf32>
    %c288 = arith.constant 288 : index
    %c0_106 = arith.constant 0 : index
    %365 = vector.load %arg1[%c288, %c0_106] : memref<448x128xf32, #tpu.memory_space<vmem>>, vector<32x32xf32>
    %c320 = arith.constant 320 : index
    %c0_107 = arith.constant 0 : index
    %366 = vector.load %arg1[%c320, %c0_107] : memref<448x128xf32, #tpu.memory_space<vmem>>, vector<1x32xf32>
    %cst_108 = arith.constant dense<0.000000e+00> : vector<32x32xf32>
    %367 = tpu.matmul %364, %365, %cst_108 {dimension_numbers = #tpu.dot_dimension_numbers<[1], [0], [0], [1], [0, 0, 1, 1], [], []>} : vector<32x32xf32>, vector<32x32xf32>, vector<32x32xf32> -> vector<32x32xf32>
    %368 = arith.addf %216, %367 : vector<32x32xf32>
    %369 = vector.broadcast %366 : vector<1x32xf32> to vector<32x32xf32>
    %370 = arith.addf %368, %369 : vector<32x32xf32>
    %c328 = arith.constant 328 : index
    %c0_109 = arith.constant 0 : index
    %371 = vector.load %arg1[%c328, %c0_109] : memref<448x128xf32, #tpu.memory_space<vmem>>, vector<2x32xf32>
    %372 = vector.extract_strided_slice %371 {offsets = [0, 0], sizes = [1, 32], strides = [1, 1]} : vector<2x32xf32> to vector<1x32xf32>
    %373 = vector.extract_strided_slice %371 {offsets = [1, 0], sizes = [1, 32], strides = [1, 1]} : vector<2x32xf32> to vector<1x32xf32>
    %cst_110 = arith.constant dense<0.000000e+00> : vector<32xf32>
    %374 = vector.multi_reduction <add>, %370, %cst_110 [1] : vector<32x32xf32> to vector<32xf32>
    %375 = vector.shape_cast %374 : vector<32xf32> to vector<32x1xf32>
    %cst_111 = arith.constant 3.200000e+01 : f32
    %376 = vector.broadcast %cst_111 : f32 to vector<32x1xf32>
    %377 = arith.divf %375, %376 : vector<32x1xf32>
    %378 = vector.broadcast %377 : vector<32x1xf32> to vector<32x32xf32>
    %379 = arith.subf %370, %378 : vector<32x32xf32>
    %380 = arith.mulf %379, %379 : vector<32x32xf32>
    %cst_112 = arith.constant dense<0.000000e+00> : vector<32xf32>
    %381 = vector.multi_reduction <add>, %380, %cst_112 [1] : vector<32x32xf32> to vector<32xf32>
    %382 = vector.shape_cast %381 : vector<32xf32> to vector<32x1xf32>
    %cst_113 = arith.constant 3.200000e+01 : f32
    %383 = vector.broadcast %cst_113 : f32 to vector<32x1xf32>
    %384 = arith.divf %382, %383 : vector<32x1xf32>
    %cst_114 = arith.constant 9.99999974E-6 : f32
    %385 = vector.broadcast %cst_114 : f32 to vector<32x1xf32>
    %386 = arith.addf %384, %385 : vector<32x1xf32>
    %387 = math.rsqrt %386 : vector<32x1xf32>
    %388 = vector.broadcast %387 : vector<32x1xf32> to vector<32x32xf32>
    %389 = arith.mulf %379, %388 : vector<32x32xf32>
    %390 = vector.broadcast %372 : vector<1x32xf32> to vector<32x32xf32>
    %391 = arith.mulf %389, %390 : vector<32x32xf32>
    %392 = vector.broadcast %373 : vector<1x32xf32> to vector<32x32xf32>
    %393 = arith.addf %391, %392 : vector<32x32xf32>
    %c336 = arith.constant 336 : index
    %c0_115 = arith.constant 0 : index
    %394 = vector.load %arg1[%c336, %c0_115] : memref<448x128xf32, #tpu.memory_space<vmem>>, vector<32x64xf32>
    %c368 = arith.constant 368 : index
    %c0_116 = arith.constant 0 : index
    %395 = vector.load %arg1[%c368, %c0_116] : memref<448x128xf32, #tpu.memory_space<vmem>>, vector<1x64xf32>
    %cst_117 = arith.constant dense<0.000000e+00> : vector<32x64xf32>
    %396 = tpu.matmul %393, %394, %cst_117 {dimension_numbers = #tpu.dot_dimension_numbers<[1], [0], [0], [1], [0, 0, 1, 1], [], []>} : vector<32x32xf32>, vector<32x64xf32>, vector<32x64xf32> -> vector<32x64xf32>
    %397 = vector.broadcast %395 : vector<1x64xf32> to vector<32x64xf32>
    %398 = arith.addf %396, %397 : vector<32x64xf32>
    %cst_118 = arith.constant 5.000000e-01 : f32
    %399 = vector.broadcast %cst_118 : f32 to vector<32x64xf32>
    %400 = arith.mulf %399, %398 : vector<32x64xf32>
    %cst_119 = arith.constant 4.471500e-02 : f32
    %401 = vector.broadcast %cst_119 : f32 to vector<32x64xf32>
    %402 = arith.mulf %401, %398 : vector<32x64xf32>
    %403 = arith.mulf %402, %398 : vector<32x64xf32>
    %404 = arith.mulf %403, %398 : vector<32x64xf32>
    %405 = arith.addf %398, %404 : vector<32x64xf32>
    %cst_120 = arith.constant 0.797884583 : f32
    %406 = vector.broadcast %cst_120 : f32 to vector<32x64xf32>
    %407 = arith.mulf %406, %405 : vector<32x64xf32>
    %408 = math.tanh %407 : vector<32x64xf32>
    %cst_121 = arith.constant 1.000000e+00 : f32
    %409 = vector.broadcast %cst_121 : f32 to vector<32x64xf32>
    %410 = arith.addf %409, %408 : vector<32x64xf32>
    %411 = arith.mulf %400, %410 : vector<32x64xf32>
    %c376 = arith.constant 376 : index
    %c0_122 = arith.constant 0 : index
    %412 = vector.load %arg1[%c376, %c0_122] : memref<448x128xf32, #tpu.memory_space<vmem>>, vector<64x32xf32>
    %c440 = arith.constant 440 : index
    %c0_123 = arith.constant 0 : index
    %413 = vector.load %arg1[%c440, %c0_123] : memref<448x128xf32, #tpu.memory_space<vmem>>, vector<1x32xf32>
    %cst_124 = arith.constant dense<0.000000e+00> : vector<32x32xf32>
    %414 = tpu.matmul %411, %412, %cst_124 {dimension_numbers = #tpu.dot_dimension_numbers<[1], [0], [0], [1], [0, 0, 1, 1], [], []>} : vector<32x64xf32>, vector<64x32xf32>, vector<32x32xf32> -> vector<32x32xf32>
    %415 = arith.addf %370, %414 : vector<32x32xf32>
    %416 = vector.broadcast %413 : vector<1x32xf32> to vector<32x32xf32>
    %417 = arith.addf %415, %416 : vector<32x32xf32>
    %418 = vector.extract_strided_slice %417 {offsets = [8, 0], sizes = [1, 32], strides = [1, 1]} : vector<32x32xf32> to vector<1x32xf32>
    %419 = vector.extract_strided_slice %417 {offsets = [24, 0], sizes = [1, 32], strides = [1, 1]} : vector<32x32xf32> to vector<1x32xf32>
    %420 = tpu.concatenate %418, %419 in 0 : vector<1x32xf32>, vector<1x32xf32> -> vector<2x32xf32>
    %c0_125 = arith.constant 0 : index
    %c0_126 = arith.constant 0 : index
    %421 = vector.load %arg2[%c0_125, %c0_126] : memref<2x32xf32, #tpu.memory_space<vmem>>, vector<2x32xf32>
    tpu.vector_store %arg2[%c0_125, %c0_126], %420 {strides = array<i32>} : memref<2x32xf32, #tpu.memory_space<vmem>>, vector<2x32xf32>,
    return
  }
}

</mosaic_0001>

<bundles_post_ra>
// kernel: tpu_custom_call.1
= control target key start
LH: loop header
LB: loop body
LE: loop exit
PB: predicated region body
PF: predicated region fallthrough
CT: control target
= control target key end

     0   :  { %7 = vsyncpa [#allocation3], 0  ;;  %s6789_s0 = inlined_call_operand.hbm [shape: f32[16,32], index: 0, kind: input, shape index: {}]   ;;  %s6790_s1 = inlined_call_operand.hbm [shape: f32[448,128], index: 1, kind: input, shape index: {}]   ;;  %s6791_s2 = inlined_call_operand.hbm [shape: f32[2,32], index: 2, kind: output, shape index: {}]  }
   0x1   :  { %8 = vsyncpa [#allocation6], 0 }
   0x2   :  { %9 = vsyncpa [#allocation4], 0  ;;  %s6057_s9 = smov [#allocation2]   ;;  %s5985_s13 = scalar_lea.hbm %s6789_s0, 256 }
   0x3   :  { %s15_s10 = sshll.u32 %s6057_s9, 4  ;;  %p5986_p0 = scmp.ne.s32.totalorder %s6789_s0, %s5985_s13  ;;  %s16_s10 = int_to_ptr.vmem [resolvable:$true] %s15_s10 }
   0x4   :  { %p5989_p1 = scmp.lt.u32.totalorder %s5985_s13, %s6789_s0 }
   0x6   :  { %p5991_p2 = pnand %p5989_p1, %p5986_p0 }
   0x8   :  { %5994 = shalt.err (!%p5991_p2)
}
   0x9   :  { %s5995_s18 = scalar_lea.vmem %s16_s10, 256  ;;  %p6000_p4 = scmp.lt.s32.totalorder %s16_s10, %s16_s10 }
   0xa   :  { %p5996_p3 = scmp.ne.s32.totalorder %s16_s10, %s5995_s18  ;;  %p6001_p5 = scmp.lt.s32.totalorder %s5995_s18, %s5995_s18 }
   0xc   :  { %p6002_p6 = por %p6001_p5, %p6000_p4 }
   0xe   :  { %p6003_p7 = pnand %p6002_p6, %p5996_p3 }
  0x10   :  { %6006 = shalt.err (!%p6003_p7)
}
  0x11   :  { %s6058_s19 = smov 128   ;;  %s6059_s20 = smov 8  }
  0x12   :  { %21 = dma.hbm_to_vmem [thread:$0]  %s6789_s0, 256, %s16_s10, [#allocation3], %s6058_s19, %s6058_s19, %s6059_s20  }
  0x13   :  { %s6060_s23 = smov [#allocation5]   ;;  %s6007_s27 = scalar_lea.hbm %s6790_s1, 7168 }
  0x14   :  { %s27_s24 = sshll.u32 %s6060_s23, 4  ;;  %p6008_p8 = scmp.ne.s32.totalorder %s6790_s1, %s6007_s27  ;;  %s28_s24 = int_to_ptr.vmem [resolvable:$true] %s27_s24 }
  0x15   :  { %p6011_p9 = scmp.lt.u32.totalorder %s6007_s27, %s6790_s1 }
  0x17   :  { %p6013_p10 = pnand %p6011_p9, %p6008_p8 }
  0x19   :  { %6016 = shalt.err (!%p6013_p10)
}
  0x1a   :  { %s6017_s4 = scalar_lea.vmem %s28_s24, 7168  ;;  %p6022_p12 = scmp.lt.s32.totalorder %s28_s24, %s28_s24 }
  0x1b   :  { %p6018_p11 = scmp.ne.s32.totalorder %s28_s24, %s6017_s4  ;;  %p6023_p13 = scmp.lt.s32.totalorder %s6017_s4, %s6017_s4 }
  0x1d   :  { %p6024_p0 = por %p6023_p13, %p6022_p12 }
  0x1f   :  { %p6025_p1 = pnand %p6024_p0, %p6018_p11 }
  0x21   :  { %6028 = shalt.err (!%p6025_p1)
}
  0x22   :  { %33 = dma.hbm_to_vmem [thread:$0]  %s6790_s1, 7168, %s28_s24, [#allocation6], %s6058_s19, %s6058_s19, %s6059_s20  }
  0x23   :  { %6051 = dma.done.wait [#allocation3], 256  }
  0x24   :  { %6052 = vsyncadd [#allocation3], 4294967040 }
  0x25   :  { %6053 = dma.done.wait [#allocation6], 7168  }
  0x26   :  { %6054 = vsyncadd [#allocation6], 4294960128  ;;  %vm46_vm0 = vcmask 261120   ;;  %v40_v0 = vld [vmem:[#allocation5] sm:$0xff]  ;;  %v41_v1 = vld [vmem:[#allocation5 + $0x8] sm:$0xff]  ;;  %v132_v40 = vlaneseq  ;;  %vm295_vm1 = vcmask 64512  }
  0x27   :  { %v42_v2 = vld [vmem:[#allocation5 + $0x10] sm:$0xff]  ;;  %v5383_v3 = vpack.c.bf16 %v41_v1, %v40_v0  ;;  %v43_v4 = vld [vmem:[#allocation5 + $0x18] sm:$0xff]  ;;  %v128_v8 = vld [vmem:[#allocation5 + $0x20] sm:$0xff]  ;;  %s6061_s1 = smov 96   ;;  %s6062_s6 = smov 88   ;;  %vm379_vm4 = vcmask 130048  }
  0x28   :  { %v44_v5 = vld [vmem:[#allocation2] sm:$0xff]  ;;  %v5387_v6 = vpack.c.bf16 %v43_v4, %v42_v2  ;;  %v45_v7 = vld [vmem:[#allocation2 + $0x8] sm:$0xff]  ;;  %v129_v12 = vld [vmem:[#allocation5 + $0x28] sm:$0xff]  ;;  %v178_v44 = vshrl.u32 %v132_v40, 7  ;;  %s6063_s7 = smov 120   ;;  %s6065_s8 = smov 56  }
  0x29   :  { %5028 = vmatprep.mubr.msk.f32.mxu0 %vm46_vm0, %v44_v5  ;;  %5384 = vmatprep.subr.bf16.mxu0 %v5383_v3  ;;  %v140_v14 = vsel %vm46_vm0, %v129_v12, 0.0  ;;  %v191_v32 = vld [vmem:[#allocation5 + $0x38] sm:$0xff]  ;;  %v192_v33 = vld [vmem:[#allocation5 + $0x40] sm:$0xff]  ;;  %v193_v35 = vld [vmem:[#allocation5 + $0x48] sm:$0xff]  ;;  %s6066_s9 = smov 64   ;;  %s6067_s10 = smov 80  }
  0x2a   :  { %5386 = vmatpush3.bf16.msra.mxu0 %v5383_v3  ;;  %v5391_v34 = vpack.c.bf16 %v192_v33, %v191_v32  ;;  %v194_v36 = vld [vmem:[#allocation5 + $0x50] sm:$0xff]  ;;  %v6134_v48 = vsub.s32 0, %v178_v44  ;;  %v6136_v51 = vsub.s32 1, %v178_v44  ;;  %vm6172_vm2 = vmpackc.low %vm295_vm1, %vm295_vm1  ;;  %s6068_s11 = smov 72   ;;  %s6069_s12 = smov 112   ;;  %vm1117_vm5 = vcmask 195584  }
  0x2b   :  { %5388 = vmatprep.subr.bf16.mxu0 %v5387_v6  ;;  %v5395_v37 = vpack.c.bf16 %v194_v36, %v193_v35  ;;  %v136_v50 = vld [vmem:[#allocation5 + $0x30] sm:$0x3]  ;;  %s6070_s13 = smov 104   ;;  %s6071_s14 = smov 40   ;;  %vm2282_vm6 = vcmask 523264   ;;  %vm4658_vm7 = vcmask 1040384  }
  0x2c   :  { %v180_v52 = vrot.slane %v136_v50, %v6134_v48  ;;  %v187_v55 = vrot.slane %v136_v50, %v6136_v51  ;;  %s6072_s15 = smov 48   ;;  %s6073_s16 = smov 16   ;;  %vm4660_vm8 = vcmask 254976  }
  0x2d   :  { %s6074_s17 = smov 24   ;;  %s6075_s18 = smov [#allocation7]  }
  0x2e   :  { %5390 = vmatpush3.bf16.msra.mxu0 %v5387_v6  ;;  %s4668_s19 = sshll.u32 %s6075_s18, 4  ;;  %s4669_s19 = int_to_ptr.vmem [resolvable:$true] %s4668_s19 }
  0x2f   :  { %5392 = vmatprep.subr.bf16.mxu0 %v5391_v34  ;;  %p6034_p3 = scmp.lt.s32.totalorder %s4669_s19, %s4669_s19 }
  0x31   :  { %5029 = vmatmul.mubr.msk.f32.vlgmr.msra.gmra.mrb[0].mxu0 %vm46_vm0, %v45_v7 }
  0x32   :  { %5394 = vmatpush3.bf16.msra.mxu0 %v5391_v34 }
  0x33   :  { %5396 = vmatprep.subr.bf16.mxu0 %v5395_v37 }
  0x36   :  { %5398 = vmatpush3.bf16.msra.mxu0 %v5395_v37 }
 0x104   :  { %v5030_v9 = vpop.f32.mrb[0].mxu0 }
 0x105   :  { %v119_v10 = vpop.f32.mrb[1].mxu0  ;;  %v6124_v15 = vadd.f32 %v5030_v9, %v128_v8 }
 0x106   :  { %v6119_v11 = vadd.f32 %v128_v8, %v119_v10 }
 0x107   :  { %v143_v16 = vsel %vm46_vm0, %v6124_v15, 0.0 }
 0x108   :  { %v137_v13 = vsel %vm46_vm0, %v6119_v11, 0.0 }
 0x109   :  { %138 = vadd.xlane.f32.xlu0 %v137_v13 }
 0x10d   :  { %141 = vadd.xlane.f32.xlu0 %v140_v14 }
 0x111   :  { %144 = vadd.xlane.f32.xlu0 %v143_v16 }
 0x196   :  { %v139_v17 = vpop.xlane.xlu0 %138 }
 0x197   :  { %v147_v18 = vmul.f32 0.03125, %v139_v17 }
 0x199   :  { %v150_v19 = vsub.f32 %v6119_v11, %v147_v18 }
 0x19a   :  { %v142_v20 = vpop.xlane.xlu0 %141 }
 0x19b   :  { %v148_v21 = vmul.f32 0.03125, %v142_v20  ;;  %v153_v22 = vmul.f32 %v150_v19, %v150_v19 }
 0x19d   :  { %v151_v23 = vsub.f32 %v129_v12, %v148_v21  ;;  %v156_v24 = vsel %vm46_vm0, %v153_v22, 0.0  ;;  %v133_v21 = vand.u32 127, %v132_v40  ;;  %v6064_v22 = vmov 0.0  }
 0x19e   :  { %157 = vadd.xlane.f32.xlu1 %v156_v24  ;;  %v145_v25 = vpop.xlane.xlu0 %144 }
 0x19f   :  { %v149_v26 = vmul.f32 0.03125, %v145_v25  ;;  %v154_v27 = vmul.f32 %v151_v23, %v151_v23  ;;  %vm134_vm3 = vcmp.ge.s32.totalorder %v133_v21, 9 }
 0x1a1   :  { %v152_v28 = vsub.f32 %v6124_v15, %v149_v26  ;;  %v159_v29 = vsel %vm46_vm0, %v154_v27, 0.0 }
 0x1a2   :  { %160 = vadd.xlane.f32.xlu1 %v159_v29 }
 0x1a3   :  { %v155_v30 = vmul.f32 %v152_v28, %v152_v28 }
 0x1a5   :  { %v162_v31 = vsel %vm46_vm0, %v155_v30, 0.0 }
 0x1a6   :  { %163 = vadd.xlane.f32.xlu1 %v162_v31 }
 0x22b   :  { %v158_v38 = vpop.xlane.xlu1 %157 }
 0x22c   :  { %v165_v39 = vmul.f32 0.03125, %v158_v38 }
 0x22e   :  { %v168_v41 = vadd.f32 1e-05, %v165_v39 }
 0x22f   :  { %v161_v42 = vpop.xlane.xlu1 %160 }
 0x230   :  { %5810 = vrsqrt.f32 %v168_v41  ;;  %v166_v43 = vmul.f32 0.03125, %v161_v42 }
 0x232   :  { %v169_v45 = vadd.f32 1e-05, %v166_v43 }
 0x233   :  { %v164_v46 = vpop.xlane.xlu1 %163 }
 0x234   :  { %5812 = vrsqrt.f32 %v169_v45  ;;  %v167_v47 = vmul.f32 0.03125, %v164_v46 }
 0x236   :  { %v170_v49 = vadd.f32 1e-05, %v167_v47 }
 0x238   :  { %5814 = vrsqrt.f32 %v170_v49 }
 0x23a   :  { %v5811_v53 = vpop.eup %5810 }
 0x23b   :  { %v174_v54 = vmul.f32 %v5811_v53, %v150_v19 }
 0x23d   :  { %v181_v56 = vmul.f32 %v180_v52, %v174_v54 }
 0x23e   :  { %v5813_v57 = vpop.eup %5812 }
 0x23f   :  { %v175_v58 = vmul.f32 %v5813_v57, %v151_v23  ;;  %v188_v59 = vadd.f32 %v187_v55, %v181_v56  ;;  %v6189_v23 = vsel %vm134_vm3, -1e+30, %v6064_v22 }
 0x241   :  { %5039 = vmatprep.mubr.msk.f32.mxu0 %vm46_vm0, %v188_v59  ;;  %v182_v60 = vmul.f32 %v180_v52, %v175_v58 }
 0x242   :  { %v5815_v61 = vpop.eup %5814 }
 0x243   :  { %v189_v62 = vadd.f32 %v187_v55, %v182_v60  ;;  %v176_v63 = vmul.f32 %v5815_v61, %v152_v28 }
 0x245   :  { %5040 = vmatmul.mubr.msk.f32.vlgmr.msra.gmra.mrb[2].mxu0 %vm46_vm0, %v189_v62  ;;  %v183_v0 = vmul.f32 %v180_v52, %v176_v63 }
 0x247   :  { %v190_v1 = vadd.f32 %v187_v55, %v183_v0 }
 0x249   :  { %5042 = vmatprep.mubr.msk.f32.mxu0 %vm46_vm0, %v190_v1 }
 0x24a   :  { %5043 = vmatmul.mubr.msk.f32.gmra.mrb[4].mxu0 %vm46_vm0, %v189_v62 }
 0x318   :  { %v6144_v2 = vpop.f32.mrb[2].mxu0 }
 0x319   :  { %v6146_v3 = vpop.f32.mrb[3].mxu0 }
 0x31a   :  { %5049 = vmatprep.mubr.msk.f32.mxu0 %vm295_vm1, %v6146_v3  ;;  %v6152_v4 = vpack.i.bf16 %v6144_v2, %v6146_v3 }
 0x31c   :  { %5651 = vrot.lane.b32.xlu0 %v6152_v4, %s6061_s1  ;;  %5656 = vrot.lane.b32.xlu1 %v6152_v4, %s6062_s6 }
 0x31d   :  { %v6158_v5 = vpop.f32.mrb[4].mxu0 }
 0x31e   :  { %v6160_v6 = vpop.f32.mrb[5].mxu0 }
 0x31f   :  { %v6164_v7 = vpack.i.bf16 %v6158_v5, %v6160_v6 }
 0x320   :  { %489 = vrot.lane.b32.xlu1 %v6146_v3, %s6063_s7 }
 0x324   :  { %491 = vrot.lane.b32.xlu1 %v6144_v2, %s6063_s7 }
 0x38e   :  { %v5657_v8 = vpop.permute.xlu1 %5656  ;;  %v5652_v9 = vpop.permute.xlu0 %5651 }
 0x38f   :  { %v5659_v10 = vunpack.i.h.bf16 %v5657_v8  ;;  %v5658_v12 = vunpack.i.l.bf16 %v5657_v8  ;;  %v5654_v13 = vunpack.i.h.bf16 %v5652_v9  ;;  %v5653_v14 = vunpack.i.l.bf16 %v5652_v9 }
 0x391   :  { %v5399_v17 = vpack.c.bf16 %v5654_v13, %v5653_v14  ;;  %v5409_v18 = vpack.c.bf16 %v5659_v10, %v5658_v12 }
 0x392   :  { %v490_v19 = vpop.permute.xlu1 %489 }
 0x393   :  { %5401 = vmatprep.subr.msk.bf16.mxu0 %vm6172_vm2, %v5399_v17 }
 0x394   :  { %5404 = vmatpush3.bf16.xpose.msk.msra.mxu0 %vm6172_vm2, %v5399_v17 }
 0x395   :  { %5411 = vmatprep.subr.msk.bf16.mxu0 %vm6172_vm2, %v5409_v18 }
 0x396   :  { %v492_v20 = vpop.permute.xlu1 %491 }
 0x39b   :  { %5050 = vmatmul.mubr.msk.f32.vlgmr.msra.gmra.mrb[6].mxu0 %vm295_vm1, %v6144_v2 }
 0x39c   :  { %5414 = vmatpush3.bf16.xpose.msk.msra.mxu0 %vm6172_vm2, %v5409_v18  ;;  %5063 = vmatprep.mubr.msk.f32.mxu0 %vm295_vm1, %v490_v19 }
 0x3a3   :  { %5064 = vmatmul.mubr.msk.f32.vlgmr.msra.gmra.mrb[8].mxu0 %vm295_vm1, %v492_v20 }
 0x46e   :  { %v5051_v24 = vpop.f32.mrb[6].mxu0 }
 0x46f   :  { %v376_v25 = vadd.f32 %v5051_v24, %v6189_v23  ;;  %v370_v26 = vpop.f32.mrb[7].mxu0 }
 0x470   :  { %v371_v27 = vadd.f32 %v370_v26, %v6189_v23 }
 0x471   :  { %v383_v28 = vsel %vm379_vm4, %v376_v25, -inf }
 0x472   :  { %384 = vmax.xlane.f32.xlu1 %v383_v28  ;;  %v380_v29 = vsel %vm379_vm4, %v371_v27, -inf }
 0x473   :  { %381 = vmax.xlane.f32.xlu0 %v380_v29 }
 0x476   :  { %v5065_v30 = vpop.f32.mrb[8].mxu0 }
 0x477   :  { %v571_v31 = vpop.f32.mrb[9].mxu0  ;;  %v577_v33 = vadd.f32 %v5065_v30, %v6189_v23 }
 0x478   :  { %v572_v32 = vadd.f32 %v571_v31, %v6189_v23 }
 0x479   :  { %v583_v35 = vsel %vm379_vm4, %v577_v33, -inf }
 0x47a   :  { %v580_v34 = vsel %vm379_vm4, %v572_v32, -inf }
 0x47b   :  { %581 = vmax.xlane.f32.xlu0 %v580_v34 }
 0x47f   :  { %584 = vmax.xlane.f32.xlu0 %v583_v35 }
 0x4ff   :  { %v385_v36 = vpop.xlane.xlu1 %384 }
 0x500   :  { %v387_v37 = vsub.f32 %v376_v25, %v385_v36  ;;  %v382_v38 = vpop.xlane.xlu0 %381 }
 0x501   :  { %v386_v39 = vsub.f32 %v371_v27, %v382_v38 }
 0x502   :  { %v390_v40 = vmul.f32 1.442695, %v387_v37 }
 0x503   :  { %v388_v41 = vmul.f32 1.442695, %v386_v39 }
 0x504   :  { %5816 = vpow2.f32 %v390_v40 }
 0x505   :  { %5818 = vpow2.f32 %v388_v41 }
 0x508   :  { %v582_v42 = vpop.xlane.xlu0 %581 }
 0x509   :  { %v586_v43 = vsub.f32 %v572_v32, %v582_v42 }
 0x50b   :  { %v588_v44 = vmul.f32 1.442695, %v586_v43 }
 0x50c   :  { %v585_v45 = vpop.xlane.xlu0 %584 }
 0x50d   :  { %5820 = vpow2.f32 %v588_v44  ;;  %v587_v46 = vsub.f32 %v577_v33, %v585_v45 }
 0x50e   :  { %v5817_v47 = vpop.eup %5816 }
 0x50f   :  { %v5819_v49 = vpop.eup %5818  ;;  %v590_v50 = vmul.f32 1.442695, %v587_v46  ;;  %v395_v52 = vsel %vm379_vm4, %v5817_v47, 0.0 }
 0x510   :  { %396 = vadd.xlane.f32.xlu1 %v395_v52  ;;  %v392_v53 = vsel %vm379_vm4, %v5819_v49, 0.0 }
 0x511   :  { %5822 = vpow2.f32 %v590_v50  ;;  %393 = vadd.xlane.f32.xlu0 %v392_v53 }
 0x517   :  { %v5821_v54 = vpop.eup %5820 }
 0x518   :  { %v592_v55 = vsel %vm379_vm4, %v5821_v54, 0.0 }
 0x519   :  { %593 = vadd.xlane.f32.xlu0 %v592_v55 }
 0x51b   :  { %v5823_v56 = vpop.eup %5822 }
 0x51c   :  { %v595_v57 = vsel %vm379_vm4, %v5823_v56, 0.0 }
 0x51d   :  { %596 = vadd.xlane.f32.xlu1 %v595_v57 }
 0x52e   :  { %5666 = vrot.lane.b32.xlu1 %v6152_v4, %s6065_s8 }
 0x52f   :  { %5661 = vrot.lane.b32.xlu0 %v6152_v4, %s6066_s9 }
 0x532   :  { %5671 = vrot.lane.b32.xlu1 %v6152_v4, %s6067_s10 }
 0x533   :  { %5676 = vrot.lane.b32.xlu0 %v6152_v4, %s6068_s11 }
 0x536   :  { %689 = vrot.lane.b32.xlu1 %v6146_v3, %s6069_s12 }
 0x537   :  { %889 = vrot.lane.b32.xlu0 %v6146_v3, %s6070_s13 }
 0x53a   :  { %691 = vrot.lane.b32.xlu1 %v6144_v2, %s6069_s12 }
 0x53e   :  { %891 = vrot.lane.b32.xlu1 %v6144_v2, %s6070_s13 }
 0x59d   :  { %v397_v59 = vpop.xlane.xlu1 %396 }
 0x59e   :  { %v394_v58 = vpop.xlane.xlu0 %393 }
 0x59f   :  { %5824 = vrcp.f32 %v394_v58 }
 0x5a0   :  { %5826 = vrcp.f32 %v397_v59 }
 0x5a6   :  { %v594_v60 = vpop.xlane.xlu0 %593 }
 0x5a7   :  { %5828 = vrcp.f32 %v594_v60 }
 0x5a9   :  { %v5825_v61 = vpop.eup %5824 }
 0x5aa   :  { %v597_v62 = vpop.xlane.xlu1 %596  ;;  %v5662_v63 = vpop.permute.xlu0 %5661  ;;  %v399_v0 = vmul.f32 %v5825_v61, %v5819_v49 }
 0x5ab   :  { %5830 = vrcp.f32 %v597_v62  ;;  %v5664_v1 = vunpack.i.h.bf16 %v5662_v63  ;;  %v5663_v8 = vunpack.i.l.bf16 %v5662_v63  ;;  %v5827_v9 = vpop.eup %5826 }
 0x5ac   :  { %5056 = vmatprep.mubr.msk.f32.mxu1 %vm379_vm4, %v399_v0  ;;  %v401_v20 = vmul.f32 %v5827_v9, %v5817_v47 }
 0x5ad   :  { %v5405_v3 = vpack.c.bf16 %v5664_v1, %v5663_v8 }
 0x5ae   :  { %v5667_v10 = vpop.permute.xlu1 %5666  ;;  %v5677_v12 = vpop.permute.xlu0 %5676 }
 0x5af   :  { %v5669_v2 = vunpack.i.h.bf16 %v5667_v10  ;;  %v5668_v13 = vunpack.i.l.bf16 %v5667_v10  ;;  %v5679_v14 = vunpack.i.h.bf16 %v5677_v12  ;;  %v5678_v17 = vunpack.i.l.bf16 %v5677_v12  ;;  %5406 = vmatprep.subr.bf16.mxu1 %v5405_v3 }
 0x5b0   :  { %5408 = vmatpush3.bf16.msra.mxu1 %v5405_v3 }
 0x5b1   :  { %v5829_v18 = vpop.eup %5828  ;;  %v5429_v19 = vpack.c.bf16 %v5679_v14, %v5678_v17  ;;  %v5415_v21 = vpack.c.bf16 %v5669_v2, %v5668_v13 }
 0x5b2   :  { %v5672_v22 = vpop.permute.xlu1 %5671  ;;  %v890_v24 = vpop.permute.xlu0 %889  ;;  %v599_v25 = vmul.f32 %v5829_v18, %v5821_v54 }
 0x5b3   :  { %v5674_v26 = vunpack.i.h.bf16 %v5672_v22  ;;  %v5673_v27 = vunpack.i.l.bf16 %v5672_v22  ;;  %5057 = vmatmul.mubr.msk.f32.vlgmr.msra.gmra.mrb[0].mxu1 %vm379_vm4, %v401_v20  ;;  %5416 = vmatprep.subr.bf16.mxu1 %v5415_v21 }
 0x5b4   :  { %5431 = vmatprep.subr.msk.bf16.mxu0 %vm6172_vm2, %v5429_v19  ;;  %5091 = vmatprep.mubr.msk.f32.mxu0 %vm295_vm1, %v890_v24 }
 0x5b5   :  { %v5831_v28 = vpop.eup %5830  ;;  %v5419_v29 = vpack.c.bf16 %v5674_v26, %v5673_v27  ;;  %5418 = vmatpush3.bf16.msra.mxu1 %v5415_v21  ;;  %5070 = vmatprep.mubr.msk.f32.mxu1 %vm379_vm4, %v599_v25 }
 0x5b6   :  { %5434 = vmatpush3.bf16.xpose.msk.msra.mxu0 %vm6172_vm2, %v5429_v19  ;;  %v690_v30 = vpop.permute.xlu1 %689  ;;  %v601_v31 = vmul.f32 %v5831_v28, %v5823_v56 }
 0x5b7   :  { %5421 = vmatprep.subr.msk.bf16.mxu1 %vm6172_vm2, %v5419_v29 }
 0x5b8   :  { %5071 = vmatmul.mubr.msk.f32.vlgmr.msra.gmra.mrb[2].mxu1 %vm379_vm4, %v601_v31 }
 0x5b9   :  { %5077 = vmatprep.mubr.msk.f32.mxu1 %vm295_vm1, %v690_v30 }
 0x5ba   :  { %v692_v32 = vpop.permute.xlu1 %691 }
 0x5be   :  { %5424 = vmatpush3.bf16.xpose.msk.msra.mxu1 %vm6172_vm2, %v5419_v29  ;;  %v892_v33 = vpop.permute.xlu1 %891 }
 0x5bf   :  { %5092 = vmatmul.mubr.msk.f32.vlgmr.msra.gmra.mrb[10].mxu0 %vm295_vm1, %v892_v33 }
 0x5c5   :  { %5078 = vmatmul.mubr.msk.f32.vlgmr.msra.gmra.mrb[4].mxu1 %vm295_vm1, %v692_v32 }
 0x686   :  { %v6235_v34 = vpop.f32.mrb[0].mxu1 }
 0x687   :  { %v6237_v35 = vpop.f32.mrb[1].mxu1 }
 0x68b   :  { %v6239_v36 = vpop.f32.mrb[2].mxu1 }
 0x68c   :  { %v6241_v37 = vpop.f32.mrb[3].mxu1 }
 0x692   :  { %v5093_v38 = vpop.f32.mrb[10].mxu0 }
 0x693   :  { %v971_v39 = vpop.f32.mrb[11].mxu0  ;;  %v977_v47 = vadd.f32 %v5093_v38, %v6189_v23 }
 0x694   :  { %v972_v45 = vadd.f32 %v971_v39, %v6189_v23 }
 0x695   :  { %v983_v50 = vsel %vm379_vm4, %v977_v47, -inf }
 0x696   :  { %v980_v49 = vsel %vm379_vm4, %v972_v45, -inf }
 0x698   :  { %v5079_v40 = vpop.f32.mrb[4].mxu1 }
 0x699   :  { %v777_v41 = vadd.f32 %v5079_v40, %v6189_v23  ;;  %v771_v42 = vpop.f32.mrb[5].mxu1 }
 0x69a   :  { %v772_v43 = vadd.f32 %v771_v42, %v6189_v23 }
 0x69b   :  { %v783_v44 = vsel %vm379_vm4, %v777_v41, -inf }
 0x69c   :  { %784 = vmax.xlane.f32.xlu1 %v783_v44  ;;  %v780_v46 = vsel %vm379_vm4, %v772_v43, -inf }
 0x69d   :  { %781 = vmax.xlane.f32.xlu0 %v780_v46 }
 0x6a1   :  { %981 = vmax.xlane.f32.xlu0 %v980_v49 }
 0x6a5   :  { %984 = vmax.xlane.f32.xlu0 %v983_v50 }
 0x729   :  { %v785_v54 = vpop.xlane.xlu1 %784 }
 0x72a   :  { %v782_v52 = vpop.xlane.xlu0 %781  ;;  %v787_v57 = vsub.f32 %v777_v41, %v785_v54 }
 0x72b   :  { %v786_v53 = vsub.f32 %v772_v43, %v782_v52 }
 0x72c   :  { %v790_v62 = vmul.f32 1.442695, %v787_v57 }
 0x72d   :  { %v788_v58 = vmul.f32 1.442695, %v786_v53 }
 0x72e   :  { %v982_v55 = vpop.xlane.xlu0 %981 }
 0x72f   :  { %v986_v56 = vsub.f32 %v972_v45, %v982_v55 }
 0x731   :  { %v988_v59 = vmul.f32 1.442695, %v986_v56 }
 0x732   :  { %v985_v60 = vpop.xlane.xlu0 %984 }
 0x733   :  { %5832 = vpow2.f32 %v988_v59  ;;  %v987_v61 = vsub.f32 %v977_v47, %v985_v60 }
 0x734   :  { %5834 = vpow2.f32 %v788_v58 }
 0x735   :  { %v990_v63 = vmul.f32 1.442695, %v987_v61 }
 0x737   :  { %5836 = vpow2.f32 %v990_v63 }
 0x738   :  { %5838 = vpow2.f32 %v790_v62 }
 0x73d   :  { %v5833_v0 = vpop.eup %5832 }
 0x73e   :  { %v992_v1 = vsel %vm379_vm4, %v5833_v0, 0.0  ;;  %v5835_v8 = vpop.eup %5834 }
 0x73f   :  { %993 = vadd.xlane.f32.xlu0 %v992_v1  ;;  %v792_v9 = vsel %vm379_vm4, %v5835_v8, 0.0 }
 0x741   :  { %v5837_v3 = vpop.eup %5836 }
 0x742   :  { %v995_v10 = vsel %vm379_vm4, %v5837_v3, 0.0  ;;  %v5839_v12 = vpop.eup %5838 }
 0x743   :  { %793 = vadd.xlane.f32.xlu0 %v792_v9  ;;  %996 = vadd.xlane.f32.xlu1 %v995_v10  ;;  %v795_v2 = vsel %vm379_vm4, %v5839_v12, 0.0 }
 0x747   :  { %796 = vadd.xlane.f32.xlu1 %v795_v2 }
 0x758   :  { %5686 = vrot.lane.b32.xlu1 %v6152_v4, %s6071_s14 }
 0x759   :  { %5681 = vrot.lane.b32.xlu0 %v6152_v4, %s6072_s15 }
 0x75c   :  { %5691 = vrot.lane.b32.xlu1 %v6164_v7, %s6061_s1 }
 0x7cc   :  { %v994_v13 = vpop.xlane.xlu0 %993 }
 0x7d0   :  { %v997_v14 = vpop.xlane.xlu1 %996  ;;  %v794_v17 = vpop.xlane.xlu0 %793 }
 0x7d1   :  { %5840 = vrcp.f32 %v794_v17 }
 0x7d2   :  { %5842 = vrcp.f32 %v994_v13 }
 0x7d4   :  { %v797_v18 = vpop.xlane.xlu1 %796  ;;  %v5682_v19 = vpop.permute.xlu0 %5681 }
 0x7d5   :  { %5844 = vrcp.f32 %v797_v18  ;;  %v5684_v20 = vunpack.i.h.bf16 %v5682_v19  ;;  %v5683_v21 = vunpack.i.l.bf16 %v5682_v19 }
 0x7d6   :  { %5846 = vrcp.f32 %v997_v14 }
 0x7d7   :  { %v5425_v22 = vpack.c.bf16 %v5684_v20, %v5683_v21 }
 0x7d8   :  { %v5687_v24 = vpop.permute.xlu1 %5686 }
 0x7d9   :  { %v5689_v25 = vunpack.i.h.bf16 %v5687_v24  ;;  %v5688_v26 = vunpack.i.l.bf16 %v5687_v24  ;;  %5426 = vmatprep.subr.bf16.mxu1 %v5425_v22 }
 0x7da   :  { %5428 = vmatpush3.bf16.msra.mxu1 %v5425_v22 }
 0x7db   :  { %v5435_v4 = vpack.c.bf16 %v5689_v25, %v5688_v26  ;;  %v5841_v27 = vpop.eup %5840 }
 0x7dc   :  { %v5692_v28 = vpop.permute.xlu1 %5691  ;;  %v799_v29 = vmul.f32 %v5841_v27, %v5835_v8  ;;  %v5843_v30 = vpop.eup %5842 }
 0x7dd   :  { %5436 = vmatprep.subr.bf16.mxu1 %v5435_v4  ;;  %v5694_v31 = vunpack.i.h.bf16 %v5692_v28  ;;  %v5693_v32 = vunpack.i.l.bf16 %v5692_v28  ;;  %v999_v40 = vmul.f32 %v5843_v30, %v5833_v0 }
 0x7de   :  { %5084 = vmatprep.mubr.msk.f32.mxu1 %vm379_vm4, %v799_v29 }
 0x7df   :  { %v5845_v33 = vpop.eup %5844  ;;  %v5439_v41 = vpack.c.bf16 %v5694_v31, %v5693_v32 }
 0x7e0   :  { %v801_v38 = vmul.f32 %v5845_v33, %v5839_v12  ;;  %v5847_v39 = vpop.eup %5846 }
 0x7e1   :  { %v1001_v42 = vmul.f32 %v5847_v39, %v5837_v3 }
 0x7e2   :  { %5085 = vmatmul.mubr.msk.f32.vlgmr.msra.gmra.mrb[6].mxu1 %vm379_vm4, %v801_v38 }
 0x7e3   :  { %5438 = vmatpush3.bf16.msra.mxu1 %v5435_v4  ;;  %5098 = vmatprep.mubr.msk.f32.mxu1 %vm379_vm4, %v999_v40 }
 0x7e4   :  { %5441 = vmatprep.subr.msk.bf16.mxu1 %vm6172_vm2, %v5439_v41 }
 0x7e6   :  { %5099 = vmatmul.mubr.msk.f32.vlgmr.msra.gmra.mrb[8].mxu1 %vm379_vm4, %v1001_v42 }
 0x7e7   :  { %5105 = vmatprep.mubr.msk.f32.mxu1 %vm295_vm1, %v6160_v6 }
 0x7ec   :  { %5444 = vmatpush3.bf16.xpose.msk.msra.mxu1 %vm6172_vm2, %v5439_v41 }
 0x7f3   :  { %5106 = vmatmul.mubr.msk.f32.vlgmr.msra.gmra.mrb[10].mxu1 %vm295_vm1, %v6158_v5 }
 0x8b5   :  { %v6273_v43 = vpop.f32.mrb[6].mxu1 }
 0x8b6   :  { %v6275_v44 = vpop.f32.mrb[7].mxu1 }
 0x8b9   :  { %v6277_v45 = vpop.f32.mrb[8].mxu1 }
 0x8ba   :  { %v6279_v46 = vpop.f32.mrb[9].mxu1 }
 0x8c6   :  { %v5107_v47 = vpop.f32.mrb[10].mxu1 }
 0x8c7   :  { %v1206_v49 = vadd.f32 %v5107_v47, %v6189_v23  ;;  %v1200_v50 = vpop.f32.mrb[11].mxu1 }
 0x8c8   :  { %v1201_v52 = vadd.f32 %v1200_v50, %v6189_v23 }
 0x8c9   :  { %v1212_v53 = vsel %vm379_vm4, %v1206_v49, -inf }
 0x8ca   :  { %1213 = vmax.xlane.f32.xlu0 %v1212_v53  ;;  %v1209_v54 = vsel %vm379_vm4, %v1201_v52, -inf }
 0x8cb   :  { %1210 = vmax.xlane.f32.xlu1 %v1209_v54 }
 0x8dc   :  { %5696 = vrot.lane.b32.xlu1 %v6164_v7, %s6066_s9 }
 0x8e0   :  { %1318 = vrot.lane.b32.xlu1 %v6160_v6, %s6063_s7 }
 0x8e4   :  { %1320 = vrot.lane.b32.xlu1 %v6158_v5, %s6063_s7 }
 0x957   :  { %v1214_v55 = vpop.xlane.xlu0 %1213 }
 0x958   :  { %v1216_v56 = vsub.f32 %v1206_v49, %v1214_v55  ;;  %v1211_v57 = vpop.xlane.xlu1 %1210 }
 0x959   :  { %v1215_v58 = vsub.f32 %v1201_v52, %v1211_v57 }
 0x95a   :  { %v1219_v59 = vmul.f32 1.442695, %v1216_v56 }
 0x95b   :  { %v1217_v60 = vmul.f32 1.442695, %v1215_v58 }
 0x95c   :  { %5848 = vpow2.f32 %v1219_v59  ;;  %v5697_v61 = vpop.permute.xlu1 %5696 }
 0x95d   :  { %v5699_v62 = vunpack.i.h.bf16 %v5697_v61  ;;  %v5698_v63 = vunpack.i.l.bf16 %v5697_v61  ;;  %5850 = vpow2.f32 %v1217_v60 }
 0x95f   :  { %v5445_v0 = vpack.c.bf16 %v5699_v62, %v5698_v63 }
 0x960   :  { %v1319_v22 = vpop.permute.xlu1 %1318 }
 0x961   :  { %5446 = vmatprep.subr.bf16.mxu0 %v5445_v0 }
 0x962   :  { %5448 = vmatpush3.bf16.msra.mxu0 %v5445_v0 }
 0x964   :  { %v1321_v24 = vpop.permute.xlu1 %1320 }
 0x966   :  { %v5849_v1 = vpop.eup %5848 }
 0x967   :  { %v1224_v8 = vsel %vm379_vm4, %v5849_v1, 0.0  ;;  %v5851_v3 = vpop.eup %5850 }
 0x968   :  { %1225 = vadd.xlane.f32.xlu0 %v1224_v8  ;;  %v1221_v9 = vsel %vm379_vm4, %v5851_v3, 0.0 }
 0x96c   :  { %1222 = vadd.xlane.f32.xlu0 %v1221_v9 }
 0x982   :  { %5701 = vrot.lane.b32.xlu0 %v6164_v7, %s6062_s6 }
 0x9f5   :  { %v1226_v10 = vpop.xlane.xlu0 %1225 }
 0x9f6   :  { %5852 = vrcp.f32 %v1226_v10 }
 0x9f9   :  { %v1223_v12 = vpop.xlane.xlu0 %1222 }
 0x9fa   :  { %5854 = vrcp.f32 %v1223_v12 }
 0x9fd   :  { %v5702_v2 = vpop.permute.xlu0 %5701 }
 0x9fe   :  { %v5704_v13 = vunpack.i.h.bf16 %v5702_v2  ;;  %v5703_v14 = vunpack.i.l.bf16 %v5702_v2 }
 0xa00   :  { %v5449_v17 = vpack.c.bf16 %v5704_v13, %v5703_v14  ;;  %v5853_v18 = vpop.eup %5852 }
 0xa01   :  { %v1230_v21 = vmul.f32 %v5853_v18, %v5849_v1 }
 0xa02   :  { %5451 = vmatprep.subr.msk.bf16.mxu0 %vm6172_vm2, %v5449_v17 }
 0xa04   :  { %v5855_v19 = vpop.eup %5854 }
 0xa05   :  { %v1228_v20 = vmul.f32 %v5855_v19, %v5851_v3 }
 0xa07   :  { %5112 = vmatprep.mubr.msk.f32.mxu0 %vm379_vm4, %v1228_v20 }
 0xa08   :  { %5113 = vmatmul.mubr.msk.f32.vlgmr.msra.gmra.mrb[12].mxu0 %vm379_vm4, %v1230_v21 }
 0xa09   :  { %5454 = vmatpush3.bf16.xpose.msk.msra.mxu0 %vm6172_vm2, %v5449_v17  ;;  %5119 = vmatprep.mubr.msk.f32.mxu0 %vm295_vm1, %v1319_v22 }
 0xa10   :  { %5120 = vmatmul.mubr.msk.f32.vlgmr.msra.gmra.mrb[14].mxu0 %vm295_vm1, %v1321_v24 }
 0xadb   :  { %v6303_v25 = vpop.f32.mrb[12].mxu0 }
 0xadc   :  { %v6305_v26 = vpop.f32.mrb[13].mxu0 }
 0xae3   :  { %v5121_v4 = vpop.f32.mrb[14].mxu0 }
 0xae4   :  { %v1406_v27 = vadd.f32 %v5121_v4, %v6189_v23  ;;  %v1400_v28 = vpop.f32.mrb[15].mxu0 }
 0xae5   :  { %v1401_v29 = vadd.f32 %v1400_v28, %v6189_v23 }
 0xae6   :  { %v1412_v30 = vsel %vm379_vm4, %v1406_v27, -inf }
 0xae7   :  { %1413 = vmax.xlane.f32.xlu0 %v1412_v30  ;;  %v1409_v31 = vsel %vm379_vm4, %v1401_v29, -inf }
 0xae8   :  { %1410 = vmax.xlane.f32.xlu1 %v1409_v31 }
 0xaf9   :  { %5706 = vrot.lane.b32.xlu1 %v6164_v7, %s6065_s8 }
 0xafd   :  { %1518 = vrot.lane.b32.xlu1 %v6160_v6, %s6069_s12 }
 0xb01   :  { %1520 = vrot.lane.b32.xlu1 %v6158_v5, %s6069_s12 }
 0xb74   :  { %v1414_v32 = vpop.xlane.xlu0 %1413 }
 0xb75   :  { %v1416_v33 = vsub.f32 %v1406_v27, %v1414_v32  ;;  %v1411_v38 = vpop.xlane.xlu1 %1410 }
 0xb76   :  { %v1415_v39 = vsub.f32 %v1401_v29, %v1411_v38 }
 0xb77   :  { %v1419_v40 = vmul.f32 1.442695, %v1416_v33 }
 0xb78   :  { %v1417_v41 = vmul.f32 1.442695, %v1415_v39 }
 0xb79   :  { %5856 = vpow2.f32 %v1419_v40  ;;  %v5707_v42 = vpop.permute.xlu1 %5706 }
 0xb7a   :  { %v5709_v47 = vunpack.i.h.bf16 %v5707_v42  ;;  %v5708_v49 = vunpack.i.l.bf16 %v5707_v42  ;;  %5858 = vpow2.f32 %v1417_v41 }
 0xb7c   :  { %v5455_v50 = vpack.c.bf16 %v5709_v47, %v5708_v49 }
 0xb7d   :  { %v1519_v8 = vpop.permute.xlu1 %1518 }
 0xb7e   :  { %5456 = vmatprep.subr.bf16.mxu1 %v5455_v50 }
 0xb7f   :  { %5458 = vmatpush3.bf16.msra.mxu1 %v5455_v50 }
 0xb81   :  { %v1521_v3 = vpop.permute.xlu1 %1520 }
 0xb83   :  { %v5857_v52 = vpop.eup %5856 }
 0xb84   :  { %v1424_v53 = vsel %vm379_vm4, %v5857_v52, 0.0  ;;  %v5859_v54 = vpop.eup %5858 }
 0xb85   :  { %1425 = vadd.xlane.f32.xlu0 %v1424_v53  ;;  %v1421_v55 = vsel %vm379_vm4, %v5859_v54, 0.0 }
 0xb89   :  { %1422 = vadd.xlane.f32.xlu0 %v1421_v55 }
 0xb9f   :  { %5711 = vrot.lane.b32.xlu0 %v6164_v7, %s6067_s10 }
 0xc12   :  { %v1426_v56 = vpop.xlane.xlu0 %1425 }
 0xc13   :  { %5860 = vrcp.f32 %v1426_v56 }
 0xc16   :  { %v1423_v57 = vpop.xlane.xlu0 %1422 }
 0xc17   :  { %5862 = vrcp.f32 %v1423_v57 }
 0xc1a   :  { %v5712_v58 = vpop.permute.xlu0 %5711 }
 0xc1b   :  { %v5714_v59 = vunpack.i.h.bf16 %v5712_v58  ;;  %v5713_v60 = vunpack.i.l.bf16 %v5712_v58 }
 0xc1d   :  { %v5459_v61 = vpack.c.bf16 %v5714_v59, %v5713_v60  ;;  %v5861_v62 = vpop.eup %5860 }
 0xc1e   :  { %v1430_v1 = vmul.f32 %v5861_v62, %v5857_v52 }
 0xc1f   :  { %5461 = vmatprep.subr.msk.bf16.mxu1 %vm6172_vm2, %v5459_v61 }
 0xc21   :  { %v5863_v63 = vpop.eup %5862 }
 0xc22   :  { %v1428_v0 = vmul.f32 %v5863_v63, %v5859_v54 }
 0xc24   :  { %5126 = vmatprep.mubr.msk.f32.mxu1 %vm379_vm4, %v1428_v0 }
 0xc25   :  { %5127 = vmatmul.mubr.msk.f32.vlgmr.msra.gmra.mrb[12].mxu1 %vm379_vm4, %v1430_v1 }
 0xc26   :  { %5464 = vmatpush3.bf16.xpose.msk.msra.mxu1 %vm6172_vm2, %v5459_v61  ;;  %5133 = vmatprep.mubr.msk.f32.mxu1 %vm295_vm1, %v1519_v8 }
 0xc2d   :  { %5134 = vmatmul.mubr.msk.f32.vlgmr.msra.gmra.mrb[14].mxu1 %vm295_vm1, %v1521_v3 }
 0xcf8   :  { %v6329_v9 = vpop.f32.mrb[12].mxu1 }
 0xcf9   :  { %v6331_v10 = vpop.f32.mrb[13].mxu1 }
 0xd00   :  { %v5135_v12 = vpop.f32.mrb[14].mxu1 }
 0xd01   :  { %v1606_v2 = vadd.f32 %v5135_v12, %v6189_v23  ;;  %v1600_v13 = vpop.f32.mrb[15].mxu1 }
 0xd02   :  { %v1601_v14 = vadd.f32 %v1600_v13, %v6189_v23 }
 0xd03   :  { %v1612_v17 = vsel %vm379_vm4, %v1606_v2, -inf }
 0xd04   :  { %1613 = vmax.xlane.f32.xlu0 %v1612_v17  ;;  %v1609_v18 = vsel %vm379_vm4, %v1601_v14, -inf  ;;  %v1949_v17 = vld [vmem:[#allocation5 + $0x60] sm:$0xff] }
 0xd05   :  { %1610 = vmax.xlane.f32.xlu1 %v1609_v18 }
 0xd16   :  { %5716 = vrot.lane.b32.xlu1 %v6164_v7, %s6072_s15 }
 0xd1a   :  { %1718 = vrot.lane.b32.xlu1 %v6160_v6, %s6070_s13 }
 0xd1e   :  { %1720 = vrot.lane.b32.xlu1 %v6158_v5, %s6070_s13 }
 0xd91   :  { %v1614_v19 = vpop.xlane.xlu0 %1613 }
 0xd92   :  { %v1616_v20 = vsub.f32 %v1606_v2, %v1614_v19  ;;  %v1611_v21 = vpop.xlane.xlu1 %1610 }
 0xd93   :  { %v1615_v22 = vsub.f32 %v1601_v14, %v1611_v21  ;;  %v1948_v14 = vld [vmem:[#allocation5 + $0x58] sm:$0xff] }
 0xd94   :  { %v1619_v24 = vmul.f32 1.442695, %v1616_v20  ;;  %v5479_v18 = vpack.c.bf16 %v1949_v17, %v1948_v14  ;;  %v2132_v14 = vld [vmem:[#allocation5 + $0x90] sm:$0xff] }
 0xd95   :  { %v1617_v4 = vmul.f32 1.442695, %v1615_v22 }
 0xd96   :  { %5864 = vpow2.f32 %v1619_v24  ;;  %v5717_v27 = vpop.permute.xlu1 %5716 }
 0xd97   :  { %v5719_v28 = vunpack.i.h.bf16 %v5717_v27  ;;  %v5718_v29 = vunpack.i.l.bf16 %v5717_v27  ;;  %5866 = vpow2.f32 %v1617_v4  ;;  %v1950_v4 = vld [vmem:[#allocation5 + $0x68] sm:$0xff]  ;;  %v1951_v27 = vld [vmem:[#allocation5 + $0x70] sm:$0xff] }
 0xd99   :  { %v5465_v30 = vpack.c.bf16 %v5719_v28, %v5718_v29 }
 0xd9a   :  { %v1719_v53 = vpop.permute.xlu1 %1718 }
 0xd9b   :  { %5466 = vmatprep.subr.bf16.mxu0 %v5465_v30 }
 0xd9c   :  { %5468 = vmatpush3.bf16.msra.mxu0 %v5465_v30 }
 0xd9e   :  { %v1721_v54 = vpop.permute.xlu1 %1720 }
 0xda0   :  { %v5865_v31 = vpop.eup %5864 }
 0xda1   :  { %v1624_v6 = vsel %vm379_vm4, %v5865_v31, 0.0  ;;  %v5867_v32 = vpop.eup %5866 }
 0xda2   :  { %1625 = vadd.xlane.f32.xlu0 %v1624_v6  ;;  %v1621_v5 = vsel %vm379_vm4, %v5867_v32, 0.0  ;;  %v5483_v6 = vpack.c.bf16 %v1951_v27, %v1950_v4 }
 0xda6   :  { %1622 = vadd.xlane.f32.xlu0 %v1621_v5 }
 0xdbc   :  { %5721 = vrot.lane.b32.xlu0 %v6164_v7, %s6068_s11 }
 0xe2f   :  { %v1626_v33 = vpop.xlane.xlu0 %1625 }
 0xe30   :  { %5868 = vrcp.f32 %v1626_v33 }
 0xe33   :  { %v1623_v38 = vpop.xlane.xlu0 %1622 }
 0xe34   :  { %5870 = vrcp.f32 %v1623_v38 }
 0xe37   :  { %v5722_v39 = vpop.permute.xlu0 %5721 }
 0xe38   :  { %v5724_v40 = vunpack.i.h.bf16 %v5722_v39  ;;  %v5723_v41 = vunpack.i.l.bf16 %v5722_v39 }
 0xe3a   :  { %v5469_v42 = vpack.c.bf16 %v5724_v40, %v5723_v41  ;;  %v5869_v47 = vpop.eup %5868 }
 0xe3b   :  { %v1630_v52 = vmul.f32 %v5869_v47, %v5865_v31 }
 0xe3c   :  { %5471 = vmatprep.subr.msk.bf16.mxu0 %vm6172_vm2, %v5469_v42 }
 0xe3e   :  { %v5871_v49 = vpop.eup %5870 }
 0xe3f   :  { %v1628_v50 = vmul.f32 %v5871_v49, %v5867_v32 }
 0xe41   :  { %5140 = vmatprep.mubr.msk.f32.mxu0 %vm379_vm4, %v1628_v50  ;;  %v4736_v50 = vld [vmem:[#allocation5 + $0x78] ss:$0 sm:$0xff] }
 0xe42   :  { %5141 = vmatmul.mubr.msk.f32.vlgmr.msra.gmra.mrb[16].mxu0 %vm379_vm4, %v1630_v52  ;;  %v5984_v52 = vld [vmem:[#allocation5 + $0x28] sm:$0xff] }
 0xe43   :  { %5474 = vmatpush3.bf16.xpose.msk.msra.mxu0 %vm6172_vm2, %v5469_v42  ;;  %5147 = vmatprep.mubr.msk.f32.mxu0 %vm295_vm1, %v1719_v53 }
 0xe4a   :  { %5148 = vmatmul.mubr.msk.f32.vlgmr.msra.gmra.mrb[18].mxu0 %vm295_vm1, %v1721_v54 }
 0xf15   :  { %v5142_v55 = vpop.f32.mrb[16].mxu0 }
 0xf16   :  { %v1709_v56 = vpop.f32.mrb[17].mxu0 }
 0xf1d   :  { %v5149_v57 = vpop.f32.mrb[18].mxu0 }
 0xf1e   :  { %v1806_v58 = vadd.f32 %v5149_v57, %v6189_v23  ;;  %v1800_v59 = vpop.f32.mrb[19].mxu0 }
 0xf1f   :  { %v1801_v60 = vadd.f32 %v1800_v59, %v6189_v23 }
 0xf20   :  { %v1812_v61 = vsel %vm379_vm4, %v1806_v58, -inf }
 0xf21   :  { %1813 = vmax.xlane.f32.xlu0 %v1812_v61  ;;  %v1809_v62 = vsel %vm379_vm4, %v1801_v60, -inf }
 0xf22   :  { %1810 = vmax.xlane.f32.xlu1 %v1809_v62 }
 0xf33   :  { %5726 = vrot.lane.b32.xlu1 %v6164_v7, %s6071_s14 }
 0xf37   :  { %1093 = vrot.lane.b32.xlu1 %v6239_v36, %s6059_s20 }
 0xf3b   :  { %1099 = vrot.lane.b32.xlu1 %v6275_v44, %s6073_s16 }
 0xf3f   :  { %1101 = vrot.lane.b32.xlu1 %v6273_v43, %s6073_s16 }
 0xf43   :  { %1109 = vrot.lane.b32.xlu1 %v6277_v45, %s6074_s17 }
 0xf47   :  { %1922 = vrot.lane.b32.xlu1 %v6329_v9, %s6059_s20 }
 0xf4b   :  { %1930 = vrot.lane.b32.xlu1 %v5142_v55, %s6073_s16 }
 0xfae   :  { %v1814_v7 = vpop.xlane.xlu0 %1813 }
 0xfaf   :  { %v1816_v63 = vsub.f32 %v1806_v58, %v1814_v7  ;;  %v1811_v0 = vpop.xlane.xlu1 %1810 }
 0xfb0   :  { %v1815_v36 = vsub.f32 %v1801_v60, %v1811_v0 }
 0xfb1   :  { %v1819_v1 = vmul.f32 1.442695, %v1816_v63 }
 0xfb2   :  { %v1817_v8 = vmul.f32 1.442695, %v1815_v36 }
 0xfb3   :  { %5872 = vpow2.f32 %v1819_v1  ;;  %v5727_v44 = vpop.permute.xlu1 %5726 }
 0xfb4   :  { %v5729_v3 = vunpack.i.h.bf16 %v5727_v44  ;;  %v5728_v12 = vunpack.i.l.bf16 %v5727_v44  ;;  %5874 = vpow2.f32 %v1817_v8 }
 0xfb6   :  { %v5475_v43 = vpack.c.bf16 %v5729_v3, %v5728_v12 }
 0xfb7   :  { %v1094_v21 = vpop.permute.xlu1 %1093 }
 0xfb8   :  { %5476 = vmatprep.subr.bf16.mxu1 %v5475_v43 }
 0xfb9   :  { %5478 = vmatpush3.bf16.msra.mxu1 %v5475_v43 }
 0xfba   :  { %5480 = vmatprep.subr.bf16.mxu1 %v5479_v18 }
 0xfbb   :  { %v1100_v24 = vpop.permute.xlu1 %1099 }
 0xfbd   :  { %v5873_v45 = vpop.eup %5872 }
 0xfbe   :  { %v1824_v2 = vsel %vm379_vm4, %v5873_v45, 0.0  ;;  %v5875_v9 = vpop.eup %5874 }
 0xfbf   :  { %1825 = vadd.xlane.f32.xlu0 %v1824_v2  ;;  %v1821_v13 = vsel %vm379_vm4, %v5875_v9, 0.0  ;;  %v1102_v31 = vpop.permute.xlu1 %1101 }
 0xfc3   :  { %1822 = vadd.xlane.f32.xlu0 %v1821_v13  ;;  %v1110_v33 = vpop.permute.xlu1 %1109  ;;  %v2131_v13 = vld [vmem:[#allocation5 + $0x88] sm:$0xff] }
 0xfc4   :  { %v5487_v17 = vpack.c.bf16 %v2132_v14, %v2131_v13 }
 0xfc6   :  { %5488 = vmatprep.subr.bf16.mxu0 %v5487_v17 }
 0xfc7   :  { %v1923_v57 = vpop.permute.xlu1 %1922  ;;  %5490 = vmatpush3.bf16.msra.mxu0 %v5487_v17 }
 0xfc8   :  { %v1943_v62 = vsel %vm295_vm1, %v6303_v25, %v1923_v57 }
 0xfcb   :  { %v1931_v59 = vpop.permute.xlu1 %1930 }
 0xfcc   :  { %v1945_v0 = vsel %vm379_vm4, %v1943_v62, %v1931_v59  ;;  %v2278_v59 = vld [vmem:[#allocation5 + $0xd8] sm:$0xff] }
 0xfd9   :  { %1091 = vrot.lane.b32.xlu0 %v6241_v37, %s6059_s20 }
 0xfdd   :  { %1107 = vrot.lane.b32.xlu0 %v6279_v46, %s6074_s17 }
 0xfe1   :  { %1920 = vrot.lane.b32.xlu0 %v6331_v10, %s6059_s20 }
 0xfe5   :  { %1928 = vrot.lane.b32.xlu0 %v1709_v56, %s6073_s16 }
0x104c   :  { %v1826_v19 = vpop.xlane.xlu0 %1825 }
0x104d   :  { %5876 = vrcp.f32 %v1826_v19  ;;  %v2134_v19 = vld [vmem:[#allocation5 + $0xa0] sm:$0xff] }
0x1050   :  { %v1823_v20 = vpop.xlane.xlu0 %1822 }
0x1051   :  { %5878 = vrcp.f32 %v1823_v20 }
0x1054   :  { %v1092_v22 = vpop.permute.xlu0 %1091 }
0x1055   :  { %v1113_v46 = vsel %vm295_vm1, %v6237_v35, %v1092_v22  ;;  %v1114_v35 = vsel %vm295_vm1, %v6235_v34, %v1094_v21 }
0x1056   :  { %v1115_v32 = vsel %vm379_vm4, %v1113_v46, %v1100_v24  ;;  %v1116_v38 = vsel %vm379_vm4, %v1114_v35, %v1102_v31 }
0x1057   :  { %v5877_v37 = vpop.eup %5876  ;;  %v1119_v39 = vsel %vm1117_vm5, %v1116_v38, %v1110_v33 }
0x1058   :  { %v1108_v29 = vpop.permute.xlu0 %1107  ;;  %v1830_v10 = vmul.f32 %v5877_v37, %v5873_v45 }
0x1059   :  { %v1118_v5 = vsel %vm1117_vm5, %v1115_v32, %v1108_v29 }
0x105b   :  { %v5879_v28 = vpop.eup %5878 }
0x105c   :  { %v1828_v30 = vmul.f32 %v5879_v28, %v5875_v9  ;;  %v1921_v58 = vpop.permute.xlu0 %1920 }
0x105e   :  { %5154 = vmatprep.mubr.msk.f32.mxu1 %vm379_vm4, %v1828_v30 }
0x105f   :  { %5155 = vmatmul.mubr.msk.f32.vlgmr.msra.gmra.mrb[16].mxu1 %vm379_vm4, %v1830_v10 }
0x1060   :  { %5482 = vmatpush3.bf16.msra.mxu1 %v5479_v18  ;;  %5165 = vmatprep.mubr.msk.f32.mxu1 %vm46_vm0, %v1118_v5  ;;  %v1929_v60 = vpop.permute.xlu0 %1928  ;;  %v2133_v18 = vld [vmem:[#allocation5 + $0x98] sm:$0xff] }
0x1061   :  { %5484 = vmatprep.subr.bf16.mxu1 %v5483_v6  ;;  %v5491_v20 = vpack.c.bf16 %v2134_v19, %v2133_v18 }
0x1063   :  { %5492 = vmatprep.subr.bf16.mxu0 %v5491_v20 }
0x1064   :  { %5486 = vmatpush3.bf16.msra.mxu1 %v5483_v6  ;;  %5494 = vmatpush3.bf16.msra.mxu0 %v5491_v20  ;;  %v2062_v6 = vld [vmem:[#allocation5 + $0x80] sm:$0x3] }
0x1065   :  { %v6428_v33 = vrot.slane %v2062_v6, %v6134_v48 }
0x1067   :  { %5166 = vmatmul.mubr.msk.f32.vlgmr.msra.gmra.mrb[18].mxu1 %vm46_vm0, %v1119_v39 }
0x1132   :  { %v5156_v40 = vpop.f32.mrb[16].mxu1 }
0x1133   :  { %1938 = vrot.lane.b32.xlu1 %v5156_v40, %s6074_s17  ;;  %v1909_v41 = vpop.f32.mrb[17].mxu1 }
0x1134   :  { %1936 = vrot.lane.b32.xlu0 %v1909_v41, %s6074_s17 }
0x113a   :  { %v5167_v42 = vpop.f32.mrb[18].mxu1 }
0x113b   :  { %v2031_v47 = vpop.f32.mrb[19].mxu1  ;;  %v2051_v34 = vadd.f32 %v5984_v52, %v5167_v42 }
0x113c   :  { %v2050_v49 = vadd.f32 %v2031_v47, %v6119_v11  ;;  %v1942_v11 = vsel %vm295_vm1, %v6305_v26, %v1921_v58  ;;  %v2277_v58 = vld [vmem:[#allocation5 + $0xd0] sm:$0xff] }
0x113d   :  { %v6398_v54 = vadd.f32 %v4736_v50, %v2051_v34  ;;  %v1944_v7 = vsel %vm379_vm4, %v1942_v11, %v1929_v60  ;;  %v5503_v60 = vpack.c.bf16 %v2278_v59, %v2277_v58  ;;  %v2279_v11 = vld [vmem:[#allocation5 + $0xe0] sm:$0xff] }
0x113e   :  { %v6396_v53 = vadd.f32 %v4736_v50, %v2050_v49 }
0x113f   :  { %v2066_v56 = vsel %vm46_vm0, %v6398_v54, 0.0 }
0x1140   :  { %v2063_v55 = vsel %vm46_vm0, %v6396_v53, 0.0 }
0x1153   :  { %2064 = vadd.xlane.f32.xlu0 %v2063_v55  ;;  %v2275_v55 = vld [vmem:[#allocation5 + $0xc0] sm:$0xff] }
0x1157   :  { %2067 = vadd.xlane.f32.xlu1 %v2066_v56  ;;  %v2276_v56 = vld [vmem:[#allocation5 + $0xc8] sm:$0xff] }
0x1158   :  { %v5499_v57 = vpack.c.bf16 %v2276_v56, %v2275_v55 }
0x11a5   :  { %v1939_v61 = vpop.permute.xlu1 %1938 }
0x11a6   :  { %v1937_v63 = vpop.permute.xlu0 %1936  ;;  %v1947_v1 = vsel %vm1117_vm5, %v1945_v0, %v1939_v61  ;;  %v2280_v61 = vld [vmem:[#allocation5 + $0xe8] sm:$0xff] }
0x11a7   :  { %v1946_v36 = vsel %vm1117_vm5, %v1944_v7, %v1937_v63  ;;  %v5507_v62 = vpack.c.bf16 %v2280_v61, %v2279_v11 }
0x11a8   :  { %5168 = vmatprep.mubr.msk.f32.mxu1 %vm46_vm0, %v1946_v36 }
0x11a9   :  { %5169 = vmatmul.mubr.msk.f32.gmra.mrb[20].mxu1 %vm46_vm0, %v1947_v1 }
0x11e0   :  { %v2065_v8 = vpop.xlane.xlu0 %2064 }
0x11e1   :  { %v2075_v44 = vmul.f32 0.03125, %v2065_v8 }
0x11e3   :  { %v2079_v26 = vsub.f32 %v6396_v53, %v2075_v44 }
0x11e4   :  { %v2068_v3 = vpop.xlane.xlu1 %2067 }
0x11e5   :  { %v2076_v12 = vmul.f32 0.03125, %v2068_v3  ;;  %v2083_v25 = vmul.f32 %v2079_v26, %v2079_v26 }
0x11e7   :  { %v2080_v43 = vsub.f32 %v6398_v54, %v2076_v12  ;;  %v2087_v45 = vsel %vm46_vm0, %v2083_v25, 0.0  ;;  %v4737_v25 = vld [vmem:[#allocation5 + $0xa8] ss:$0 sm:$0xff] }
0x11e8   :  { %2088 = vadd.xlane.f32.xlu0 %v2087_v45 }
0x11e9   :  { %v2084_v2 = vmul.f32 %v2080_v43, %v2080_v43 }
0x11eb   :  { %v2090_v9 = vsel %vm46_vm0, %v2084_v2, 0.0 }
0x11ec   :  { %2091 = vadd.xlane.f32.xlu0 %v2090_v9 }
0x1275   :  { %v2089_v21 = vpop.xlane.xlu0 %2088 }
0x1276   :  { %v2099_v22 = vmul.f32 0.03125, %v2089_v21 }
0x1278   :  { %v2103_v24 = vadd.f32 1e-05, %v2099_v22 }
0x1279   :  { %v2092_v37 = vpop.xlane.xlu0 %2091 }
0x127a   :  { %5880 = vrsqrt.f32 %v2103_v24  ;;  %v2100_v4 = vmul.f32 0.03125, %v2092_v37 }
0x127c   :  { %v2104_v27 = vadd.f32 1e-05, %v2100_v4  ;;  %v5170_v28 = vpop.f32.mrb[20].mxu1 }
0x127d   :  { %v2053_v46 = vadd.f32 %v5984_v52, %v5170_v28  ;;  %v2041_v29 = vpop.f32.mrb[21].mxu1  ;;  %v2274_v52 = vld [vmem:[#allocation5 + $0xb8] sm:$0xff] }
0x127e   :  { %5882 = vrsqrt.f32 %v2104_v27  ;;  %v2052_v30 = vadd.f32 %v2041_v29, %v6124_v15  ;;  %v6431_v15 = vrot.slane %v2062_v6, %v6136_v51 }
0x127f   :  { %v6419_v31 = vadd.f32 %v4736_v50, %v2053_v46 }
0x1280   :  { %v6421_v10 = vadd.f32 %v4736_v50, %v2052_v30  ;;  %v2273_v50 = vld [vmem:[#allocation5 + $0xb0] sm:$0xff] }
0x1281   :  { %v2072_v32 = vsel %vm46_vm0, %v6419_v31, 0.0  ;;  %v5495_v34 = vpack.c.bf16 %v2274_v52, %v2273_v50 }
0x1282   :  { %2073 = vadd.xlane.f32.xlu1 %v2072_v32  ;;  %v2069_v5 = vsel %vm46_vm0, %v6421_v10, 0.0 }
0x1283   :  { %2070 = vadd.xlane.f32.xlu0 %v2069_v5  ;;  %5496 = vmatprep.subr.bf16.mxu1 %v5495_v34 }
0x1284   :  { %v5881_v35 = vpop.eup %5880  ;;  %5498 = vmatpush3.bf16.msra.mxu1 %v5495_v34 }
0x1285   :  { %v2111_v38 = vmul.f32 %v5881_v35, %v2079_v26  ;;  %5500 = vmatprep.subr.bf16.mxu1 %v5499_v57 }
0x1287   :  { %v2119_v39 = vmul.f32 %v6428_v33, %v2111_v38 }
0x1288   :  { %v5883_v40 = vpop.eup %5882  ;;  %5502 = vmatpush3.bf16.msra.mxu1 %v5499_v57  ;;  %v6451_v57 = vld [vmem:[#allocation5 + $0xf0] ss:$0 sm:$0xff] }
0x1289   :  { %v2112_v41 = vmul.f32 %v5883_v40, %v2080_v43  ;;  %v2127_v42 = vadd.f32 %v6431_v15, %v2119_v39  ;;  %5504 = vmatprep.subr.bf16.mxu1 %v5503_v60 }
0x128b   :  { %5179 = vmatprep.mubr.msk.f32.mxu0 %vm46_vm0, %v2127_v42  ;;  %v2120_v47 = vmul.f32 %v6428_v33, %v2112_v41 }
0x128c   :  { %5506 = vmatpush3.bf16.msra.mxu1 %v5503_v60 }
0x128d   :  { %v2128_v49 = vadd.f32 %v6431_v15, %v2120_v47  ;;  %5508 = vmatprep.subr.bf16.mxu1 %v5507_v62 }
0x128f   :  { %5180 = vmatmul.mubr.msk.f32.vlgmr.msra.gmra.mrb[20].mxu0 %vm46_vm0, %v2128_v49 }
0x1290   :  { %5510 = vmatpush3.bf16.msra.mxu1 %v5507_v62 }
0x130f   :  { %v2074_v7 = vpop.xlane.xlu1 %2073 }
0x1310   :  { %v2078_v63 = vmul.f32 0.03125, %v2074_v7  ;;  %v2071_v0 = vpop.xlane.xlu0 %2070 }
0x1311   :  { %v2077_v36 = vmul.f32 0.03125, %v2071_v0 }
0x1312   :  { %v2082_v1 = vsub.f32 %v6419_v31, %v2078_v63 }
0x1313   :  { %v2081_v8 = vsub.f32 %v6421_v10, %v2077_v36 }
0x1314   :  { %v2086_v44 = vmul.f32 %v2082_v1, %v2082_v1 }
0x1315   :  { %v2085_v26 = vmul.f32 %v2081_v8, %v2081_v8 }
0x1316   :  { %v2096_v3 = vsel %vm46_vm0, %v2086_v44, 0.0 }
0x1317   :  { %2097 = vadd.xlane.f32.xlu1 %v2096_v3  ;;  %v2093_v12 = vsel %vm46_vm0, %v2085_v26, 0.0 }
0x1318   :  { %2094 = vadd.xlane.f32.xlu0 %v2093_v12 }
0x1362   :  { %v5181_v43 = vpop.f32.mrb[20].mxu0 }
0x1363   :  { %v2224_v45 = vadd.f32 %v5181_v43, %v4737_v25  ;;  %v2218_v2 = vpop.f32.mrb[21].mxu0 }
0x1364   :  { %v2219_v9 = vadd.f32 %v4737_v25, %v2218_v2 }
0x1365   :  { %v2242_v13 = vmul.f32 0.044715, %v2224_v45  ;;  %v2238_v30 = vmul.f32 0.5, %v2224_v45 }
0x1366   :  { %v2241_v14 = vmul.f32 0.044715, %v2219_v9  ;;  %v2237_v46 = vmul.f32 0.5, %v2219_v9 }
0x1367   :  { %v2246_v17 = vmul.f32 %v2242_v13, %v2224_v45 }
0x1368   :  { %v2245_v18 = vmul.f32 %v2241_v14, %v2219_v9 }
0x1369   :  { %v2250_v19 = vmul.f32 %v2246_v17, %v2224_v45 }
0x136a   :  { %v2249_v20 = vmul.f32 %v2245_v18, %v2219_v9 }
0x136b   :  { %v2254_v21 = vadd.f32 %v2250_v19, %v2224_v45 }
0x136c   :  { %v2253_v22 = vadd.f32 %v2249_v20, %v2219_v9 }
0x136d   :  { %v2258_v24 = vmul.f32 0.7978846, %v2254_v21 }
0x136e   :  { %v2257_v37 = vmul.f32 0.7978846, %v2253_v22 }
0x136f   :  { %5884 = vtanh.f32 %v2258_v24 }
0x1370   :  { %5886 = vtanh.f32 %v2257_v37 }
0x1379   :  { %v5885_v4 = vpop.eup %5884 }
0x137a   :  { %v5887_v27 = vpop.eup %5886  ;;  %v2266_v28 = vadd.f32 1.0, %v5885_v4 }
0x137b   :  { %v2265_v29 = vadd.f32 1.0, %v5887_v27 }
0x137c   :  { %v2270_v32 = vmul.f32 %v2266_v28, %v2238_v30  ;;  %v2461_v30 = vld [vmem:[#allocation5 + $0x100] sm:$0xff] }
0x137d   :  { %v2269_v6 = vmul.f32 %v2265_v29, %v2237_v46 }
0x137f   :  { %5201 = vmatprep.mubr.msk.f32.mxu1 %vm2282_vm6, %v2269_v6  ;;  %v2462_v6 = vld [vmem:[#allocation5 + $0x108] sm:$0xff] }
0x1380   :  { %5202 = vmatmul.mubr.msk.f32.vlgmr.msra.gmra.mrb[22].mxu1 %vm2282_vm6, %v2270_v32  ;;  %v5511_v32 = vpack.c.bf16 %v2462_v6, %v2461_v30 }
0x1382   :  { %5512 = vmatprep.subr.bf16.mxu0 %v5511_v32 }
0x1383   :  { %5514 = vmatpush3.bf16.msra.mxu0 %v5511_v32 }
0x13a4   :  { %v2098_v5 = vpop.xlane.xlu1 %2097 }
0x13a5   :  { %v2102_v35 = vmul.f32 0.03125, %v2098_v5  ;;  %v2095_v38 = vpop.xlane.xlu0 %2094  ;;  %v2463_v5 = vld [vmem:[#allocation5 + $0x110] sm:$0xff] }
0x13a6   :  { %v2101_v39 = vmul.f32 0.03125, %v2095_v38 }
0x13a7   :  { %v2106_v40 = vadd.f32 1e-05, %v2102_v35  ;;  %v2464_v35 = vld [vmem:[#allocation5 + $0x118] sm:$0xff] }
0x13a8   :  { %v2105_v41 = vadd.f32 1e-05, %v2101_v39  ;;  %v5515_v38 = vpack.c.bf16 %v2464_v35, %v2463_v5 }
0x13a9   :  { %5888 = vrsqrt.f32 %v2106_v40 }
0x13aa   :  { %5890 = vrsqrt.f32 %v2105_v41  ;;  %5516 = vmatprep.subr.bf16.mxu0 %v5515_v38 }
0x13ab   :  { %5518 = vmatpush3.bf16.msra.mxu0 %v5515_v38 }
0x13b3   :  { %v5889_v42 = vpop.eup %5888 }
0x13b4   :  { %v5891_v47 = vpop.eup %5890  ;;  %v2114_v49 = vmul.f32 %v5889_v42, %v2082_v1 }
0x13b5   :  { %v2113_v50 = vmul.f32 %v5891_v47, %v2081_v8 }
0x13b6   :  { %v2122_v52 = vmul.f32 %v6428_v33, %v2114_v49 }
0x13b7   :  { %v2121_v34 = vmul.f32 %v6428_v33, %v2113_v50 }
0x13b8   :  { %v2130_v56 = vadd.f32 %v6431_v15, %v2122_v52 }
0x13b9   :  { %v2129_v55 = vadd.f32 %v6431_v15, %v2121_v34 }
0x13bb   :  { %5182 = vmatprep.mubr.msk.f32.mxu0 %vm46_vm0, %v2129_v55 }
0x13bc   :  { %5183 = vmatmul.mubr.msk.f32.gmra.mrb[22].mxu0 %vm46_vm0, %v2130_v56 }
0x1453   :  { %v5203_v58 = vpop.f32.mrb[22].mxu1 }
0x1454   :  { %v2381_v59 = vadd.f32 %v5203_v58, %v6398_v54  ;;  %v2361_v60 = vpop.f32.mrb[23].mxu1 }
0x1455   :  { %v2380_v11 = vadd.f32 %v2361_v60, %v6396_v53  ;;  %v2392_v60 = vld [vmem:[#allocation5 + $0xf8] sm:$0x3] }
0x1456   :  { %v6456_v61 = vadd.f32 %v6451_v57, %v2381_v59 }
0x1457   :  { %v6459_v33 = vadd.f32 %v6451_v57, %v2380_v11 }
0x1458   :  { %v2396_v15 = vsel %vm46_vm0, %v6456_v61, 0.0 }
0x1459   :  { %2397 = vadd.xlane.f32.xlu1 %v2396_v15  ;;  %v2393_v62 = vsel %vm46_vm0, %v6459_v33, 0.0 }
0x145a   :  { %2394 = vadd.xlane.f32.xlu0 %v2393_v62 }
0x148f   :  { %v5184_v7 = vpop.f32.mrb[22].mxu0 }
0x1490   :  { %v2234_v63 = vadd.f32 %v5184_v7, %v4737_v25  ;;  %v2228_v54 = vpop.f32.mrb[23].mxu0 }
0x1491   :  { %v2229_v0 = vadd.f32 %v4737_v25, %v2228_v54 }
0x1492   :  { %v2244_v36 = vmul.f32 0.044715, %v2234_v63  ;;  %v2240_v18 = vmul.f32 0.5, %v2234_v63 }
0x1493   :  { %v2243_v53 = vmul.f32 0.044715, %v2229_v0  ;;  %v2239_v14 = vmul.f32 0.5, %v2229_v0 }
0x1494   :  { %v2248_v1 = vmul.f32 %v2244_v36, %v2234_v63 }
0x1495   :  { %v2247_v8 = vmul.f32 %v2243_v53, %v2229_v0 }
0x1496   :  { %v2252_v44 = vmul.f32 %v2248_v1, %v2234_v63 }
0x1497   :  { %v2251_v26 = vmul.f32 %v2247_v8, %v2229_v0 }
0x1498   :  { %v2256_v3 = vadd.f32 %v2252_v44, %v2234_v63  ;;  %v2456_v63 = vrot.slane %v2392_v60, %v6136_v51 }
0x1499   :  { %v2255_v12 = vadd.f32 %v2251_v26, %v2229_v0 }
0x149a   :  { %v2260_v43 = vmul.f32 0.7978846, %v2256_v3 }
0x149b   :  { %v2259_v45 = vmul.f32 0.7978846, %v2255_v12 }
0x149c   :  { %5892 = vtanh.f32 %v2260_v43 }
0x149d   :  { %5894 = vtanh.f32 %v2259_v45 }
0x14a6   :  { %v5893_v2 = vpop.eup %5892 }
0x14a7   :  { %v5895_v9 = vpop.eup %5894  ;;  %v2268_v13 = vadd.f32 1.0, %v5893_v2 }
0x14a8   :  { %v2267_v17 = vadd.f32 1.0, %v5895_v9 }
0x14a9   :  { %v2272_v25 = vmul.f32 %v2268_v13, %v2240_v18 }
0x14aa   :  { %v2271_v19 = vmul.f32 %v2267_v17, %v2239_v14 }
0x14ac   :  { %5204 = vmatprep.mubr.msk.f32.mxu1 %vm2282_vm6, %v2271_v19 }
0x14ad   :  { %5205 = vmatmul.mubr.msk.f32.gmra.mrb[24].mxu1 %vm2282_vm6, %v2272_v25 }
0x14e6   :  { %v2398_v20 = vpop.xlane.xlu1 %2397 }
0x14e7   :  { %v2406_v21 = vmul.f32 0.03125, %v2398_v20  ;;  %v2395_v22 = vpop.xlane.xlu0 %2394 }
0x14e8   :  { %v2405_v24 = vmul.f32 0.03125, %v2395_v22 }
0x14e9   :  { %v2410_v37 = vsub.f32 %v6456_v61, %v2406_v21 }
0x14ea   :  { %v2409_v4 = vsub.f32 %v6459_v33, %v2405_v24 }
0x14eb   :  { %v2414_v27 = vmul.f32 %v2410_v37, %v2410_v37 }
0x14ec   :  { %v2413_v28 = vmul.f32 %v2409_v4, %v2409_v4 }
0x14ed   :  { %v2420_v46 = vsel %vm46_vm0, %v2414_v27, 0.0 }
0x14ee   :  { %2421 = vadd.xlane.f32.xlu1 %v2420_v46  ;;  %v2417_v29 = vsel %vm46_vm0, %v2413_v28, 0.0 }
0x14ef   :  { %2418 = vadd.xlane.f32.xlu0 %v2417_v29 }
0x157b   :  { %v2422_v39 = vpop.xlane.xlu1 %2421 }
0x157c   :  { %v2430_v40 = vmul.f32 0.03125, %v2422_v39  ;;  %v2419_v41 = vpop.xlane.xlu0 %2418 }
0x157d   :  { %v2429_v42 = vmul.f32 0.03125, %v2419_v41 }
0x157e   :  { %v2434_v47 = vadd.f32 1e-05, %v2430_v40 }
0x157f   :  { %v2433_v49 = vadd.f32 1e-05, %v2429_v42 }
0x1580   :  { %5896 = vrsqrt.f32 %v2434_v47  ;;  %v5206_v50 = vpop.f32.mrb[24].mxu1 }
0x1581   :  { %5898 = vrsqrt.f32 %v2433_v49  ;;  %v2383_v52 = vadd.f32 %v5206_v50, %v6419_v31  ;;  %v2371_v34 = vpop.f32.mrb[25].mxu1  ;;  %v2448_v31 = vrot.slane %v2392_v60, %v6134_v48 }
0x1582   :  { %v2382_v55 = vadd.f32 %v2371_v34, %v6421_v10 }
0x1583   :  { %v6474_v56 = vadd.f32 %v6451_v57, %v2383_v52 }
0x1584   :  { %v6477_v58 = vadd.f32 %v6451_v57, %v2382_v55 }
0x1585   :  { %v2402_v59 = vsel %vm46_vm0, %v6474_v56, 0.0 }
0x1586   :  { %2403 = vadd.xlane.f32.xlu1 %v2402_v59  ;;  %v2399_v11 = vsel %vm46_vm0, %v6477_v58, 0.0 }
0x1587   :  { %2400 = vadd.xlane.f32.xlu0 %v2399_v11 }
0x158a   :  { %v5897_v15 = vpop.eup %5896 }
0x158b   :  { %v5899_v62 = vpop.eup %5898  ;;  %v2442_v10 = vmul.f32 %v5897_v15, %v2410_v37 }
0x158c   :  { %v2441_v7 = vmul.f32 %v5899_v62, %v2409_v4 }
0x158d   :  { %v2450_v54 = vmul.f32 %v2448_v31, %v2442_v10 }
0x158e   :  { %v2449_v57 = vmul.f32 %v2448_v31, %v2441_v7 }
0x158f   :  { %v2458_v36 = vadd.f32 %v2456_v63, %v2450_v54 }
0x1590   :  { %v2457_v0 = vadd.f32 %v2456_v63, %v2449_v57 }
0x1592   :  { %5215 = vmatprep.mubr.msk.f32.mxu0 %vm46_vm0, %v2457_v0 }
0x1593   :  { %5216 = vmatmul.mubr.msk.f32.vlgmr.msra.gmra.mrb[24].mxu0 %vm46_vm0, %v2458_v36 }
0x1613   :  { %v2404_v53 = vpop.xlane.xlu1 %2403 }
0x1614   :  { %v2408_v1 = vmul.f32 0.03125, %v2404_v53  ;;  %v2401_v8 = vpop.xlane.xlu0 %2400 }
0x1615   :  { %v2407_v44 = vmul.f32 0.03125, %v2401_v8 }
0x1616   :  { %v2412_v26 = vsub.f32 %v6474_v56, %v2408_v1 }
0x1617   :  { %v2411_v3 = vsub.f32 %v6477_v58, %v2407_v44 }
0x1618   :  { %v2416_v12 = vmul.f32 %v2412_v26, %v2412_v26 }
0x1619   :  { %v2415_v43 = vmul.f32 %v2411_v3, %v2411_v3 }
0x161a   :  { %v2426_v45 = vsel %vm46_vm0, %v2416_v12, 0.0 }
0x161b   :  { %2427 = vadd.xlane.f32.xlu1 %v2426_v45  ;;  %v2423_v2 = vsel %vm46_vm0, %v2415_v43, 0.0 }
0x161c   :  { %2424 = vadd.xlane.f32.xlu0 %v2423_v2 }
0x1666   :  { %v6491_v9 = vpop.f32.mrb[24].mxu0 }
0x1667   :  { %v6493_v13 = vpop.f32.mrb[25].mxu0 }
0x1668   :  { %v6497_v14 = vpack.i.bf16 %v6491_v9, %v6493_v13 }
0x166a   :  { %5736 = vrot.lane.b32.xlu1 %v6497_v14, %s6062_s6  ;;  %5731 = vrot.lane.b32.xlu0 %v6497_v14, %s6061_s1 }
0x166e   :  { %2760 = vrot.lane.b32.xlu1 %v6493_v13, %s6063_s7  ;;  %2762 = vrot.lane.b32.xlu0 %v6491_v9, %s6063_s7 }
0x1672   :  { %5741 = vrot.lane.b32.xlu1 %v6497_v14, %s6067_s10  ;;  %2962 = vrot.lane.b32.xlu0 %v6491_v9, %s6069_s12 }
0x1676   :  { %2960 = vrot.lane.b32.xlu1 %v6493_v13, %s6069_s12 }
0x16a8   :  { %v2428_v17 = vpop.xlane.xlu1 %2427 }
0x16a9   :  { %v2432_v18 = vmul.f32 0.03125, %v2428_v17  ;;  %v2425_v19 = vpop.xlane.xlu0 %2424 }
0x16aa   :  { %v2431_v25 = vmul.f32 0.03125, %v2425_v19 }
0x16ab   :  { %v2436_v20 = vadd.f32 1e-05, %v2432_v18 }
0x16ac   :  { %v2435_v21 = vadd.f32 1e-05, %v2431_v25 }
0x16ad   :  { %5900 = vrsqrt.f32 %v2436_v20 }
0x16ae   :  { %5902 = vrsqrt.f32 %v2435_v21 }
0x16b7   :  { %v5901_v22 = vpop.eup %5900 }
0x16b8   :  { %v5903_v24 = vpop.eup %5902  ;;  %v2444_v37 = vmul.f32 %v5901_v22, %v2412_v26 }
0x16b9   :  { %v2443_v4 = vmul.f32 %v5903_v24, %v2411_v3 }
0x16ba   :  { %v2452_v27 = vmul.f32 %v2448_v31, %v2444_v37 }
0x16bb   :  { %v2451_v28 = vmul.f32 %v2448_v31, %v2443_v4 }
0x16bc   :  { %v2460_v29 = vadd.f32 %v2456_v63, %v2452_v27 }
0x16bd   :  { %v2459_v46 = vadd.f32 %v2456_v63, %v2451_v28 }
0x16bf   :  { %5218 = vmatprep.mubr.msk.f32.mxu0 %vm46_vm0, %v2459_v46 }
0x16c0   :  { %5219 = vmatmul.mubr.msk.f32.gmra.mrb[26].mxu0 %vm46_vm0, %v2460_v29 }
0x16c1   :  { %5225 = vmatprep.mubr.msk.f32.mxu0 %vm295_vm1, %v6493_v13 }
0x16dc   :  { %v5737_v30 = vpop.permute.xlu1 %5736  ;;  %v5732_v6 = vpop.permute.xlu0 %5731 }
0x16dd   :  { %v5739_v32 = vunpack.i.h.bf16 %v5737_v30  ;;  %v5738_v5 = vunpack.i.l.bf16 %v5737_v30  ;;  %v5734_v35 = vunpack.i.h.bf16 %v5732_v6  ;;  %v5733_v38 = vunpack.i.l.bf16 %v5732_v6 }
0x16df   :  { %v5529_v39 = vpack.c.bf16 %v5739_v32, %v5738_v5  ;;  %v5519_v40 = vpack.c.bf16 %v5734_v35, %v5733_v38 }
0x16e0   :  { %v2761_v41 = vpop.permute.xlu1 %2760  ;;  %v2763_v34 = vpop.permute.xlu0 %2762 }
0x16e1   :  { %5521 = vmatprep.subr.msk.bf16.mxu0 %vm6172_vm2, %v5519_v40  ;;  %5531 = vmatprep.subr.msk.bf16.mxu1 %vm6172_vm2, %v5529_v39 }
0x16e2   :  { %5239 = vmatprep.mubr.msk.f32.mxu1 %vm295_vm1, %v2761_v41  ;;  %5524 = vmatpush3.bf16.xpose.msk.msra.mxu0 %vm6172_vm2, %v5519_v40 }
0x16e3   :  { %5534 = vmatpush3.bf16.xpose.msk.msra.mxu1 %vm6172_vm2, %v5529_v39 }
0x16e4   :  { %v5742_v42 = vpop.permute.xlu1 %5741  ;;  %v2963_v55 = vpop.permute.xlu0 %2962 }
0x16e5   :  { %v5744_v47 = vunpack.i.h.bf16 %v5742_v42  ;;  %v5743_v49 = vunpack.i.l.bf16 %v5742_v42 }
0x16e7   :  { %v5539_v50 = vpack.c.bf16 %v5744_v47, %v5743_v49 }
0x16e8   :  { %v2961_v52 = vpop.permute.xlu1 %2960 }
0x16e9   :  { %5226 = vmatmul.mubr.msk.f32.vlgmr.msra.gmra.mrb[28].mxu0 %vm295_vm1, %v6491_v9  ;;  %5541 = vmatprep.subr.msk.bf16.mxu1 %vm6172_vm2, %v5539_v50 }
0x16ea   :  { %5240 = vmatmul.mubr.msk.f32.vlgmr.msra.gmra.mrb[26].mxu1 %vm295_vm1, %v2763_v34 }
0x16eb   :  { %5544 = vmatpush3.bf16.xpose.msk.msra.mxu1 %vm6172_vm2, %v5539_v50  ;;  %5253 = vmatprep.mubr.msk.f32.mxu1 %vm295_vm1, %v2961_v52 }
0x16f2   :  { %5254 = vmatmul.mubr.msk.f32.vlgmr.msra.gmra.mrb[28].mxu1 %vm295_vm1, %v2963_v55 }
0x1793   :  { %v6535_v59 = vpop.f32.mrb[26].mxu0 }
0x1794   :  { %v6537_v60 = vpop.f32.mrb[27].mxu0 }
0x1795   :  { %v6541_v11 = vpack.i.bf16 %v6535_v59, %v6537_v60 }
0x17bc   :  { %v5227_v31 = vpop.f32.mrb[28].mxu0 }
0x17bd   :  { %v2648_v15 = vadd.f32 %v5227_v31, %v6189_v23  ;;  %v5241_v62 = vpop.f32.mrb[26].mxu1  ;;  %v2642_v10 = vpop.f32.mrb[29].mxu0 }
0x17be   :  { %v2643_v7 = vadd.f32 %v2642_v10, %v6189_v23  ;;  %v2842_v63 = vpop.f32.mrb[27].mxu1  ;;  %v2848_v36 = vadd.f32 %v5241_v62, %v6189_v23 }
0x17bf   :  { %v2843_v54 = vadd.f32 %v2842_v63, %v6189_v23  ;;  %v2654_v57 = vsel %vm379_vm4, %v2648_v15, -inf }
0x17c0   :  { %2655 = vmax.xlane.f32.xlu0 %v2654_v57  ;;  %v2651_v0 = vsel %vm379_vm4, %v2643_v7, -inf  ;;  %v2854_v3 = vsel %vm379_vm4, %v2848_v36, -inf }
0x17c1   :  { %2652 = vmax.xlane.f32.xlu1 %v2651_v0  ;;  %v2851_v53 = vsel %vm379_vm4, %v2843_v54, -inf }
0x17c4   :  { %2852 = vmax.xlane.f32.xlu0 %v2851_v53 }
0x17c5   :  { %v5255_v1 = vpop.f32.mrb[28].mxu1 }
0x17c6   :  { %v3042_v8 = vpop.f32.mrb[29].mxu1  ;;  %v3048_v44 = vadd.f32 %v5255_v1, %v6189_v23 }
0x17c7   :  { %v3043_v26 = vadd.f32 %v3042_v8, %v6189_v23 }
0x17c8   :  { %2855 = vmax.xlane.f32.xlu0 %v2854_v3  ;;  %v3054_v43 = vsel %vm379_vm4, %v3048_v44, -inf }
0x17c9   :  { %v3051_v12 = vsel %vm379_vm4, %v3043_v26, -inf }
0x17ca   :  { %3052 = vmax.xlane.f32.xlu1 %v3051_v12 }
0x17cc   :  { %3055 = vmax.xlane.f32.xlu0 %v3054_v43 }
0x17db   :  { %5746 = vrot.lane.b32.xlu1 %v6497_v14, %s6066_s9 }
0x184d   :  { %v2656_v45 = vpop.xlane.xlu0 %2655 }
0x184e   :  { %v2658_v2 = vsub.f32 %v2648_v15, %v2656_v45  ;;  %v2653_v17 = vpop.xlane.xlu1 %2652 }
0x184f   :  { %v2657_v18 = vsub.f32 %v2643_v7, %v2653_v17 }
0x1850   :  { %v2661_v19 = vmul.f32 1.442695, %v2658_v2 }
0x1851   :  { %v2659_v25 = vmul.f32 1.442695, %v2657_v18  ;;  %v2853_v20 = vpop.xlane.xlu0 %2852 }
0x1852   :  { %5904 = vpow2.f32 %v2661_v19  ;;  %v2857_v21 = vsub.f32 %v2843_v54, %v2853_v20 }
0x1853   :  { %5906 = vpow2.f32 %v2659_v25 }
0x1854   :  { %v2859_v22 = vmul.f32 1.442695, %v2857_v21 }
0x1855   :  { %v2856_v24 = vpop.xlane.xlu0 %2855 }
0x1856   :  { %5908 = vpow2.f32 %v2859_v22  ;;  %v2858_v37 = vsub.f32 %v2848_v36, %v2856_v24 }
0x1857   :  { %v3053_v4 = vpop.xlane.xlu1 %3052 }
0x1858   :  { %v2861_v27 = vmul.f32 1.442695, %v2858_v37  ;;  %v3057_v34 = vsub.f32 %v3043_v26, %v3053_v4 }
0x1859   :  { %v3056_v28 = vpop.xlane.xlu0 %3055 }
0x185a   :  { %5910 = vpow2.f32 %v2861_v27  ;;  %v3058_v46 = vsub.f32 %v3048_v44, %v3056_v28  ;;  %v3059_v55 = vmul.f32 1.442695, %v3057_v34 }
0x185b   :  { %v5747_v29 = vpop.permute.xlu1 %5746 }
0x185c   :  { %v5905_v30 = vpop.eup %5904  ;;  %v3061_v6 = vmul.f32 1.442695, %v3058_v46  ;;  %v5749_v32 = vunpack.i.h.bf16 %v5747_v29  ;;  %v5748_v5 = vunpack.i.l.bf16 %v5747_v29 }
0x185d   :  { %v5907_v35 = vpop.eup %5906  ;;  %v2666_v38 = vsel %vm379_vm4, %v5905_v30, 0.0 }
0x185e   :  { %5912 = vpow2.f32 %v3061_v6  ;;  %v5525_v39 = vpack.c.bf16 %v5749_v32, %v5748_v5  ;;  %2667 = vadd.xlane.f32.xlu0 %v2666_v38  ;;  %v2663_v40 = vsel %vm379_vm4, %v5907_v35, 0.0 }
0x185f   :  { %2664 = vadd.xlane.f32.xlu1 %v2663_v40  ;;  %5914 = vpow2.f32 %v3059_v55 }
0x1860   :  { %v5909_v41 = vpop.eup %5908  ;;  %5526 = vmatprep.subr.bf16.mxu0 %v5525_v39 }
0x1861   :  { %5528 = vmatpush3.bf16.msra.mxu0 %v5525_v39  ;;  %v2863_v42 = vsel %vm379_vm4, %v5909_v41, 0.0 }
0x1863   :  { %2864 = vadd.xlane.f32.xlu1 %v2863_v42 }
0x1864   :  { %v5911_v47 = vpop.eup %5910 }
0x1865   :  { %v2866_v49 = vsel %vm379_vm4, %v5911_v47, 0.0 }
0x1866   :  { %2867 = vadd.xlane.f32.xlu0 %v2866_v49 }
0x1868   :  { %v5913_v50 = vpop.eup %5912 }
0x1869   :  { %v3066_v52 = vsel %vm379_vm4, %v5913_v50, 0.0  ;;  %v5915_v31 = vpop.eup %5914 }
0x186a   :  { %3067 = vadd.xlane.f32.xlu0 %v3066_v52  ;;  %v3063_v15 = vsel %vm379_vm4, %v5915_v31, 0.0 }
0x1874   :  { %5756 = vrot.lane.b32.xlu1 %v6497_v14, %s6072_s15 }
0x1878   :  { %5761 = vrot.lane.b32.xlu1 %v6497_v14, %s6068_s11 }
0x1880   :  { %5751 = vrot.lane.b32.xlu0 %v6497_v14, %s6065_s8 }
0x1884   :  { %3162 = vrot.lane.b32.xlu0 %v6491_v9, %s6070_s13 }
0x189c   :  { %3064 = vadd.xlane.f32.xlu1 %v3063_v15 }
0x18ad   :  { %3160 = vrot.lane.b32.xlu1 %v6493_v13, %s6070_s13 }
0x18eb   :  { %v2668_v62 = vpop.xlane.xlu0 %2667 }
0x18ec   :  { %5916 = vrcp.f32 %v2668_v62  ;;  %v2665_v10 = vpop.xlane.xlu1 %2664 }
0x18ed   :  { %5918 = vrcp.f32 %v2665_v10 }
0x18f0   :  { %v2865_v7 = vpop.xlane.xlu1 %2864 }
0x18f1   :  { %5920 = vrcp.f32 %v2865_v7 }
0x18f3   :  { %v2868_v63 = vpop.xlane.xlu0 %2867 }
0x18f4   :  { %5922 = vrcp.f32 %v2868_v63  ;;  %v5757_v57 = vpop.permute.xlu1 %5756 }
0x18f5   :  { %v5759_v8 = vunpack.i.h.bf16 %v5757_v57  ;;  %v5758_v13 = vunpack.i.l.bf16 %v5757_v57 }
0x18f6   :  { %v5917_v54 = vpop.eup %5916 }
0x18f7   :  { %v5919_v9 = vpop.eup %5918  ;;  %v3068_v0 = vpop.xlane.xlu0 %3067  ;;  %v2672_v53 = vmul.f32 %v5917_v54, %v5905_v30  ;;  %v5545_v17 = vpack.c.bf16 %v5759_v8, %v5758_v13 }
0x18f8   :  { %v2670_v36 = vmul.f32 %v5919_v9, %v5907_v35  ;;  %v5762_v43 = vpop.permute.xlu1 %5761  ;;  %5924 = vrcp.f32 %v3068_v0 }
0x18f9   :  { %v5764_v18 = vunpack.i.h.bf16 %v5762_v43  ;;  %v5763_v19 = vunpack.i.l.bf16 %v5762_v43 }
0x18fa   :  { %5232 = vmatprep.mubr.msk.f32.mxu0 %vm379_vm4, %v2670_v36 }
0x18fb   :  { %v5921_v1 = vpop.eup %5920  ;;  %v5752_v44 = vpop.permute.xlu0 %5751  ;;  %5233 = vmatmul.mubr.msk.f32.vlgmr.msra.gmra.mrb[30].mxu0 %vm379_vm4, %v2672_v53  ;;  %v5549_v20 = vpack.c.bf16 %v5764_v18, %v5763_v19 }
0x18fc   :  { %v5754_v26 = vunpack.i.h.bf16 %v5752_v44  ;;  %v5753_v3 = vunpack.i.l.bf16 %v5752_v44  ;;  %v2870_v12 = vmul.f32 %v5921_v1, %v5909_v41 }
0x18fe   :  { %v5535_v45 = vpack.c.bf16 %v5754_v26, %v5753_v3  ;;  %5246 = vmatprep.mubr.msk.f32.mxu0 %vm379_vm4, %v2870_v12  ;;  %v5923_v2 = vpop.eup %5922 }
0x18ff   :  { %v2872_v25 = vmul.f32 %v5923_v2, %v5911_v47  ;;  %v3163_v28 = vpop.permute.xlu0 %3162 }
0x1900   :  { %5536 = vmatprep.subr.bf16.mxu0 %v5535_v45 }
0x1901   :  { %5538 = vmatpush3.bf16.msra.mxu0 %v5535_v45 }
0x1902   :  { %5546 = vmatprep.subr.bf16.mxu0 %v5545_v17  ;;  %v5925_v22 = vpop.eup %5924 }
0x1903   :  { %v3072_v4 = vmul.f32 %v5925_v22, %v5913_v50 }
0x1904   :  { %5247 = vmatmul.mubr.msk.f32.vlgmr.msra.gmra.mrb[32].mxu0 %vm379_vm4, %v2872_v25 }
0x1905   :  { %5548 = vmatpush3.bf16.msra.mxu0 %v5545_v17 }
0x1906   :  { %5551 = vmatprep.subr.msk.bf16.mxu0 %vm6172_vm2, %v5549_v20 }
0x1929   :  { %v3065_v21 = vpop.xlane.xlu1 %3064 }
0x192a   :  { %5926 = vrcp.f32 %v3065_v21 }
0x192d   :  { %v3161_v27 = vpop.permute.xlu1 %3160 }
0x1934   :  { %v5927_v24 = vpop.eup %5926 }
0x1935   :  { %v3070_v37 = vmul.f32 %v5927_v24, %v5915_v31 }
0x1937   :  { %5260 = vmatprep.mubr.msk.f32.mxu0 %vm379_vm4, %v3070_v37 }
0x1938   :  { %5261 = vmatmul.mubr.msk.f32.vlgmr.msra.gmra.mrb[34].mxu0 %vm379_vm4, %v3072_v4 }
0x1939   :  { %5554 = vmatpush3.bf16.xpose.msk.msra.mxu0 %vm6172_vm2, %v5549_v20  ;;  %5267 = vmatprep.mubr.msk.f32.mxu0 %vm295_vm1, %v3161_v27 }
0x1940   :  { %5268 = vmatmul.mubr.msk.f32.vlgmr.msra.gmra.mrb[36].mxu0 %vm295_vm1, %v3163_v28 }
0x19ce   :  { %v6585_v46 = vpop.f32.mrb[30].mxu0 }
0x19cf   :  { %v6587_v29 = vpop.f32.mrb[31].mxu0 }
0x19d7   :  { %v6589_v30 = vpop.f32.mrb[32].mxu0 }
0x19d8   :  { %v6591_v6 = vpop.f32.mrb[33].mxu0 }
0x1a0b   :  { %v6593_v32 = vpop.f32.mrb[34].mxu0 }
0x1a0c   :  { %v6595_v5 = vpop.f32.mrb[35].mxu0 }
0x1a13   :  { %v5269_v35 = vpop.f32.mrb[36].mxu0 }
0x1a14   :  { %v3248_v38 = vadd.f32 %v5269_v35, %v6189_v23  ;;  %v3242_v39 = vpop.f32.mrb[37].mxu0 }
0x1a15   :  { %v3243_v40 = vadd.f32 %v3242_v39, %v6189_v23 }
0x1a16   :  { %v3254_v41 = vsel %vm379_vm4, %v3248_v38, -inf }
0x1a17   :  { %3255 = vmax.xlane.f32.xlu0 %v3254_v41  ;;  %v3251_v42 = vsel %vm379_vm4, %v3243_v40, -inf }
0x1a18   :  { %3252 = vmax.xlane.f32.xlu1 %v3251_v42 }
0x1a29   :  { %5766 = vrot.lane.b32.xlu1 %v6497_v14, %s6071_s14 }
0x1aa4   :  { %v3256_v47 = vpop.xlane.xlu0 %3255 }
0x1aa5   :  { %v3258_v49 = vsub.f32 %v3248_v38, %v3256_v47  ;;  %v3253_v50 = vpop.xlane.xlu1 %3252 }
0x1aa6   :  { %v3257_v52 = vsub.f32 %v3243_v40, %v3253_v50 }
0x1aa7   :  { %v3261_v34 = vmul.f32 1.442695, %v3258_v49 }
0x1aa8   :  { %v3259_v55 = vmul.f32 1.442695, %v3257_v52 }
0x1aa9   :  { %5928 = vpow2.f32 %v3261_v34  ;;  %v5767_v31 = vpop.permute.xlu1 %5766 }
0x1aaa   :  { %v5769_v15 = vunpack.i.h.bf16 %v5767_v31  ;;  %v5768_v62 = vunpack.i.l.bf16 %v5767_v31  ;;  %5930 = vpow2.f32 %v3259_v55 }
0x1aac   :  { %v5555_v10 = vpack.c.bf16 %v5769_v15, %v5768_v62 }
0x1aae   :  { %5556 = vmatprep.subr.bf16.mxu1 %v5555_v10 }
0x1aaf   :  { %5558 = vmatpush3.bf16.msra.mxu1 %v5555_v10 }
0x1ab3   :  { %v5929_v7 = vpop.eup %5928 }
0x1ab4   :  { %v3266_v63 = vsel %vm379_vm4, %v5929_v7, 0.0  ;;  %v5931_v54 = vpop.eup %5930 }
0x1ab5   :  { %3267 = vadd.xlane.f32.xlu0 %v3266_v63  ;;  %v3263_v14 = vsel %vm379_vm4, %v5931_v54, 0.0 }
0x1ab9   :  { %3264 = vadd.xlane.f32.xlu0 %v3263_v14 }
0x1acf   :  { %5771 = vrot.lane.b32.xlu0 %v6541_v11, %s6061_s1 }
0x1b42   :  { %v3268_v9 = vpop.xlane.xlu0 %3267 }
0x1b43   :  { %5932 = vrcp.f32 %v3268_v9 }
0x1b46   :  { %v3265_v57 = vpop.xlane.xlu0 %3264 }
0x1b47   :  { %5934 = vrcp.f32 %v3265_v57 }
0x1b4a   :  { %v5772_v0 = vpop.permute.xlu0 %5771 }
0x1b4b   :  { %v5774_v36 = vunpack.i.h.bf16 %v5772_v0  ;;  %v5773_v53 = vunpack.i.l.bf16 %v5772_v0 }
0x1b4d   :  { %v5559_v1 = vpack.c.bf16 %v5774_v36, %v5773_v53  ;;  %v5933_v8 = vpop.eup %5932 }
0x1b4e   :  { %v3272_v26 = vmul.f32 %v5933_v8, %v5929_v7 }
0x1b4f   :  { %5561 = vmatprep.subr.msk.bf16.mxu1 %vm6172_vm2, %v5559_v1 }
0x1b51   :  { %v5935_v44 = vpop.eup %5934 }
0x1b52   :  { %v3270_v13 = vmul.f32 %v5935_v44, %v5931_v54 }
0x1b54   :  { %5274 = vmatprep.mubr.msk.f32.mxu1 %vm379_vm4, %v3270_v13 }
0x1b55   :  { %5275 = vmatmul.mubr.msk.f32.vlgmr.msra.gmra.mrb[30].mxu1 %vm379_vm4, %v3272_v26 }
0x1b56   :  { %5564 = vmatpush3.bf16.xpose.msk.msra.mxu1 %vm6172_vm2, %v5559_v1  ;;  %5281 = vmatprep.mubr.msk.f32.mxu1 %vm295_vm1, %v6537_v60 }
0x1b5d   :  { %5282 = vmatmul.mubr.msk.f32.vlgmr.msra.gmra.mrb[32].mxu1 %vm295_vm1, %v6535_v59 }
0x1c28   :  { %v6617_v3 = vpop.f32.mrb[30].mxu1 }
0x1c29   :  { %v6619_v12 = vpop.f32.mrb[31].mxu1 }
0x1c30   :  { %v5283_v43 = vpop.f32.mrb[32].mxu1 }
0x1c31   :  { %v3476_v45 = vadd.f32 %v5283_v43, %v6189_v23  ;;  %v3470_v2 = vpop.f32.mrb[33].mxu1 }
0x1c32   :  { %v3471_v17 = vadd.f32 %v3470_v2, %v6189_v23 }
0x1c33   :  { %v3482_v18 = vsel %vm379_vm4, %v3476_v45, -inf }
0x1c34   :  { %3483 = vmax.xlane.f32.xlu0 %v3482_v18  ;;  %v3479_v19 = vsel %vm379_vm4, %v3471_v17, -inf }
0x1c35   :  { %3480 = vmax.xlane.f32.xlu1 %v3479_v19 }
0x1c46   :  { %5776 = vrot.lane.b32.xlu1 %v6541_v11, %s6066_s9 }
0x1c4a   :  { %3588 = vrot.lane.b32.xlu1 %v6537_v60, %s6063_s7 }
0x1cc1   :  { %v3484_v25 = vpop.xlane.xlu0 %3483 }
0x1cc2   :  { %v3486_v20 = vsub.f32 %v3476_v45, %v3484_v25  ;;  %v3481_v21 = vpop.xlane.xlu1 %3480 }
0x1cc3   :  { %v3485_v22 = vsub.f32 %v3471_v17, %v3481_v21 }
0x1cc4   :  { %v3489_v24 = vmul.f32 1.442695, %v3486_v20 }
0x1cc5   :  { %v3487_v37 = vmul.f32 1.442695, %v3485_v22 }
0x1cc6   :  { %5936 = vpow2.f32 %v3489_v24  ;;  %v5777_v4 = vpop.permute.xlu1 %5776 }
0x1cc7   :  { %5938 = vpow2.f32 %v3487_v37  ;;  %v5779_v27 = vunpack.i.h.bf16 %v5777_v4  ;;  %v5778_v28 = vunpack.i.l.bf16 %v5777_v4 }
0x1cc9   :  { %v5565_v35 = vpack.c.bf16 %v5779_v27, %v5778_v28 }
0x1cca   :  { %v3589_v42 = vpop.permute.xlu1 %3588 }
0x1ccb   :  { %5566 = vmatprep.subr.bf16.mxu0 %v5565_v35 }
0x1ccc   :  { %5568 = vmatpush3.bf16.msra.mxu0 %v5565_v35 }
0x1cd0   :  { %v5937_v38 = vpop.eup %5936 }
0x1cd1   :  { %v5939_v39 = vpop.eup %5938  ;;  %v3494_v40 = vsel %vm379_vm4, %v5937_v38, 0.0 }
0x1cd2   :  { %3495 = vadd.xlane.f32.xlu0 %v3494_v40  ;;  %v3491_v41 = vsel %vm379_vm4, %v5939_v39, 0.0 }
0x1cd3   :  { %3492 = vadd.xlane.f32.xlu1 %v3491_v41 }
0x1ce4   :  { %3590 = vrot.lane.b32.xlu1 %v6535_v59, %s6063_s7 }
0x1ce8   :  { %5781 = vrot.lane.b32.xlu0 %v6541_v11, %s6062_s6 }
0x1d5f   :  { %v3496_v47 = vpop.xlane.xlu0 %3495 }
0x1d60   :  { %5940 = vrcp.f32 %v3496_v47  ;;  %v3493_v49 = vpop.xlane.xlu1 %3492 }
0x1d61   :  { %5942 = vrcp.f32 %v3493_v49 }
0x1d63   :  { %v5782_v50 = vpop.permute.xlu0 %5781 }
0x1d64   :  { %v5784_v52 = vunpack.i.h.bf16 %v5782_v50  ;;  %v5783_v34 = vunpack.i.l.bf16 %v5782_v50  ;;  %v3591_v7 = vpop.permute.xlu1 %3590 }
0x1d66   :  { %v5569_v55 = vpack.c.bf16 %v5784_v52, %v5783_v34 }
0x1d68   :  { %5571 = vmatprep.subr.msk.bf16.mxu0 %vm6172_vm2, %v5569_v55 }
0x1d6a   :  { %v5941_v31 = vpop.eup %5940 }
0x1d6b   :  { %v5943_v15 = vpop.eup %5942  ;;  %v3500_v10 = vmul.f32 %v5941_v31, %v5937_v38 }
0x1d6c   :  { %v3498_v62 = vmul.f32 %v5943_v15, %v5939_v39 }
0x1d6e   :  { %5288 = vmatprep.mubr.msk.f32.mxu0 %vm379_vm4, %v3498_v62 }
0x1d6f   :  { %5289 = vmatmul.mubr.msk.f32.vlgmr.msra.gmra.mrb[38].mxu0 %vm379_vm4, %v3500_v10 }
0x1d70   :  { %5574 = vmatpush3.bf16.xpose.msk.msra.mxu0 %vm6172_vm2, %v5569_v55  ;;  %5295 = vmatprep.mubr.msk.f32.mxu0 %vm295_vm1, %v3589_v42 }
0x1d77   :  { %5296 = vmatmul.mubr.msk.f32.vlgmr.msra.gmra.mrb[40].mxu0 %vm295_vm1, %v3591_v7 }
0x1e42   :  { %v6643_v63 = vpop.f32.mrb[38].mxu0 }
0x1e43   :  { %v6645_v54 = vpop.f32.mrb[39].mxu0 }
0x1e4a   :  { %v5297_v14 = vpop.f32.mrb[40].mxu0 }
0x1e4b   :  { %v3676_v9 = vadd.f32 %v5297_v14, %v6189_v23  ;;  %v3670_v57 = vpop.f32.mrb[41].mxu0 }
0x1e4c   :  { %v3671_v0 = vadd.f32 %v3670_v57, %v6189_v23 }
0x1e4d   :  { %v3682_v36 = vsel %vm379_vm4, %v3676_v9, -inf }
0x1e4e   :  { %3683 = vmax.xlane.f32.xlu0 %v3682_v36  ;;  %v3679_v53 = vsel %vm379_vm4, %v3671_v0, -inf }
0x1e4f   :  { %3680 = vmax.xlane.f32.xlu1 %v3679_v53 }
0x1e60   :  { %5786 = vrot.lane.b32.xlu1 %v6541_v11, %s6065_s8 }
0x1e64   :  { %3788 = vrot.lane.b32.xlu1 %v6537_v60, %s6069_s12 }
0x1e68   :  { %3790 = vrot.lane.b32.xlu1 %v6535_v59, %s6069_s12 }
0x1edb   :  { %v3684_v1 = vpop.xlane.xlu0 %3683 }
0x1edc   :  { %v3686_v8 = vsub.f32 %v3676_v9, %v3684_v1  ;;  %v3681_v44 = vpop.xlane.xlu1 %3680 }
0x1edd   :  { %v3685_v13 = vsub.f32 %v3671_v0, %v3681_v44 }
0x1ede   :  { %v3689_v26 = vmul.f32 1.442695, %v3686_v8 }
0x1edf   :  { %v3687_v43 = vmul.f32 1.442695, %v3685_v13 }
0x1ee0   :  { %5944 = vpow2.f32 %v3689_v26  ;;  %v5787_v45 = vpop.permute.xlu1 %5786 }
0x1ee1   :  { %v5789_v2 = vunpack.i.h.bf16 %v5787_v45  ;;  %v5788_v17 = vunpack.i.l.bf16 %v5787_v45  ;;  %5946 = vpow2.f32 %v3687_v43 }
0x1ee3   :  { %v5575_v18 = vpack.c.bf16 %v5789_v2, %v5788_v17 }
0x1ee4   :  { %v3789_v41 = vpop.permute.xlu1 %3788 }
0x1ee5   :  { %5576 = vmatprep.subr.bf16.mxu1 %v5575_v18 }
0x1ee6   :  { %5578 = vmatpush3.bf16.msra.mxu1 %v5575_v18 }
0x1ee8   :  { %v3791_v42 = vpop.permute.xlu1 %3790 }
0x1eea   :  { %v5945_v19 = vpop.eup %5944 }
0x1eeb   :  { %v3694_v25 = vsel %vm379_vm4, %v5945_v19, 0.0  ;;  %v5947_v20 = vpop.eup %5946 }
0x1eec   :  { %3695 = vadd.xlane.f32.xlu0 %v3694_v25  ;;  %v3691_v21 = vsel %vm379_vm4, %v5947_v20, 0.0 }
0x1ef0   :  { %3692 = vadd.xlane.f32.xlu0 %v3691_v21 }
0x1f06   :  { %5791 = vrot.lane.b32.xlu0 %v6541_v11, %s6067_s10 }
0x1f79   :  { %v3696_v22 = vpop.xlane.xlu0 %3695 }
0x1f7a   :  { %5948 = vrcp.f32 %v3696_v22 }
0x1f7d   :  { %v3693_v24 = vpop.xlane.xlu0 %3692 }
0x1f7e   :  { %5950 = vrcp.f32 %v3693_v24 }
0x1f81   :  { %v5792_v37 = vpop.permute.xlu0 %5791 }
0x1f82   :  { %v5794_v4 = vunpack.i.h.bf16 %v5792_v37  ;;  %v5793_v27 = vunpack.i.l.bf16 %v5792_v37 }
0x1f84   :  { %v5579_v28 = vpack.c.bf16 %v5794_v4, %v5793_v27  ;;  %v5949_v35 = vpop.eup %5948 }
0x1f85   :  { %v3700_v40 = vmul.f32 %v5949_v35, %v5945_v19 }
0x1f86   :  { %5581 = vmatprep.subr.msk.bf16.mxu1 %vm6172_vm2, %v5579_v28 }
0x1f88   :  { %v5951_v38 = vpop.eup %5950 }
0x1f89   :  { %v3698_v39 = vmul.f32 %v5951_v38, %v5947_v20 }
0x1f8b   :  { %5302 = vmatprep.mubr.msk.f32.mxu1 %vm379_vm4, %v3698_v39 }
0x1f8c   :  { %5303 = vmatmul.mubr.msk.f32.vlgmr.msra.gmra.mrb[34].mxu1 %vm379_vm4, %v3700_v40 }
0x1f8d   :  { %5584 = vmatpush3.bf16.xpose.msk.msra.mxu1 %vm6172_vm2, %v5579_v28  ;;  %5309 = vmatprep.mubr.msk.f32.mxu1 %vm295_vm1, %v3789_v41 }
0x1f94   :  { %5310 = vmatmul.mubr.msk.f32.vlgmr.msra.gmra.mrb[36].mxu1 %vm295_vm1, %v3791_v42 }
0x205f   :  { %v6669_v47 = vpop.f32.mrb[34].mxu1 }
0x2060   :  { %v6671_v49 = vpop.f32.mrb[35].mxu1 }
0x2067   :  { %v5311_v50 = vpop.f32.mrb[36].mxu1 }
0x2068   :  { %v3876_v52 = vadd.f32 %v5311_v50, %v6189_v23  ;;  %v3870_v34 = vpop.f32.mrb[37].mxu1 }
0x2069   :  { %v3871_v55 = vadd.f32 %v3870_v34, %v6189_v23 }
0x206a   :  { %v3882_v31 = vsel %vm379_vm4, %v3876_v52, -inf }
0x206b   :  { %3883 = vmax.xlane.f32.xlu0 %v3882_v31  ;;  %v3879_v15 = vsel %vm379_vm4, %v3871_v55, -inf  ;;  %v4219_v31 = vld [vmem:[#allocation5 + $0x128] sm:$0xff] }
0x206c   :  { %3880 = vmax.xlane.f32.xlu1 %v3879_v15 }
0x207d   :  { %5796 = vrot.lane.b32.xlu1 %v6541_v11, %s6072_s15 }
0x2081   :  { %3988 = vrot.lane.b32.xlu1 %v6537_v60, %s6070_s13 }
0x2085   :  { %3990 = vrot.lane.b32.xlu1 %v6535_v59, %s6070_s13 }
0x20f8   :  { %v3884_v62 = vpop.xlane.xlu0 %3883 }
0x20f9   :  { %v3886_v10 = vsub.f32 %v3876_v52, %v3884_v62  ;;  %v3881_v7 = vpop.xlane.xlu1 %3880 }
0x20fa   :  { %v3885_v14 = vsub.f32 %v3871_v55, %v3881_v7  ;;  %v4218_v55 = vld [vmem:[#allocation5 + $0x120] sm:$0xff] }
0x20fb   :  { %v3889_v9 = vmul.f32 1.442695, %v3886_v10  ;;  %v5599_v15 = vpack.c.bf16 %v4219_v31, %v4218_v55 }
0x20fc   :  { %v3887_v57 = vmul.f32 1.442695, %v3885_v14 }
0x20fd   :  { %5952 = vpow2.f32 %v3889_v9  ;;  %v5797_v0 = vpop.permute.xlu1 %5796 }
0x20fe   :  { %v5799_v36 = vunpack.i.h.bf16 %v5797_v0  ;;  %v5798_v53 = vunpack.i.l.bf16 %v5797_v0  ;;  %5954 = vpow2.f32 %v3887_v57  ;;  %v4220_v0 = vld [vmem:[#allocation5 + $0x130] sm:$0xff] }
0x2100   :  { %v5585_v1 = vpack.c.bf16 %v5799_v36, %v5798_v53  ;;  %v4221_v36 = vld [vmem:[#allocation5 + $0x138] sm:$0xff] }
0x2101   :  { %v3989_v21 = vpop.permute.xlu1 %3988 }
0x2102   :  { %5586 = vmatprep.subr.bf16.mxu0 %v5585_v1 }
0x2103   :  { %5588 = vmatpush3.bf16.msra.mxu0 %v5585_v1 }
0x2105   :  { %v3991_v22 = vpop.permute.xlu1 %3990 }
0x2107   :  { %v5953_v8 = vpop.eup %5952 }
0x2108   :  { %v3894_v60 = vsel %vm379_vm4, %v5953_v8, 0.0  ;;  %v5955_v44 = vpop.eup %5954 }
0x2109   :  { %3895 = vadd.xlane.f32.xlu0 %v3894_v60  ;;  %v3891_v59 = vsel %vm379_vm4, %v5955_v44, 0.0  ;;  %v5603_v60 = vpack.c.bf16 %v4221_v36, %v4220_v0 }
0x210d   :  { %3892 = vadd.xlane.f32.xlu0 %v3891_v59 }
0x2123   :  { %5801 = vrot.lane.b32.xlu0 %v6541_v11, %s6068_s11 }
0x2196   :  { %v3896_v13 = vpop.xlane.xlu0 %3895 }
0x2197   :  { %5956 = vrcp.f32 %v3896_v13 }
0x219a   :  { %v3893_v26 = vpop.xlane.xlu0 %3892 }
0x219b   :  { %5958 = vrcp.f32 %v3893_v26 }
0x219e   :  { %v5802_v43 = vpop.permute.xlu0 %5801 }
0x219f   :  { %v5804_v45 = vunpack.i.h.bf16 %v5802_v43  ;;  %v5803_v2 = vunpack.i.l.bf16 %v5802_v43 }
0x21a1   :  { %v5589_v17 = vpack.c.bf16 %v5804_v45, %v5803_v2  ;;  %v5957_v18 = vpop.eup %5956 }
0x21a2   :  { %v3900_v20 = vmul.f32 %v5957_v18, %v5953_v8 }
0x21a3   :  { %5591 = vmatprep.subr.msk.bf16.mxu0 %vm6172_vm2, %v5589_v17 }
0x21a5   :  { %v5959_v19 = vpop.eup %5958 }
0x21a6   :  { %v3898_v25 = vmul.f32 %v5959_v19, %v5955_v44 }
0x21a8   :  { %5316 = vmatprep.mubr.msk.f32.mxu0 %vm379_vm4, %v3898_v25  ;;  %v4803_v25 = vld [vmem:[#allocation5 + $0x140] ss:$0 sm:$0xff] }
0x21a9   :  { %5317 = vmatmul.mubr.msk.f32.vlgmr.msra.gmra.mrb[42].mxu0 %vm379_vm4, %v3900_v20 }
0x21aa   :  { %5594 = vmatpush3.bf16.xpose.msk.msra.mxu0 %vm6172_vm2, %v5589_v17  ;;  %5323 = vmatprep.mubr.msk.f32.mxu0 %vm295_vm1, %v3989_v21 }
0x21b1   :  { %5324 = vmatmul.mubr.msk.f32.vlgmr.msra.gmra.mrb[44].mxu0 %vm295_vm1, %v3991_v22 }
0x227c   :  { %v5318_v24 = vpop.f32.mrb[42].mxu0 }
0x227d   :  { %v3979_v37 = vpop.f32.mrb[43].mxu0 }
0x2284   :  { %v5325_v4 = vpop.f32.mrb[44].mxu0 }
0x2285   :  { %v4076_v27 = vadd.f32 %v5325_v4, %v6189_v23  ;;  %v4070_v28 = vpop.f32.mrb[45].mxu0 }
0x2286   :  { %v4071_v35 = vadd.f32 %v4070_v28, %v6189_v23 }
0x2287   :  { %v4082_v38 = vsel %vm379_vm4, %v4076_v27, -inf }
0x2288   :  { %4083 = vmax.xlane.f32.xlu0 %v4082_v38  ;;  %v4079_v39 = vsel %vm379_vm4, %v4071_v35, -inf }
0x2289   :  { %4080 = vmax.xlane.f32.xlu1 %v4079_v39 }
0x229a   :  { %5806 = vrot.lane.b32.xlu1 %v6541_v11, %s6071_s14 }
0x229e   :  { %3364 = vrot.lane.b32.xlu1 %v6589_v30, %s6059_s20 }
0x22a2   :  { %3370 = vrot.lane.b32.xlu1 %v6595_v5, %s6073_s16 }
0x22a6   :  { %3372 = vrot.lane.b32.xlu1 %v6593_v32, %s6073_s16 }
0x22aa   :  { %3380 = vrot.lane.b32.xlu1 %v6617_v3, %s6074_s17 }
0x22ae   :  { %4192 = vrot.lane.b32.xlu1 %v6669_v47, %s6059_s20 }
0x22b2   :  { %4200 = vrot.lane.b32.xlu1 %v5318_v24, %s6073_s16 }
0x2315   :  { %v4084_v16 = vpop.xlane.xlu0 %4083 }
0x2316   :  { %v4086_v23 = vsub.f32 %v4076_v27, %v4084_v16  ;;  %v4081_v11 = vpop.xlane.xlu1 %4080 }
0x2317   :  { %v4085_v40 = vsub.f32 %v4071_v35, %v4081_v11 }
0x2318   :  { %v4089_v41 = vmul.f32 1.442695, %v4086_v23 }
0x2319   :  { %v4087_v30 = vmul.f32 1.442695, %v4085_v40 }
0x231a   :  { %v5807_v42 = vpop.permute.xlu1 %5806 }
0x231b   :  { %5960 = vpow2.f32 %v4087_v30  ;;  %v5809_v5 = vunpack.i.h.bf16 %v5807_v42  ;;  %v5808_v50 = vunpack.i.l.bf16 %v5807_v42 }
0x231c   :  { %5962 = vpow2.f32 %v4089_v41 }
0x231d   :  { %v5595_v32 = vpack.c.bf16 %v5809_v5, %v5808_v50 }
0x231e   :  { %v3365_v10 = vpop.permute.xlu1 %3364 }
0x231f   :  { %5596 = vmatprep.subr.bf16.mxu1 %v5595_v32 }
0x2320   :  { %5598 = vmatpush3.bf16.msra.mxu1 %v5595_v32 }
0x2321   :  { %5600 = vmatprep.subr.bf16.mxu1 %v5599_v15 }
0x2322   :  { %v3371_v9 = vpop.permute.xlu1 %3370 }
0x2325   :  { %v5961_v3 = vpop.eup %5960 }
0x2326   :  { %v4091_v52 = vsel %vm379_vm4, %v5961_v3, 0.0  ;;  %v5963_v47 = vpop.eup %5962  ;;  %v3373_v1 = vpop.permute.xlu1 %3372 }
0x2327   :  { %4092 = vadd.xlane.f32.xlu0 %v4091_v52  ;;  %v4094_v34 = vsel %vm379_vm4, %v5963_v47, 0.0 }
0x232a   :  { %v3381_v13 = vpop.permute.xlu1 %3380 }
0x232b   :  { %4095 = vadd.xlane.f32.xlu0 %v4094_v34 }
0x2341   :  { %3362 = vrot.lane.b32.xlu0 %v6591_v6, %s6059_s20 }
0x2345   :  { %3378 = vrot.lane.b32.xlu0 %v6619_v12, %s6074_s17 }
0x2349   :  { %4190 = vrot.lane.b32.xlu0 %v6671_v49, %s6059_s20  ;;  %s6029_s20 = scalar_lea.vmem %s4669_s19, 32 }
0x234a   :  { %p6030_p2 = scmp.ne.s32.totalorder %s4669_s19, %s6029_s20  ;;  %p6035_p4 = scmp.lt.s32.totalorder %s6029_s20, %s6029_s20 }
0x234c   :  { %p6036_p5 = por %p6035_p4, %p6034_p3 }
0x234d   :  { %4198 = vrot.lane.b32.xlu0 %v3979_v37, %s6073_s16  ;;  %v4193_v37 = vpop.permute.xlu1 %4192 }
0x234e   :  { %p6037_p6 = pnand %p6036_p5, %p6030_p2 }
0x2351   :  { %v4201_v27 = vpop.permute.xlu1 %4200 }
0x23b4   :  { %v4093_v62 = vpop.xlane.xlu0 %4092 }
0x23b5   :  { %5964 = vrcp.f32 %v4093_v62 }
0x23b8   :  { %v4096_v7 = vpop.xlane.xlu0 %4095 }
0x23b9   :  { %5966 = vrcp.f32 %v4096_v7  ;;  %v4401_v7 = vld [vmem:[#allocation5 + $0x150] sm:$0xff] }
0x23bc   :  { %v3363_v14 = vpop.permute.xlu0 %3362 }
0x23bd   :  { %v3384_v12 = vsel %vm295_vm1, %v6587_v29, %v3363_v14  ;;  %v3385_v29 = vsel %vm295_vm1, %v6585_v46, %v3365_v10  ;;  %v4402_v14 = vld [vmem:[#allocation5 + $0x158] sm:$0xff] }
0x23be   :  { %v3386_v44 = vsel %vm379_vm4, %v3384_v12, %v3371_v9  ;;  %v3387_v26 = vsel %vm379_vm4, %v3385_v29, %v3373_v1  ;;  %v5607_v9 = vpack.c.bf16 %v4402_v14, %v4401_v7 }
0x23bf   :  { %v5965_v6 = vpop.eup %5964  ;;  %v3389_v43 = vsel %vm1117_vm5, %v3387_v26, %v3381_v13 }
0x23c0   :  { %v4098_v57 = vmul.f32 %v5965_v6, %v5961_v3  ;;  %v3379_v49 = vpop.permute.xlu0 %3378  ;;  %5608 = vmatprep.subr.bf16.mxu0 %v5607_v9 }
0x23c1   :  { %v3388_v59 = vsel %vm1117_vm5, %v3386_v44, %v3379_v49  ;;  %5610 = vmatpush3.bf16.msra.mxu0 %v5607_v9 }
0x23c2   :  { %5330 = vmatprep.mubr.msk.f32.mxu1 %vm379_vm4, %v4098_v57 }
0x23c3   :  { %v5967_v53 = vpop.eup %5966 }
0x23c4   :  { %v4100_v8 = vmul.f32 %v5967_v53, %v5963_v47  ;;  %v4191_v4 = vpop.permute.xlu0 %4190 }
0x23c6   :  { %5331 = vmatmul.mubr.msk.f32.vlgmr.msra.gmra.mrb[38].mxu1 %vm379_vm4, %v4100_v8 }
0x23c7   :  { %5602 = vmatpush3.bf16.msra.mxu1 %v5599_v15  ;;  %5341 = vmatprep.mubr.msk.f32.mxu1 %vm46_vm0, %v3388_v59 }
0x23c8   :  { %5604 = vmatprep.subr.bf16.mxu1 %v5603_v60  ;;  %v4199_v28 = vpop.permute.xlu0 %4198 }
0x23cb   :  { %5606 = vmatpush3.bf16.msra.mxu1 %v5603_v60 }
0x23ce   :  { %5342 = vmatmul.mubr.msk.f32.vlgmr.msra.gmra.mrb[40].mxu1 %vm46_vm0, %v3389_v43 }
0x2499   :  { %v5332_v45 = vpop.f32.mrb[38].mxu1 }
0x249a   :  { %4208 = vrot.lane.b32.xlu1 %v5332_v45, %s6074_s17  ;;  %v4179_v2 = vpop.f32.mrb[39].mxu1 }
0x249b   :  { %4206 = vrot.lane.b32.xlu0 %v4179_v2, %s6074_s17 }
0x24a1   :  { %v5343_v17 = vpop.f32.mrb[40].mxu1 }
0x24a2   :  { %v4301_v18 = vpop.f32.mrb[41].mxu1  ;;  %v4321_v46 = vadd.f32 %v5343_v17, %v6456_v61  ;;  %v4213_v61 = vsel %vm295_vm1, %v6643_v63, %v4193_v37  ;;  %v4332_v17 = vld [vmem:[#allocation5 + $0x148] sm:$0x3] }
0x24a3   :  { %v4320_v19 = vadd.f32 %v4301_v18, %v6459_v33  ;;  %v4212_v33 = vsel %vm295_vm1, %v6645_v54, %v4191_v4  ;;  %v4215_v16 = vsel %vm379_vm4, %v4213_v61, %v4201_v27  ;;  %v4543_v27 = vld [vmem:[#allocation5 + $0x178] sm:$0xff]  ;;  %v4546_v61 = vld [vmem:[#allocation5 + $0x190] sm:$0xff] }
0x24a4   :  { %v6737_v21 = vadd.f32 %v4803_v25, %v4321_v46  ;;  %v4214_v38 = vsel %vm379_vm4, %v4212_v33, %v4199_v28  ;;  %v4544_v28 = vld [vmem:[#allocation5 + $0x180] sm:$0xff] }
0x24a5   :  { %v4328_v20 = vadd.f32 %v4803_v25, %v4320_v19  ;;  %v4388_v19 = vrot.slane %v4332_v17, %v6134_v48  ;;  %v5615_v33 = vpack.c.bf16 %v4544_v28, %v4543_v27 }
0x24a6   :  { %v4336_v24 = vsel %vm46_vm0, %v6737_v21, 0.0 }
0x24a7   :  { %v4333_v22 = vsel %vm46_vm0, %v4328_v20, 0.0  ;;  %5616 = vmatprep.subr.bf16.mxu1 %v5615_v33 }
0x24a8   :  { %5618 = vmatpush3.bf16.msra.mxu1 %v5615_v33 }
0x24ba   :  { %4334 = vadd.xlane.f32.xlu0 %v4333_v22 }
0x24be   :  { %4337 = vadd.xlane.f32.xlu1 %v4336_v24 }
0x250c   :  { %v4209_v35 = vpop.permute.xlu1 %4208 }
0x250d   :  { %v4207_v39 = vpop.permute.xlu0 %4206  ;;  %v4217_v11 = vsel %vm1117_vm5, %v4215_v16, %v4209_v35  ;;  %v4545_v35 = vld [vmem:[#allocation5 + $0x188] sm:$0xff] }
0x250e   :  { %v4216_v23 = vsel %vm1117_vm5, %v4214_v38, %v4207_v39  ;;  %v5619_v48 = vpack.c.bf16 %v4546_v61, %v4545_v35  ;;  %v4547_v38 = vld [vmem:[#allocation5 + $0x198] sm:$0xff]  ;;  %v4549_v16 = vld [vmem:[#allocation5 + $0x1a8] sm:$0xff] }
0x250f   :  { %5344 = vmatprep.mubr.msk.f32.mxu1 %vm46_vm0, %v4216_v23  ;;  %v4550_v23 = vld [vmem:[#allocation5 + $0x1b0] sm:$0xff] }
0x2510   :  { %5345 = vmatmul.mubr.msk.f32.gmra.mrb[42].mxu1 %vm46_vm0, %v4217_v11  ;;  %5620 = vmatprep.subr.bf16.mxu1 %v5619_v48  ;;  %v5627_v11 = vpack.c.bf16 %v4550_v23, %v4549_v16 }
0x2511   :  { %5622 = vmatpush3.bf16.msra.mxu1 %v5619_v48 }
0x2547   :  { %v4335_v42 = vpop.xlane.xlu0 %4334 }
0x2548   :  { %v4345_v32 = vmul.f32 0.03125, %v4335_v42 }
0x254a   :  { %v4349_v34 = vsub.f32 %v4328_v20, %v4345_v32  ;;  %v4396_v20 = vrot.slane %v4332_v17, %v6136_v51  ;;  %v4548_v51 = vld [vmem:[#allocation5 + $0x1a0] sm:$0xff] }
0x254b   :  { %v4338_v40 = vpop.xlane.xlu1 %4337  ;;  %v5623_v39 = vpack.c.bf16 %v4548_v51, %v4547_v38 }
0x254c   :  { %v4346_v41 = vmul.f32 0.03125, %v4338_v40  ;;  %v4353_v62 = vmul.f32 %v4349_v34, %v4349_v34 }
0x254d   :  { %5624 = vmatprep.subr.bf16.mxu1 %v5623_v39 }
0x254e   :  { %v4350_v54 = vsub.f32 %v6737_v21, %v4346_v41  ;;  %v4357_v10 = vsel %vm46_vm0, %v4353_v62, 0.0  ;;  %5626 = vmatpush3.bf16.msra.mxu1 %v5623_v39 }
0x254f   :  { %5628 = vmatprep.subr.bf16.mxu1 %v5627_v11 }
0x2550   :  { %v4354_v30 = vmul.f32 %v4350_v54, %v4350_v54 }
0x2552   :  { %v4360_v63 = vsel %vm46_vm0, %v4354_v30, 0.0  ;;  %5630 = vmatpush3.bf16.msra.mxu1 %v5627_v11 }
0x2553   :  { %4361 = vadd.xlane.f32.xlu1 %v4360_v63 }
0x25e0   :  { %v4362_v57 = vpop.xlane.xlu1 %4361 }
0x25e1   :  { %v4370_v0 = vmul.f32 0.03125, %v4362_v57 }
0x25e3   :  { %v5346_v5 = vpop.f32.mrb[42].mxu1  ;;  %v4374_v49 = vadd.f32 1e-05, %v4370_v0 }
0x25e4   :  { %v4311_v50 = vpop.f32.mrb[43].mxu1  ;;  %v4323_v3 = vadd.f32 %v5346_v5, %v6474_v56  ;;  %v4403_v56 = vld [vmem:[#allocation5 + $0x160] sm:$0xff] }
0x25e5   :  { %v4322_v52 = vadd.f32 %v4311_v50, %v6477_v58  ;;  %v4404_v58 = vld [vmem:[#allocation5 + $0x168] sm:$0xff]  ;;  %5968 = vrsqrt.f32 %v4374_v49 }
0x25e6   :  { %v6756_v55 = vadd.f32 %v4803_v25, %v4323_v3  ;;  %v5611_v6 = vpack.c.bf16 %v4404_v58, %v4403_v56 }
0x25e7   :  { %v4330_v47 = vadd.f32 %v4803_v25, %v4322_v52 }
0x25e8   :  { %v4342_v15 = vsel %vm46_vm0, %v6756_v55, 0.0  ;;  %5612 = vmatprep.subr.bf16.mxu0 %v5611_v6 }
0x25e9   :  { %v4339_v31 = vsel %vm46_vm0, %v4330_v47, 0.0  ;;  %5614 = vmatpush3.bf16.msra.mxu0 %v5611_v6 }
0x25ea   :  { %4340 = vadd.xlane.f32.xlu0 %v4339_v31 }
0x25ee   :  { %4343 = vadd.xlane.f32.xlu0 %v4342_v15  ;;  %v4804_v15 = vld [vmem:[#allocation5 + $0x170] ss:$0 sm:$0xff] }
0x25ef   :  { %v5969_v2 = vpop.eup %5968 }
0x25f0   :  { %v4382_v18 = vmul.f32 %v5969_v2, %v4350_v54 }
0x25f2   :  { %4358 = vadd.xlane.f32.xlu0 %v4357_v10  ;;  %v4390_v22 = vmul.f32 %v4388_v19, %v4382_v18 }
0x25f4   :  { %v4398_v4 = vadd.f32 %v4396_v20, %v4390_v22 }
0x2677   :  { %v4341_v36 = vpop.xlane.xlu0 %4340 }
0x2678   :  { %v4347_v12 = vmul.f32 0.03125, %v4341_v36 }
0x267a   :  { %v4351_v53 = vsub.f32 %v4330_v47, %v4347_v12 }
0x267b   :  { %v4344_v1 = vpop.xlane.xlu0 %4343 }
0x267c   :  { %v4348_v8 = vmul.f32 0.03125, %v4344_v1  ;;  %v4355_v60 = vmul.f32 %v4351_v53, %v4351_v53 }
0x267e   :  { %v4352_v44 = vsub.f32 %v6756_v55, %v4348_v8  ;;  %v4363_v59 = vsel %vm46_vm0, %v4355_v60, 0.0 }
0x267f   :  { %4364 = vadd.xlane.f32.xlu0 %v4363_v59  ;;  %v4359_v13 = vpop.xlane.xlu0 %4358 }
0x2680   :  { %v4369_v29 = vmul.f32 0.03125, %v4359_v13  ;;  %v4356_v26 = vmul.f32 %v4352_v44, %v4352_v44 }
0x2682   :  { %v4373_v43 = vadd.f32 1e-05, %v4369_v29  ;;  %v4366_v45 = vsel %vm46_vm0, %v4356_v26, 0.0 }
0x2683   :  { %4367 = vadd.xlane.f32.xlu1 %v4366_v45 }
0x2684   :  { %5970 = vrsqrt.f32 %v4373_v43 }
0x268e   :  { %v5971_v25 = vpop.eup %5970 }
0x268f   :  { %v4381_v46 = vmul.f32 %v5971_v25, %v4349_v34 }
0x2691   :  { %v4389_v24 = vmul.f32 %v4388_v19, %v4381_v46 }
0x2693   :  { %v4397_v37 = vadd.f32 %v4396_v20, %v4389_v24 }
0x2695   :  { %5355 = vmatprep.mubr.msk.f32.mxu0 %vm46_vm0, %v4397_v37 }
0x2696   :  { %5356 = vmatmul.mubr.msk.f32.vlgmr.msra.gmra.mrb[46].mxu0 %vm46_vm0, %v4398_v4 }
0x270c   :  { %v4365_v40 = vpop.xlane.xlu0 %4364 }
0x270d   :  { %v4371_v41 = vmul.f32 0.03125, %v4365_v40 }
0x270f   :  { %v4375_v54 = vadd.f32 1e-05, %v4371_v41 }
0x2710   :  { %v4368_v30 = vpop.xlane.xlu1 %4367 }
0x2711   :  { %5972 = vrsqrt.f32 %v4375_v54  ;;  %v4372_v63 = vmul.f32 0.03125, %v4368_v30  ;;  %v4813_v30 = vld [vmem:[#allocation5 + $0x1b8] ss:$0 sm:$0xff] }
0x2713   :  { %v4376_v42 = vadd.f32 1e-05, %v4372_v63 }
0x2715   :  { %5974 = vrsqrt.f32 %v4376_v42 }
0x271b   :  { %v5973_v5 = vpop.eup %5972 }
0x271c   :  { %v4383_v50 = vmul.f32 %v5973_v5, %v4351_v53 }
0x271e   :  { %v4391_v32 = vmul.f32 %v4388_v19, %v4383_v50 }
0x271f   :  { %v5975_v3 = vpop.eup %5974 }
0x2720   :  { %v4399_v52 = vadd.f32 %v4396_v20, %v4391_v32  ;;  %v4384_v47 = vmul.f32 %v5975_v3, %v4352_v44 }
0x2722   :  { %5358 = vmatprep.mubr.msk.f32.mxu0 %vm46_vm0, %v4399_v52  ;;  %v4392_v34 = vmul.f32 %v4388_v19, %v4384_v47 }
0x2724   :  { %v4400_v31 = vadd.f32 %v4396_v20, %v4392_v34 }
0x2726   :  { %5359 = vmatmul.mubr.msk.f32.gmra.mrb[48].mxu0 %vm46_vm0, %v4400_v31 }
0x2769   :  { %v5357_v62 = vpop.f32.mrb[46].mxu0 }
0x276a   :  { %v4494_v10 = vadd.f32 %v5357_v62, %v4804_v15  ;;  %v4488_v7 = vpop.f32.mrb[47].mxu0 }
0x276b   :  { %v4489_v14 = vadd.f32 %v4804_v15, %v4488_v7 }
0x276c   :  { %v4512_v56 = vmul.f32 0.044715, %v4494_v10  ;;  %v4508_v13 = vmul.f32 0.5, %v4494_v10 }
0x276d   :  { %v4511_v9 = vmul.f32 0.044715, %v4489_v14  ;;  %v4507_v44 = vmul.f32 0.5, %v4489_v14 }
0x276e   :  { %v4516_v58 = vmul.f32 %v4512_v56, %v4494_v10 }
0x276f   :  { %v4515_v6 = vmul.f32 %v4511_v9, %v4489_v14 }
0x2770   :  { %v4520_v57 = vmul.f32 %v4516_v58, %v4494_v10 }
0x2771   :  { %v4519_v0 = vmul.f32 %v4515_v6, %v4489_v14 }
0x2772   :  { %v4524_v36 = vadd.f32 %v4520_v57, %v4494_v10 }
0x2773   :  { %v4523_v12 = vadd.f32 %v4519_v0, %v4489_v14 }
0x2774   :  { %v4528_v53 = vmul.f32 0.7978846, %v4524_v36 }
0x2775   :  { %v4527_v49 = vmul.f32 0.7978846, %v4523_v12 }
0x2776   :  { %5976 = vtanh.f32 %v4528_v53 }
0x2777   :  { %5978 = vtanh.f32 %v4527_v49 }
0x2780   :  { %v5977_v1 = vpop.eup %5976 }
0x2781   :  { %v5979_v8 = vpop.eup %5978  ;;  %v4536_v60 = vadd.f32 1.0, %v5977_v1 }
0x2782   :  { %v4535_v59 = vadd.f32 1.0, %v5979_v8 }
0x2783   :  { %v4540_v26 = vmul.f32 %v4536_v60, %v4508_v13 }
0x2784   :  { %v4539_v29 = vmul.f32 %v4535_v59, %v4507_v44 }
0x2786   :  { %5377 = vmatprep.mubr.msk.f32.mxu1 %vm2282_vm6, %v4539_v29 }
0x2787   :  { %5378 = vmatmul.mubr.msk.f32.vlgmr.msra.gmra.mrb[44].mxu1 %vm2282_vm6, %v4540_v26 }
0x27f9   :  { %v5360_v43 = vpop.f32.mrb[48].mxu0 }
0x27fa   :  { %v4504_v45 = vadd.f32 %v5360_v43, %v4804_v15  ;;  %v4498_v2 = vpop.f32.mrb[49].mxu0 }
0x27fb   :  { %v4499_v17 = vadd.f32 %v4804_v15, %v4498_v2 }
0x27fc   :  { %v4514_v18 = vmul.f32 0.044715, %v4504_v45  ;;  %v4510_v38 = vmul.f32 0.5, %v4504_v45 }
0x27fd   :  { %v4513_v19 = vmul.f32 0.044715, %v4499_v17  ;;  %v4509_v61 = vmul.f32 0.5, %v4499_v17 }
0x27fe   :  { %v4518_v25 = vmul.f32 %v4514_v18, %v4504_v45 }
0x27ff   :  { %v4517_v46 = vmul.f32 %v4513_v19, %v4499_v17 }
0x2800   :  { %v4522_v20 = vmul.f32 %v4518_v25, %v4504_v45 }
0x2801   :  { %v4521_v22 = vmul.f32 %v4517_v46, %v4499_v17 }
0x2802   :  { %v4526_v24 = vadd.f32 %v4522_v20, %v4504_v45 }
0x2803   :  { %v4525_v37 = vadd.f32 %v4521_v22, %v4499_v17 }
0x2804   :  { %v4530_v4 = vmul.f32 0.7978846, %v4526_v24 }
0x2805   :  { %v4529_v27 = vmul.f32 0.7978846, %v4525_v37 }
0x2806   :  { %5980 = vtanh.f32 %v4530_v4 }
0x2807   :  { %5982 = vtanh.f32 %v4529_v27 }
0x2810   :  { %v5981_v28 = vpop.eup %5980 }
0x2811   :  { %v5983_v33 = vpop.eup %5982  ;;  %v4538_v35 = vadd.f32 1.0, %v5981_v28 }
0x2812   :  { %v4537_v48 = vadd.f32 1.0, %v5983_v33 }
0x2813   :  { %v4542_v39 = vmul.f32 %v4538_v35, %v4510_v38 }
0x2814   :  { %v4541_v51 = vmul.f32 %v4537_v48, %v4509_v61 }
0x2816   :  { %5380 = vmatprep.mubr.msk.f32.mxu1 %vm2282_vm6, %v4541_v51 }
0x2817   :  { %5381 = vmatmul.mubr.msk.f32.gmra.mrb[46].mxu1 %vm2282_vm6, %v4542_v39 }
0x285a   :  { %v5379_v16 = vpop.f32.mrb[44].mxu1 }
0x285b   :  { %v4630_v23 = vpop.f32.mrb[45].mxu1  ;;  %v4647_v40 = vadd.f32 %v5379_v16, %v6737_v21 }
0x285d   :  { %v4653_v42 = vadd.f32 %v4813_v30, %v4647_v40 }
0x28ea   :  { %v5382_v11 = vpop.f32.mrb[46].mxu1 }
0x28eb   :  { %v4648_v41 = vadd.f32 %v5382_v11, %v6756_v55  ;;  %v4639_v54 = vpop.f32.mrb[47].mxu1 }
0x28ed   :  { %v4654_v63 = vadd.f32 %v4813_v30, %v4648_v41 }
0x28ef   :  { %v4656_v5 = vrot.slane %v4654_v63, 7 }
0x28f1   :  { %v4659_v50 = vsel %vm4658_vm7, %v4653_v42, %v4656_v5 }
0x28f2   :  { %4661 = vst.msk [vmem:[#allocation7] sm:$0x3] %vm4660_vm8, %v4659_v50 }
0x28f3   :  { %6040 = shalt.err (!%p6037_p6)
}
0x28f4   :  { %s6041_s23 = scalar_lea.hbm %s6791_s2, 32 }
0x28f5   :  { %p6042_p7 = scmp.ne.s32.totalorder %s6791_s2, %s6041_s23  ;;  %p6045_p8 = scmp.lt.u32.totalorder %s6041_s23, %s6791_s2 }
0x28f7   :  { %p6047_p9 = pnand %p6045_p8, %p6042_p7 }
0x28f9   :  { %6050 = shalt.err (!%p6047_p9)
}
0x28fa   :  { %4671 = dma.vmem_to_hbm [thread:$0]  %s4669_s19, 32, %s6791_s2, [#allocation4]  }
0x28fb   :  { %6055 = dma.done.wait [#allocation4], 32  }
0x28fc   :  { %6056 = vsyncadd [#allocation4], 4294967264 }
0x28fd   :  { %4675 = vsyncpa [#allocation3], 1 }
0x28fe   :  { %4676 = vsyncpa [#allocation6], 1 }
0x28ff   :  { %4677 = vsyncpa [#allocation4], 1 }

</bundles_post_ra>
